<compile_context>
chip_gen: v5e
topology: v5e:2x2
jax: 0.10.0
libtpu: 0.0.40
codegen_flags: <defaults>
</compile_context>

<pallas_src>
import functools
import math

import jax
import jax.numpy as jnp
from jax.experimental import pallas as pl
from jax.experimental.pallas import tpu as pltpu


# ----------------------------------------------------------------------------
# Pallas kernel: fused channel-mean/max + 7x7 conv (2->1) + sigmoid
# ----------------------------------------------------------------------------
def _spatial_attention_kernel(x_ref, w_ref, o_ref, sum_sc, max_sc, pad_sc, *,
                              n_chan, c_tile, height, width, ksize):
    """x_ref:(c_tile, H*W) VMEM, w_ref:(2*K*K,) SMEM, o_ref:(1, H, W) VMEM."""
    c_idx = pl.program_id(1)
    P = ksize // 2

    # --- init accumulators at the start of the channel reduction (once per batch) ---
    @pl.when(c_idx == 0)
    def _init():
        sum_sc[...] = jnp.zeros_like(sum_sc)
        max_sc[...] = jnp.full_like(max_sc, -jnp.inf)
        pad_sc[...] = jnp.zeros_like(pad_sc)   # zero halo; interior rewritten in finalize

    # --- lane-dense channel reduction for this channel tile ---
    xb = x_ref[...].astype(jnp.float32)        # (c_tile, H*W), all 128 lanes used
    if n_chan % c_tile != 0:
        # cdiv tail block: mask out-of-range channels (partial blocks are padded with
        # unspecified values by Pallas).
        ch = jax.lax.broadcasted_iota(jnp.int32, xb.shape, 0) + c_idx * c_tile
        valid = ch < n_chan
        xb_sum = jnp.where(valid, xb, 0.0)
        xb_max = jnp.where(valid, xb, -jnp.inf)
    else:
        xb_sum = xb
        xb_max = xb
    sum_sc[...] = sum_sc[...] + jnp.sum(xb_sum, axis=0, keepdims=True)
    max_sc[...] = jnp.maximum(max_sc[...], jnp.max(xb_max, axis=0, keepdims=True))

    # --- finalize: 7x7 conv over [avg, max] + sigmoid ---
    @pl.when(c_idx == pl.num_programs(1) - 1)
    def _finalize():
        avg_flat = sum_sc[...] * (1.0 / n_chan)            # (1, H*W)
        max_flat = max_sc[...]                             # (1, H*W)

        # Rebuild the 2-D spatial planes inside the zero-padded scratch, one row at a
        # time (static lane slices only; avoids a lane-splitting reshape).
        for h in range(height):
            lo = h * width
            pad_sc[0, P + h:P + h + 1, P:P + width] = avg_flat[:, lo:lo + width]
            pad_sc[1, P + h:P + h + 1, P:P + width] = max_flat[:, lo:lo + width]

        # Unrolled VPU stencil (2*K*K taps): one aligned band read per (channel, dy),
        # static lane slices for dx, 4 independent accumulator chains.
        accs = [jnp.zeros((height, width), jnp.float32) for _ in range(4)]
        for ci in range(2):
            for dy in range(ksize):
                band = pad_sc[ci, dy:dy + height, :]       # (H, W + K - 1)
                a = ci * 2 + (dy & 1)
                for dx in range(ksize):
                    wv = w_ref[ci * ksize * ksize + dy * ksize + dx]
                    accs[a] = accs[a] + wv * band[:, dx:dx + width]
        acc = (accs[0] + accs[1]) + (accs[2] + accs[3])

        # sigmoid: exp on the EUP, f32 epilogue (v5e-safe)
        o_ref[0, :, :] = (1.0 / (1.0 + jnp.exp(-acc))).astype(o_ref.dtype)


# ----------------------------------------------------------------------------
# Wrapper helpers: VMEM-budget-aware tiling
# ----------------------------------------------------------------------------
def _vmem_limit_bytes():
    cap = 64 * 1024 * 1024                      # conservative default (v7x per-TC VMEM)
    try:
        info = pltpu.get_tpu_info()
        cap = int(getattr(info, "vmem_capacity_bytes", cap))
    except Exception:
        pass
    return min(int(cap * 0.7), 100 * 1024 * 1024)


def _pick_channel_tile(n_chan, hw, itemsize, h, w, ksize, budget_bytes):
    """Largest channel tile whose pipelined buffers fit the VMEM budget."""
    fixed = (2 * hw * 4                                        # sum / max accumulators
             + 2 * (h + ksize - 1) * (w + ksize - 1) * 4       # padded [avg, max] planes
             + 2 * h * w * itemsize)                           # double-buffered output
    avail = max(budget_bytes - fixed, 0)
    n_buf = 3                                                  # worst case (Buffered(3))
    max_c = avail // max(n_buf * hw * itemsize, 1)
    if max_c >= n_chan:
        return n_chan                                          # single reduction step
    # Partial tiles: keep the sublane dim a multiple of 32 (safe for f32/bf16/int8).
    c_tile = int(max_c) // 32 * 32
    if c_tile < 32:
        # TODO(synk): extremely large H*W needs a spatial row-band grid axis instead.
        c_tile = min(n_chan, 32)
    return c_tile


def _make_x_spec(c_tile, hw, block_bytes, n_chan_steps):
    shape = (pl.Squeezed(), c_tile, hw)
    index_map = lambda n, c: (n, c, 0)
    if block_bytes <= 256 * 1024 and n_chan_steps > 3:
        try:   # deepen pipelining for small per-step blocks on long reductions
            return pl.BlockSpec(shape, index_map, pipeline_mode=pl.Buffered(3))
        except Exception:
            pass
    return pl.BlockSpec(shape, index_map)


# ----------------------------------------------------------------------------
# Public entry point
# ----------------------------------------------------------------------------
@functools.partial(jax.jit, static_argnames=("kernel_size",))
def spatial_attention(x, w, kernel_size=7):
    """x: (N, C, H, W) NCHW (native dtype); w: (1, 2, K, K) conv weight -> (N, 1, H, W)."""
    N, C, H, W = x.shape
    K = kernel_size
    assert w.shape == (1, 2, K, K)
    HW = H * W
    out_dtype = x.dtype

    vmem_limit = _vmem_limit_bytes()
    budget = int(vmem_limit * 0.85)
    c_tile = _pick_channel_tile(C, HW, x.dtype.itemsize, H, W, K, budget)
    grid_c = pl.cdiv(C, c_tile)
    grid = (N, grid_c)

    # Lane-dense view of x for the channel reduction (free reshape for contiguous NCHW).
    x_flat = x.reshape(N, C, HW)
    w_flat = w.reshape(2 * K * K).astype(jnp.float32)

    kernel = functools.partial(_spatial_attention_kernel, n_chan=C, c_tile=c_tile,
                               height=H, width=W, ksize=K)

    return pl.pallas_call(
        kernel,
        out_shape=jax.ShapeDtypeStruct((N, 1, H, W), out_dtype),
        grid_spec=pltpu.PrefetchScalarGridSpec(
            num_scalar_prefetch=0,
            grid=grid,
            in_specs=[
                # (N, C, H*W): batch squeezed, channel tiled, flattened (lane-dense) spatial.
                _make_x_spec(c_tile, HW, c_tile * HW * x.dtype.itemsize, grid_c),
                # conv weights: small scalar table in SMEM.
                pl.BlockSpec(memory_space=pltpu.MemorySpace.SMEM),
            ],
            out_specs=pl.BlockSpec((pl.Squeezed(), 1, H, W),
                                   lambda n, c: (n, 0, 0, 0)),
            scratch_shapes=[
                pltpu.VMEM((1, HW), jnp.float32),                      # channel-sum acc
                pltpu.VMEM((1, HW), jnp.float32),                      # channel-max acc
                pltpu.VMEM((2, H + K - 1, W + K - 1), jnp.float32),    # padded [avg, max]
            ],
        ),
        compiler_params=pltpu.CompilerParams(
            dimension_semantics=("parallel", "arbitrary"),
            vmem_limit_bytes=vmem_limit),
    )(x_flat, w_flat)


# ----------------------------------------------------------------------------
# Pure-JAX reference (for correctness check)
# ----------------------------------------------------------------------------
def spatial_attention_ref(x, w, kernel_size=7):
    P = kernel_size // 2
    avg = jnp.mean(x, axis=1, keepdims=True)
    mx = jnp.max(x, axis=1, keepdims=True)
    s = jnp.concatenate([avg, mx], axis=1)                 # (N, 2, H, W)
    y = jax.lax.conv_general_dilated(
        s, w, window_strides=(1, 1), padding=((P, P), (P, P)),
        dimension_numbers=("NCHW", "OIHW", "NCHW"))
    return jax.nn.sigmoid(y)


if __name__ == "__main__":
    N, C, H, W = 2, 4, 16, 16
    K = 7

    key = jax.random.PRNGKey(0)
    kx, kw = jax.random.split(key)
    x = jax.random.normal(kx, (N, C, H, W), jnp.float32)
    # PyTorch Conv2d default init: U(-1/sqrt(fan_in), 1/sqrt(fan_in)), fan_in = 2*K*K
    bound = 1.0 / math.sqrt(2 * K * K)
    w = jax.random.uniform(kw, (1, 2, K, K), jnp.float32, -bound, bound)

    out = spatial_attention(x, w, kernel_size=K)
    out = jax.block_until_ready(out)

    ref = spatial_attention_ref(x, w, kernel_size=K)

    assert out.shape == (N, 1, H, W)
    assert bool(jnp.all(jnp.isfinite(out)))
    assert bool(jnp.all((out >= 0.0) & (out <= 1.0)))      # sigmoid range
    max_err = float(jnp.max(jnp.abs(out - ref)))
    assert max_err < 1e-4, f"max abs error vs reference = {max_err}"
    print("KERNEL_OK")
</pallas_src>

<mosaic_0001>
module attributes {stable_mosaic.version = 11 : i64} {
  func.func @_spatial_attention_kernel(%arg0: i32, %arg1: i32, %arg2: memref<1x4x256xf32, #tpu.memory_space<vmem>>, %arg3: memref<98xf32, #tpu.memory_space<smem>>, %arg4: memref<1x1x16x16xf32, #tpu.memory_space<vmem>>, %arg5: memref<1x256xf32, #tpu.memory_space<vmem>>, %arg6: memref<1x256xf32, #tpu.memory_space<vmem>>, %arg7: memref<2x22x22xf32, #tpu.memory_space<vmem>>) attributes {dimension_semantics = [#tpu.dimension_semantics<parallel>, #tpu.dimension_semantics<arbitrary>], iteration_bounds = array<i64: 2, 1>, scalar_prefetch = 0 : i64, scratch_operands = 3 : i64, tpu.core_type = #tpu.core_type<tc>, window_params = [{transform_indices = @transform_0, window_bounds = array<i64: 1, 4, 256>}, {transform_indices = @transform_1, window_bounds = array<i64: 98>}, {transform_indices = @transform_2, window_bounds = array<i64: 1, 1, 16, 16>}]} {
    %c0_i32 = arith.constant 0 : i32
    %0 = arith.cmpi eq, %arg1, %c0_i32 : i32
    %1 = arith.extui %0 : i1 to i32
    %c0_i32_0 = arith.constant 0 : i32
    %2 = arith.cmpi ne, %1, %c0_i32_0 : i32
    scf.if %2 {
      %cst_14 = arith.constant 0.000000e+00 : f32
      %18 = vector.broadcast %cst_14 : f32 to vector<1x256xf32>
      %c0_15 = arith.constant 0 : index
      %c0_16 = arith.constant 0 : index
      %19 = vector.load %arg5[%c0_15, %c0_16] : memref<1x256xf32, #tpu.memory_space<vmem>>, vector<1x256xf32>
      tpu.vector_store %arg5[%c0_15, %c0_16], %18 {strides = array<i32>} : memref<1x256xf32, #tpu.memory_space<vmem>>, vector<1x256xf32>,
      %cst_17 = arith.constant 0xFF800000 : f32
      %20 = vector.broadcast %cst_17 : f32 to vector<1x256xf32>
      %c0_18 = arith.constant 0 : index
      %c0_19 = arith.constant 0 : index
      %21 = vector.load %arg6[%c0_18, %c0_19] : memref<1x256xf32, #tpu.memory_space<vmem>>, vector<1x256xf32>
      tpu.vector_store %arg6[%c0_18, %c0_19], %20 {strides = array<i32>} : memref<1x256xf32, #tpu.memory_space<vmem>>, vector<1x256xf32>,
      %cst_20 = arith.constant 0.000000e+00 : f32
      %22 = vector.broadcast %cst_20 : f32 to vector<2x22x22xf32>
      %c0_21 = arith.constant 0 : index
      %c0_22 = arith.constant 0 : index
      %c0_23 = arith.constant 0 : index
      %23 = vector.load %arg7[%c0_21, %c0_22, %c0_23] : memref<2x22x22xf32, #tpu.memory_space<vmem>>, vector<2x22x22xf32>
      tpu.vector_store %arg7[%c0_21, %c0_22, %c0_23], %22 {strides = array<i32>} : memref<2x22x22xf32, #tpu.memory_space<vmem>>, vector<2x22x22xf32>,
    } else {
    }
    %c0 = arith.constant 0 : index
    %c0_1 = arith.constant 0 : index
    %c0_2 = arith.constant 0 : index
    %3 = vector.load %arg2[%c0, %c0_1, %c0_2] : memref<1x4x256xf32, #tpu.memory_space<vmem>>, vector<1x4x256xf32>
    %4 = vector.shape_cast %3 : vector<1x4x256xf32> to vector<4x256xf32>
    %c0_3 = arith.constant 0 : index
    %c0_4 = arith.constant 0 : index
    %5 = vector.load %arg5[%c0_3, %c0_4] : memref<1x256xf32, #tpu.memory_space<vmem>>, vector<1x256xf32>
    %cst = arith.constant dense<0.000000e+00> : vector<256xf32>
    %6 = vector.multi_reduction <add>, %4, %cst [0] : vector<4x256xf32> to vector<256xf32>
    %7 = vector.shape_cast %6 : vector<256xf32> to vector<1x256xf32>
    %8 = arith.addf %5, %7 : vector<1x256xf32>
    %c0_5 = arith.constant 0 : index
    %c0_6 = arith.constant 0 : index
    %9 = vector.load %arg5[%c0_5, %c0_6] : memref<1x256xf32, #tpu.memory_space<vmem>>, vector<1x256xf32>
    tpu.vector_store %arg5[%c0_5, %c0_6], %8 {strides = array<i32>} : memref<1x256xf32, #tpu.memory_space<vmem>>, vector<1x256xf32>,
    %c0_7 = arith.constant 0 : index
    %c0_8 = arith.constant 0 : index
    %10 = vector.load %arg6[%c0_7, %c0_8] : memref<1x256xf32, #tpu.memory_space<vmem>>, vector<1x256xf32>
    %cst_9 = arith.constant dense<0xFF800000> : vector<256xf32>
    %11 = vector.multi_reduction <maximumf>, %4, %cst_9 [0] : vector<4x256xf32> to vector<256xf32>
    %12 = vector.shape_cast %11 : vector<256xf32> to vector<1x256xf32>
    %13 = arith.maximumf %10, %12 : vector<1x256xf32>
    %c0_10 = arith.constant 0 : index
    %c0_11 = arith.constant 0 : index
    %14 = vector.load %arg6[%c0_10, %c0_11] : memref<1x256xf32, #tpu.memory_space<vmem>>, vector<1x256xf32>
    tpu.vector_store %arg6[%c0_10, %c0_11], %13 {strides = array<i32>} : memref<1x256xf32, #tpu.memory_space<vmem>>, vector<1x256xf32>,
    %c0_i32_12 = arith.constant 0 : i32
    %15 = arith.cmpi eq, %arg1, %c0_i32_12 : i32
    %16 = arith.extui %15 : i1 to i32
    %c0_i32_13 = arith.constant 0 : i32
    %17 = arith.cmpi ne, %16, %c0_i32_13 : i32
    scf.if %17 {
      %c0_14 = arith.constant 0 : index
      %c0_15 = arith.constant 0 : index
      %18 = vector.load %arg5[%c0_14, %c0_15] : memref<1x256xf32, #tpu.memory_space<vmem>>, vector<1x256xf32>
      %cst_16 = arith.constant 2.500000e-01 : f32
      %19 = vector.broadcast %cst_16 : f32 to vector<1x256xf32>
      %20 = arith.mulf %18, %19 : vector<1x256xf32>
      %c0_17 = arith.constant 0 : index
      %c0_18 = arith.constant 0 : index
      %21 = vector.load %arg6[%c0_17, %c0_18] : memref<1x256xf32, #tpu.memory_space<vmem>>, vector<1x256xf32>
      %22 = vector.extract_strided_slice %20 {offsets = [0, 0], sizes = [1, 16], strides = [1, 1]} : vector<1x256xf32> to vector<1x16xf32>
      %c0_19 = arith.constant 0 : index
      %c3 = arith.constant 3 : index
      %c3_20 = arith.constant 3 : index
      %23 = vector.load %arg7[%c0_19, %c3, %c3_20] : memref<2x22x22xf32, #tpu.memory_space<vmem>>, vector<1x1x16xf32>
      %24 = vector.shape_cast %23 : vector<1x1x16xf32> to vector<1x16xf32>
      %25 = vector.shape_cast %22 : vector<1x16xf32> to vector<1x1x16xf32>
      tpu.vector_store %arg7[%c0_19, %c3, %c3_20], %25 {strides = array<i32>} : memref<2x22x22xf32, #tpu.memory_space<vmem>>, vector<1x1x16xf32>,
      %26 = vector.extract_strided_slice %21 {offsets = [0, 0], sizes = [1, 16], strides = [1, 1]} : vector<1x256xf32> to vector<1x16xf32>
      %c1 = arith.constant 1 : index
      %c3_21 = arith.constant 3 : index
      %c3_22 = arith.constant 3 : index
      %27 = vector.load %arg7[%c1, %c3_21, %c3_22] : memref<2x22x22xf32, #tpu.memory_space<vmem>>, vector<1x1x16xf32>
      %28 = vector.shape_cast %27 : vector<1x1x16xf32> to vector<1x16xf32>
      %29 = vector.shape_cast %26 : vector<1x16xf32> to vector<1x1x16xf32>
      tpu.vector_store %arg7[%c1, %c3_21, %c3_22], %29 {strides = array<i32>} : memref<2x22x22xf32, #tpu.memory_space<vmem>>, vector<1x1x16xf32>,
      %30 = vector.extract_strided_slice %20 {offsets = [0, 16], sizes = [1, 16], strides = [1, 1]} : vector<1x256xf32> to vector<1x16xf32>
      %c0_23 = arith.constant 0 : index
      %c4 = arith.constant 4 : index
      %c3_24 = arith.constant 3 : index
      %31 = vector.load %arg7[%c0_23, %c4, %c3_24] : memref<2x22x22xf32, #tpu.memory_space<vmem>>, vector<1x1x16xf32>
      %32 = vector.shape_cast %31 : vector<1x1x16xf32> to vector<1x16xf32>
      %33 = vector.shape_cast %30 : vector<1x16xf32> to vector<1x1x16xf32>
      tpu.vector_store %arg7[%c0_23, %c4, %c3_24], %33 {strides = array<i32>} : memref<2x22x22xf32, #tpu.memory_space<vmem>>, vector<1x1x16xf32>,
      %34 = vector.extract_strided_slice %21 {offsets = [0, 16], sizes = [1, 16], strides = [1, 1]} : vector<1x256xf32> to vector<1x16xf32>
      %c1_25 = arith.constant 1 : index
      %c4_26 = arith.constant 4 : index
      %c3_27 = arith.constant 3 : index
      %35 = vector.load %arg7[%c1_25, %c4_26, %c3_27] : memref<2x22x22xf32, #tpu.memory_space<vmem>>, vector<1x1x16xf32>
      %36 = vector.shape_cast %35 : vector<1x1x16xf32> to vector<1x16xf32>
      %37 = vector.shape_cast %34 : vector<1x16xf32> to vector<1x1x16xf32>
      tpu.vector_store %arg7[%c1_25, %c4_26, %c3_27], %37 {strides = array<i32>} : memref<2x22x22xf32, #tpu.memory_space<vmem>>, vector<1x1x16xf32>,
      %38 = vector.extract_strided_slice %20 {offsets = [0, 32], sizes = [1, 16], strides = [1, 1]} : vector<1x256xf32> to vector<1x16xf32>
      %c0_28 = arith.constant 0 : index
      %c5 = arith.constant 5 : index
      %c3_29 = arith.constant 3 : index
      %39 = vector.load %arg7[%c0_28, %c5, %c3_29] : memref<2x22x22xf32, #tpu.memory_space<vmem>>, vector<1x1x16xf32>
      %40 = vector.shape_cast %39 : vector<1x1x16xf32> to vector<1x16xf32>
      %41 = vector.shape_cast %38 : vector<1x16xf32> to vector<1x1x16xf32>
      tpu.vector_store %arg7[%c0_28, %c5, %c3_29], %41 {strides = array<i32>} : memref<2x22x22xf32, #tpu.memory_space<vmem>>, vector<1x1x16xf32>,
      %42 = vector.extract_strided_slice %21 {offsets = [0, 32], sizes = [1, 16], strides = [1, 1]} : vector<1x256xf32> to vector<1x16xf32>
      %c1_30 = arith.constant 1 : index
      %c5_31 = arith.constant 5 : index
      %c3_32 = arith.constant 3 : index
      %43 = vector.load %arg7[%c1_30, %c5_31, %c3_32] : memref<2x22x22xf32, #tpu.memory_space<vmem>>, vector<1x1x16xf32>
      %44 = vector.shape_cast %43 : vector<1x1x16xf32> to vector<1x16xf32>
      %45 = vector.shape_cast %42 : vector<1x16xf32> to vector<1x1x16xf32>
      tpu.vector_store %arg7[%c1_30, %c5_31, %c3_32], %45 {strides = array<i32>} : memref<2x22x22xf32, #tpu.memory_space<vmem>>, vector<1x1x16xf32>,
      %46 = vector.extract_strided_slice %20 {offsets = [0, 48], sizes = [1, 16], strides = [1, 1]} : vector<1x256xf32> to vector<1x16xf32>
      %c0_33 = arith.constant 0 : index
      %c6 = arith.constant 6 : index
      %c3_34 = arith.constant 3 : index
      %47 = vector.load %arg7[%c0_33, %c6, %c3_34] : memref<2x22x22xf32, #tpu.memory_space<vmem>>, vector<1x1x16xf32>
      %48 = vector.shape_cast %47 : vector<1x1x16xf32> to vector<1x16xf32>
      %49 = vector.shape_cast %46 : vector<1x16xf32> to vector<1x1x16xf32>
      tpu.vector_store %arg7[%c0_33, %c6, %c3_34], %49 {strides = array<i32>} : memref<2x22x22xf32, #tpu.memory_space<vmem>>, vector<1x1x16xf32>,
      %50 = vector.extract_strided_slice %21 {offsets = [0, 48], sizes = [1, 16], strides = [1, 1]} : vector<1x256xf32> to vector<1x16xf32>
      %c1_35 = arith.constant 1 : index
      %c6_36 = arith.constant 6 : index
      %c3_37 = arith.constant 3 : index
      %51 = vector.load %arg7[%c1_35, %c6_36, %c3_37] : memref<2x22x22xf32, #tpu.memory_space<vmem>>, vector<1x1x16xf32>
      %52 = vector.shape_cast %51 : vector<1x1x16xf32> to vector<1x16xf32>
      %53 = vector.shape_cast %50 : vector<1x16xf32> to vector<1x1x16xf32>
      tpu.vector_store %arg7[%c1_35, %c6_36, %c3_37], %53 {strides = array<i32>} : memref<2x22x22xf32, #tpu.memory_space<vmem>>, vector<1x1x16xf32>,
      %54 = vector.extract_strided_slice %20 {offsets = [0, 64], sizes = [1, 16], strides = [1, 1]} : vector<1x256xf32> to vector<1x16xf32>
      %c0_38 = arith.constant 0 : index
      %c7 = arith.constant 7 : index
      %c3_39 = arith.constant 3 : index
      %55 = vector.load %arg7[%c0_38, %c7, %c3_39] : memref<2x22x22xf32, #tpu.memory_space<vmem>>, vector<1x1x16xf32>
      %56 = vector.shape_cast %55 : vector<1x1x16xf32> to vector<1x16xf32>
      %57 = vector.shape_cast %54 : vector<1x16xf32> to vector<1x1x16xf32>
      tpu.vector_store %arg7[%c0_38, %c7, %c3_39], %57 {strides = array<i32>} : memref<2x22x22xf32, #tpu.memory_space<vmem>>, vector<1x1x16xf32>,
      %58 = vector.extract_strided_slice %21 {offsets = [0, 64], sizes = [1, 16], strides = [1, 1]} : vector<1x256xf32> to vector<1x16xf32>
      %c1_40 = arith.constant 1 : index
      %c7_41 = arith.constant 7 : index
      %c3_42 = arith.constant 3 : index
      %59 = vector.load %arg7[%c1_40, %c7_41, %c3_42] : memref<2x22x22xf32, #tpu.memory_space<vmem>>, vector<1x1x16xf32>
      %60 = vector.shape_cast %59 : vector<1x1x16xf32> to vector<1x16xf32>
      %61 = vector.shape_cast %58 : vector<1x16xf32> to vector<1x1x16xf32>
      tpu.vector_store %arg7[%c1_40, %c7_41, %c3_42], %61 {strides = array<i32>} : memref<2x22x22xf32, #tpu.memory_space<vmem>>, vector<1x1x16xf32>,
      %62 = vector.extract_strided_slice %20 {offsets = [0, 80], sizes = [1, 16], strides = [1, 1]} : vector<1x256xf32> to vector<1x16xf32>
      %c0_43 = arith.constant 0 : index
      %c8 = arith.constant 8 : index
      %c3_44 = arith.constant 3 : index
      %63 = vector.load %arg7[%c0_43, %c8, %c3_44] : memref<2x22x22xf32, #tpu.memory_space<vmem>>, vector<1x1x16xf32>
      %64 = vector.shape_cast %63 : vector<1x1x16xf32> to vector<1x16xf32>
      %65 = vector.shape_cast %62 : vector<1x16xf32> to vector<1x1x16xf32>
      tpu.vector_store %arg7[%c0_43, %c8, %c3_44], %65 {strides = array<i32>} : memref<2x22x22xf32, #tpu.memory_space<vmem>>, vector<1x1x16xf32>,
      %66 = vector.extract_strided_slice %21 {offsets = [0, 80], sizes = [1, 16], strides = [1, 1]} : vector<1x256xf32> to vector<1x16xf32>
      %c1_45 = arith.constant 1 : index
      %c8_46 = arith.constant 8 : index
      %c3_47 = arith.constant 3 : index
      %67 = vector.load %arg7[%c1_45, %c8_46, %c3_47] : memref<2x22x22xf32, #tpu.memory_space<vmem>>, vector<1x1x16xf32>
      %68 = vector.shape_cast %67 : vector<1x1x16xf32> to vector<1x16xf32>
      %69 = vector.shape_cast %66 : vector<1x16xf32> to vector<1x1x16xf32>
      tpu.vector_store %arg7[%c1_45, %c8_46, %c3_47], %69 {strides = array<i32>} : memref<2x22x22xf32, #tpu.memory_space<vmem>>, vector<1x1x16xf32>,
      %70 = vector.extract_strided_slice %20 {offsets = [0, 96], sizes = [1, 16], strides = [1, 1]} : vector<1x256xf32> to vector<1x16xf32>
      %c0_48 = arith.constant 0 : index
      %c9 = arith.constant 9 : index
      %c3_49 = arith.constant 3 : index
      %71 = vector.load %arg7[%c0_48, %c9, %c3_49] : memref<2x22x22xf32, #tpu.memory_space<vmem>>, vector<1x1x16xf32>
      %72 = vector.shape_cast %71 : vector<1x1x16xf32> to vector<1x16xf32>
      %73 = vector.shape_cast %70 : vector<1x16xf32> to vector<1x1x16xf32>
      tpu.vector_store %arg7[%c0_48, %c9, %c3_49], %73 {strides = array<i32>} : memref<2x22x22xf32, #tpu.memory_space<vmem>>, vector<1x1x16xf32>,
      %74 = vector.extract_strided_slice %21 {offsets = [0, 96], sizes = [1, 16], strides = [1, 1]} : vector<1x256xf32> to vector<1x16xf32>
      %c1_50 = arith.constant 1 : index
      %c9_51 = arith.constant 9 : index
      %c3_52 = arith.constant 3 : index
      %75 = vector.load %arg7[%c1_50, %c9_51, %c3_52] : memref<2x22x22xf32, #tpu.memory_space<vmem>>, vector<1x1x16xf32>
      %76 = vector.shape_cast %75 : vector<1x1x16xf32> to vector<1x16xf32>
      %77 = vector.shape_cast %74 : vector<1x16xf32> to vector<1x1x16xf32>
      tpu.vector_store %arg7[%c1_50, %c9_51, %c3_52], %77 {strides = array<i32>} : memref<2x22x22xf32, #tpu.memory_space<vmem>>, vector<1x1x16xf32>,
      %78 = vector.extract_strided_slice %20 {offsets = [0, 112], sizes = [1, 16], strides = [1, 1]} : vector<1x256xf32> to vector<1x16xf32>
      %c0_53 = arith.constant 0 : index
      %c10 = arith.constant 10 : index
      %c3_54 = arith.constant 3 : index
      %79 = vector.load %arg7[%c0_53, %c10, %c3_54] : memref<2x22x22xf32, #tpu.memory_space<vmem>>, vector<1x1x16xf32>
      %80 = vector.shape_cast %79 : vector<1x1x16xf32> to vector<1x16xf32>
      %81 = vector.shape_cast %78 : vector<1x16xf32> to vector<1x1x16xf32>
      tpu.vector_store %arg7[%c0_53, %c10, %c3_54], %81 {strides = array<i32>} : memref<2x22x22xf32, #tpu.memory_space<vmem>>, vector<1x1x16xf32>,
      %82 = vector.extract_strided_slice %21 {offsets = [0, 112], sizes = [1, 16], strides = [1, 1]} : vector<1x256xf32> to vector<1x16xf32>
      %c1_55 = arith.constant 1 : index
      %c10_56 = arith.constant 10 : index
      %c3_57 = arith.constant 3 : index
      %83 = vector.load %arg7[%c1_55, %c10_56, %c3_57] : memref<2x22x22xf32, #tpu.memory_space<vmem>>, vector<1x1x16xf32>
      %84 = vector.shape_cast %83 : vector<1x1x16xf32> to vector<1x16xf32>
      %85 = vector.shape_cast %82 : vector<1x16xf32> to vector<1x1x16xf32>
      tpu.vector_store %arg7[%c1_55, %c10_56, %c3_57], %85 {strides = array<i32>} : memref<2x22x22xf32, #tpu.memory_space<vmem>>, vector<1x1x16xf32>,
      %86 = vector.extract_strided_slice %20 {offsets = [0, 128], sizes = [1, 16], strides = [1, 1]} : vector<1x256xf32> to vector<1x16xf32>
      %c0_58 = arith.constant 0 : index
      %c11 = arith.constant 11 : index
      %c3_59 = arith.constant 3 : index
      %87 = vector.load %arg7[%c0_58, %c11, %c3_59] : memref<2x22x22xf32, #tpu.memory_space<vmem>>, vector<1x1x16xf32>
      %88 = vector.shape_cast %87 : vector<1x1x16xf32> to vector<1x16xf32>
      %89 = vector.shape_cast %86 : vector<1x16xf32> to vector<1x1x16xf32>
      tpu.vector_store %arg7[%c0_58, %c11, %c3_59], %89 {strides = array<i32>} : memref<2x22x22xf32, #tpu.memory_space<vmem>>, vector<1x1x16xf32>,
      %90 = vector.extract_strided_slice %21 {offsets = [0, 128], sizes = [1, 16], strides = [1, 1]} : vector<1x256xf32> to vector<1x16xf32>
      %c1_60 = arith.constant 1 : index
      %c11_61 = arith.constant 11 : index
      %c3_62 = arith.constant 3 : index
      %91 = vector.load %arg7[%c1_60, %c11_61, %c3_62] : memref<2x22x22xf32, #tpu.memory_space<vmem>>, vector<1x1x16xf32>
      %92 = vector.shape_cast %91 : vector<1x1x16xf32> to vector<1x16xf32>
      %93 = vector.shape_cast %90 : vector<1x16xf32> to vector<1x1x16xf32>
      tpu.vector_store %arg7[%c1_60, %c11_61, %c3_62], %93 {strides = array<i32>} : memref<2x22x22xf32, #tpu.memory_space<vmem>>, vector<1x1x16xf32>,
      %94 = vector.extract_strided_slice %20 {offsets = [0, 144], sizes = [1, 16], strides = [1, 1]} : vector<1x256xf32> to vector<1x16xf32>
      %c0_63 = arith.constant 0 : index
      %c12 = arith.constant 12 : index
      %c3_64 = arith.constant 3 : index
      %95 = vector.load %arg7[%c0_63, %c12, %c3_64] : memref<2x22x22xf32, #tpu.memory_space<vmem>>, vector<1x1x16xf32>
      %96 = vector.shape_cast %95 : vector<1x1x16xf32> to vector<1x16xf32>
      %97 = vector.shape_cast %94 : vector<1x16xf32> to vector<1x1x16xf32>
      tpu.vector_store %arg7[%c0_63, %c12, %c3_64], %97 {strides = array<i32>} : memref<2x22x22xf32, #tpu.memory_space<vmem>>, vector<1x1x16xf32>,
      %98 = vector.extract_strided_slice %21 {offsets = [0, 144], sizes = [1, 16], strides = [1, 1]} : vector<1x256xf32> to vector<1x16xf32>
      %c1_65 = arith.constant 1 : index
      %c12_66 = arith.constant 12 : index
      %c3_67 = arith.constant 3 : index
      %99 = vector.load %arg7[%c1_65, %c12_66, %c3_67] : memref<2x22x22xf32, #tpu.memory_space<vmem>>, vector<1x1x16xf32>
      %100 = vector.shape_cast %99 : vector<1x1x16xf32> to vector<1x16xf32>
      %101 = vector.shape_cast %98 : vector<1x16xf32> to vector<1x1x16xf32>
      tpu.vector_store %arg7[%c1_65, %c12_66, %c3_67], %101 {strides = array<i32>} : memref<2x22x22xf32, #tpu.memory_space<vmem>>, vector<1x1x16xf32>,
      %102 = vector.extract_strided_slice %20 {offsets = [0, 160], sizes = [1, 16], strides = [1, 1]} : vector<1x256xf32> to vector<1x16xf32>
      %c0_68 = arith.constant 0 : index
      %c13 = arith.constant 13 : index
      %c3_69 = arith.constant 3 : index
      %103 = vector.load %arg7[%c0_68, %c13, %c3_69] : memref<2x22x22xf32, #tpu.memory_space<vmem>>, vector<1x1x16xf32>
      %104 = vector.shape_cast %103 : vector<1x1x16xf32> to vector<1x16xf32>
      %105 = vector.shape_cast %102 : vector<1x16xf32> to vector<1x1x16xf32>
      tpu.vector_store %arg7[%c0_68, %c13, %c3_69], %105 {strides = array<i32>} : memref<2x22x22xf32, #tpu.memory_space<vmem>>, vector<1x1x16xf32>,
      %106 = vector.extract_strided_slice %21 {offsets = [0, 160], sizes = [1, 16], strides = [1, 1]} : vector<1x256xf32> to vector<1x16xf32>
      %c1_70 = arith.constant 1 : index
      %c13_71 = arith.constant 13 : index
      %c3_72 = arith.constant 3 : index
      %107 = vector.load %arg7[%c1_70, %c13_71, %c3_72] : memref<2x22x22xf32, #tpu.memory_space<vmem>>, vector<1x1x16xf32>
      %108 = vector.shape_cast %107 : vector<1x1x16xf32> to vector<1x16xf32>
      %109 = vector.shape_cast %106 : vector<1x16xf32> to vector<1x1x16xf32>
      tpu.vector_store %arg7[%c1_70, %c13_71, %c3_72], %109 {strides = array<i32>} : memref<2x22x22xf32, #tpu.memory_space<vmem>>, vector<1x1x16xf32>,
      %110 = vector.extract_strided_slice %20 {offsets = [0, 176], sizes = [1, 16], strides = [1, 1]} : vector<1x256xf32> to vector<1x16xf32>
      %c0_73 = arith.constant 0 : index
      %c14 = arith.constant 14 : index
      %c3_74 = arith.constant 3 : index
      %111 = vector.load %arg7[%c0_73, %c14, %c3_74] : memref<2x22x22xf32, #tpu.memory_space<vmem>>, vector<1x1x16xf32>
      %112 = vector.shape_cast %111 : vector<1x1x16xf32> to vector<1x16xf32>
      %113 = vector.shape_cast %110 : vector<1x16xf32> to vector<1x1x16xf32>
      tpu.vector_store %arg7[%c0_73, %c14, %c3_74], %113 {strides = array<i32>} : memref<2x22x22xf32, #tpu.memory_space<vmem>>, vector<1x1x16xf32>,
      %114 = vector.extract_strided_slice %21 {offsets = [0, 176], sizes = [1, 16], strides = [1, 1]} : vector<1x256xf32> to vector<1x16xf32>
      %c1_75 = arith.constant 1 : index
      %c14_76 = arith.constant 14 : index
      %c3_77 = arith.constant 3 : index
      %115 = vector.load %arg7[%c1_75, %c14_76, %c3_77] : memref<2x22x22xf32, #tpu.memory_space<vmem>>, vector<1x1x16xf32>
      %116 = vector.shape_cast %115 : vector<1x1x16xf32> to vector<1x16xf32>
      %117 = vector.shape_cast %114 : vector<1x16xf32> to vector<1x1x16xf32>
      tpu.vector_store %arg7[%c1_75, %c14_76, %c3_77], %117 {strides = array<i32>} : memref<2x22x22xf32, #tpu.memory_space<vmem>>, vector<1x1x16xf32>,
      %118 = vector.extract_strided_slice %20 {offsets = [0, 192], sizes = [1, 16], strides = [1, 1]} : vector<1x256xf32> to vector<1x16xf32>
      %c0_78 = arith.constant 0 : index
      %c15 = arith.constant 15 : index
      %c3_79 = arith.constant 3 : index
      %119 = vector.load %arg7[%c0_78, %c15, %c3_79] : memref<2x22x22xf32, #tpu.memory_space<vmem>>, vector<1x1x16xf32>
      %120 = vector.shape_cast %119 : vector<1x1x16xf32> to vector<1x16xf32>
      %121 = vector.shape_cast %118 : vector<1x16xf32> to vector<1x1x16xf32>
      tpu.vector_store %arg7[%c0_78, %c15, %c3_79], %121 {strides = array<i32>} : memref<2x22x22xf32, #tpu.memory_space<vmem>>, vector<1x1x16xf32>,
      %122 = vector.extract_strided_slice %21 {offsets = [0, 192], sizes = [1, 16], strides = [1, 1]} : vector<1x256xf32> to vector<1x16xf32>
      %c1_80 = arith.constant 1 : index
      %c15_81 = arith.constant 15 : index
      %c3_82 = arith.constant 3 : index
      %123 = vector.load %arg7[%c1_80, %c15_81, %c3_82] : memref<2x22x22xf32, #tpu.memory_space<vmem>>, vector<1x1x16xf32>
      %124 = vector.shape_cast %123 : vector<1x1x16xf32> to vector<1x16xf32>
      %125 = vector.shape_cast %122 : vector<1x16xf32> to vector<1x1x16xf32>
      tpu.vector_store %arg7[%c1_80, %c15_81, %c3_82], %125 {strides = array<i32>} : memref<2x22x22xf32, #tpu.memory_space<vmem>>, vector<1x1x16xf32>,
      %126 = vector.extract_strided_slice %20 {offsets = [0, 208], sizes = [1, 16], strides = [1, 1]} : vector<1x256xf32> to vector<1x16xf32>
      %c0_83 = arith.constant 0 : index
      %c16 = arith.constant 16 : index
      %c3_84 = arith.constant 3 : index
      %127 = vector.load %arg7[%c0_83, %c16, %c3_84] : memref<2x22x22xf32, #tpu.memory_space<vmem>>, vector<1x1x16xf32>
      %128 = vector.shape_cast %127 : vector<1x1x16xf32> to vector<1x16xf32>
      %129 = vector.shape_cast %126 : vector<1x16xf32> to vector<1x1x16xf32>
      tpu.vector_store %arg7[%c0_83, %c16, %c3_84], %129 {strides = array<i32>} : memref<2x22x22xf32, #tpu.memory_space<vmem>>, vector<1x1x16xf32>,
      %130 = vector.extract_strided_slice %21 {offsets = [0, 208], sizes = [1, 16], strides = [1, 1]} : vector<1x256xf32> to vector<1x16xf32>
      %c1_85 = arith.constant 1 : index
      %c16_86 = arith.constant 16 : index
      %c3_87 = arith.constant 3 : index
      %131 = vector.load %arg7[%c1_85, %c16_86, %c3_87] : memref<2x22x22xf32, #tpu.memory_space<vmem>>, vector<1x1x16xf32>
      %132 = vector.shape_cast %131 : vector<1x1x16xf32> to vector<1x16xf32>
      %133 = vector.shape_cast %130 : vector<1x16xf32> to vector<1x1x16xf32>
      tpu.vector_store %arg7[%c1_85, %c16_86, %c3_87], %133 {strides = array<i32>} : memref<2x22x22xf32, #tpu.memory_space<vmem>>, vector<1x1x16xf32>,
      %134 = vector.extract_strided_slice %20 {offsets = [0, 224], sizes = [1, 16], strides = [1, 1]} : vector<1x256xf32> to vector<1x16xf32>
      %c0_88 = arith.constant 0 : index
      %c17 = arith.constant 17 : index
      %c3_89 = arith.constant 3 : index
      %135 = vector.load %arg7[%c0_88, %c17, %c3_89] : memref<2x22x22xf32, #tpu.memory_space<vmem>>, vector<1x1x16xf32>
      %136 = vector.shape_cast %135 : vector<1x1x16xf32> to vector<1x16xf32>
      %137 = vector.shape_cast %134 : vector<1x16xf32> to vector<1x1x16xf32>
      tpu.vector_store %arg7[%c0_88, %c17, %c3_89], %137 {strides = array<i32>} : memref<2x22x22xf32, #tpu.memory_space<vmem>>, vector<1x1x16xf32>,
      %138 = vector.extract_strided_slice %21 {offsets = [0, 224], sizes = [1, 16], strides = [1, 1]} : vector<1x256xf32> to vector<1x16xf32>
      %c1_90 = arith.constant 1 : index
      %c17_91 = arith.constant 17 : index
      %c3_92 = arith.constant 3 : index
      %139 = vector.load %arg7[%c1_90, %c17_91, %c3_92] : memref<2x22x22xf32, #tpu.memory_space<vmem>>, vector<1x1x16xf32>
      %140 = vector.shape_cast %139 : vector<1x1x16xf32> to vector<1x16xf32>
      %141 = vector.shape_cast %138 : vector<1x16xf32> to vector<1x1x16xf32>
      tpu.vector_store %arg7[%c1_90, %c17_91, %c3_92], %141 {strides = array<i32>} : memref<2x22x22xf32, #tpu.memory_space<vmem>>, vector<1x1x16xf32>,
      %142 = vector.extract_strided_slice %20 {offsets = [0, 240], sizes = [1, 16], strides = [1, 1]} : vector<1x256xf32> to vector<1x16xf32>
      %c0_93 = arith.constant 0 : index
      %c18 = arith.constant 18 : index
      %c3_94 = arith.constant 3 : index
      %143 = vector.load %arg7[%c0_93, %c18, %c3_94] : memref<2x22x22xf32, #tpu.memory_space<vmem>>, vector<1x1x16xf32>
      %144 = vector.shape_cast %143 : vector<1x1x16xf32> to vector<1x16xf32>
      %145 = vector.shape_cast %142 : vector<1x16xf32> to vector<1x1x16xf32>
      tpu.vector_store %arg7[%c0_93, %c18, %c3_94], %145 {strides = array<i32>} : memref<2x22x22xf32, #tpu.memory_space<vmem>>, vector<1x1x16xf32>,
      %146 = vector.extract_strided_slice %21 {offsets = [0, 240], sizes = [1, 16], strides = [1, 1]} : vector<1x256xf32> to vector<1x16xf32>
      %c1_95 = arith.constant 1 : index
      %c18_96 = arith.constant 18 : index
      %c3_97 = arith.constant 3 : index
      %147 = vector.load %arg7[%c1_95, %c18_96, %c3_97] : memref<2x22x22xf32, #tpu.memory_space<vmem>>, vector<1x1x16xf32>
      %148 = vector.shape_cast %147 : vector<1x1x16xf32> to vector<1x16xf32>
      %149 = vector.shape_cast %146 : vector<1x16xf32> to vector<1x1x16xf32>
      tpu.vector_store %arg7[%c1_95, %c18_96, %c3_97], %149 {strides = array<i32>} : memref<2x22x22xf32, #tpu.memory_space<vmem>>, vector<1x1x16xf32>,
      %cst_98 = arith.constant 0.000000e+00 : f32
      %150 = vector.broadcast %cst_98 : f32 to vector<16x16xf32>
      %cst_99 = arith.constant 0.000000e+00 : f32
      %151 = vector.broadcast %cst_99 : f32 to vector<16x16xf32>
      %cst_100 = arith.constant 0.000000e+00 : f32
      %152 = vector.broadcast %cst_100 : f32 to vector<16x16xf32>
      %cst_101 = arith.constant 0.000000e+00 : f32
      %153 = vector.broadcast %cst_101 : f32 to vector<16x16xf32>
      %c0_102 = arith.constant 0 : index
      %c0_103 = arith.constant 0 : index
      %c0_104 = arith.constant 0 : index
      %154 = vector.load %arg7[%c0_102, %c0_103, %c0_104] : memref<2x22x22xf32, #tpu.memory_space<vmem>>, vector<1x16x22xf32>
      %155 = vector.shape_cast %154 : vector<1x16x22xf32> to vector<16x22xf32>
      %c0_105 = arith.constant 0 : index
      %156 = memref.load %arg3[%c0_105] : memref<98xf32, #tpu.memory_space<smem>>
      %157 = vector.extract_strided_slice %155 {offsets = [0, 0], sizes = [16, 16], strides = [1, 1]} : vector<16x22xf32> to vector<16x16xf32>
      %158 = vector.broadcast %156 : f32 to vector<16x16xf32>
      %159 = arith.mulf %158, %157 : vector<16x16xf32>
      %160 = arith.addf %150, %159 : vector<16x16xf32>
      %c1_106 = arith.constant 1 : index
      %161 = memref.load %arg3[%c1_106] : memref<98xf32, #tpu.memory_space<smem>>
      %162 = vector.extract_strided_slice %155 {offsets = [0, 1], sizes = [16, 16], strides = [1, 1]} : vector<16x22xf32> to vector<16x16xf32>
      %163 = vector.broadcast %161 : f32 to vector<16x16xf32>
      %164 = arith.mulf %163, %162 : vector<16x16xf32>
      %165 = arith.addf %160, %164 : vector<16x16xf32>
      %c2 = arith.constant 2 : index
      %166 = memref.load %arg3[%c2] : memref<98xf32, #tpu.memory_space<smem>>
      %167 = vector.extract_strided_slice %155 {offsets = [0, 2], sizes = [16, 16], strides = [1, 1]} : vector<16x22xf32> to vector<16x16xf32>
      %168 = vector.broadcast %166 : f32 to vector<16x16xf32>
      %169 = arith.mulf %168, %167 : vector<16x16xf32>
      %170 = arith.addf %165, %169 : vector<16x16xf32>
      %c3_107 = arith.constant 3 : index
      %171 = memref.load %arg3[%c3_107] : memref<98xf32, #tpu.memory_space<smem>>
      %172 = vector.extract_strided_slice %155 {offsets = [0, 3], sizes = [16, 16], strides = [1, 1]} : vector<16x22xf32> to vector<16x16xf32>
      %173 = vector.broadcast %171 : f32 to vector<16x16xf32>
      %174 = arith.mulf %173, %172 : vector<16x16xf32>
      %175 = arith.addf %170, %174 : vector<16x16xf32>
      %c4_108 = arith.constant 4 : index
      %176 = memref.load %arg3[%c4_108] : memref<98xf32, #tpu.memory_space<smem>>
      %177 = vector.extract_strided_slice %155 {offsets = [0, 4], sizes = [16, 16], strides = [1, 1]} : vector<16x22xf32> to vector<16x16xf32>
      %178 = vector.broadcast %176 : f32 to vector<16x16xf32>
      %179 = arith.mulf %178, %177 : vector<16x16xf32>
      %180 = arith.addf %175, %179 : vector<16x16xf32>
      %c5_109 = arith.constant 5 : index
      %181 = memref.load %arg3[%c5_109] : memref<98xf32, #tpu.memory_space<smem>>
      %182 = vector.extract_strided_slice %155 {offsets = [0, 5], sizes = [16, 16], strides = [1, 1]} : vector<16x22xf32> to vector<16x16xf32>
      %183 = vector.broadcast %181 : f32 to vector<16x16xf32>
      %184 = arith.mulf %183, %182 : vector<16x16xf32>
      %185 = arith.addf %180, %184 : vector<16x16xf32>
      %c6_110 = arith.constant 6 : index
      %186 = memref.load %arg3[%c6_110] : memref<98xf32, #tpu.memory_space<smem>>
      %187 = vector.extract_strided_slice %155 {offsets = [0, 6], sizes = [16, 16], strides = [1, 1]} : vector<16x22xf32> to vector<16x16xf32>
      %188 = vector.broadcast %186 : f32 to vector<16x16xf32>
      %189 = arith.mulf %188, %187 : vector<16x16xf32>
      %190 = arith.addf %185, %189 : vector<16x16xf32>
      %c0_111 = arith.constant 0 : index
      %c1_112 = arith.constant 1 : index
      %c0_113 = arith.constant 0 : index
      %191 = vector.load %arg7[%c0_111, %c1_112, %c0_113] : memref<2x22x22xf32, #tpu.memory_space<vmem>>, vector<1x16x22xf32>
      %192 = vector.shape_cast %191 : vector<1x16x22xf32> to vector<16x22xf32>
      %c7_114 = arith.constant 7 : index
      %193 = memref.load %arg3[%c7_114] : memref<98xf32, #tpu.memory_space<smem>>
      %194 = vector.extract_strided_slice %192 {offsets = [0, 0], sizes = [16, 16], strides = [1, 1]} : vector<16x22xf32> to vector<16x16xf32>
      %195 = vector.broadcast %193 : f32 to vector<16x16xf32>
      %196 = arith.mulf %195, %194 : vector<16x16xf32>
      %197 = arith.addf %151, %196 : vector<16x16xf32>
      %c8_115 = arith.constant 8 : index
      %198 = memref.load %arg3[%c8_115] : memref<98xf32, #tpu.memory_space<smem>>
      %199 = vector.extract_strided_slice %192 {offsets = [0, 1], sizes = [16, 16], strides = [1, 1]} : vector<16x22xf32> to vector<16x16xf32>
      %200 = vector.broadcast %198 : f32 to vector<16x16xf32>
      %201 = arith.mulf %200, %199 : vector<16x16xf32>
      %202 = arith.addf %197, %201 : vector<16x16xf32>
      %c9_116 = arith.constant 9 : index
      %203 = memref.load %arg3[%c9_116] : memref<98xf32, #tpu.memory_space<smem>>
      %204 = vector.extract_strided_slice %192 {offsets = [0, 2], sizes = [16, 16], strides = [1, 1]} : vector<16x22xf32> to vector<16x16xf32>
      %205 = vector.broadcast %203 : f32 to vector<16x16xf32>
      %206 = arith.mulf %205, %204 : vector<16x16xf32>
      %207 = arith.addf %202, %206 : vector<16x16xf32>
      %c10_117 = arith.constant 10 : index
      %208 = memref.load %arg3[%c10_117] : memref<98xf32, #tpu.memory_space<smem>>
      %209 = vector.extract_strided_slice %192 {offsets = [0, 3], sizes = [16, 16], strides = [1, 1]} : vector<16x22xf32> to vector<16x16xf32>
      %210 = vector.broadcast %208 : f32 to vector<16x16xf32>
      %211 = arith.mulf %210, %209 : vector<16x16xf32>
      %212 = arith.addf %207, %211 : vector<16x16xf32>
      %c11_118 = arith.constant 11 : index
      %213 = memref.load %arg3[%c11_118] : memref<98xf32, #tpu.memory_space<smem>>
      %214 = vector.extract_strided_slice %192 {offsets = [0, 4], sizes = [16, 16], strides = [1, 1]} : vector<16x22xf32> to vector<16x16xf32>
      %215 = vector.broadcast %213 : f32 to vector<16x16xf32>
      %216 = arith.mulf %215, %214 : vector<16x16xf32>
      %217 = arith.addf %212, %216 : vector<16x16xf32>
      %c12_119 = arith.constant 12 : index
      %218 = memref.load %arg3[%c12_119] : memref<98xf32, #tpu.memory_space<smem>>
      %219 = vector.extract_strided_slice %192 {offsets = [0, 5], sizes = [16, 16], strides = [1, 1]} : vector<16x22xf32> to vector<16x16xf32>
      %220 = vector.broadcast %218 : f32 to vector<16x16xf32>
      %221 = arith.mulf %220, %219 : vector<16x16xf32>
      %222 = arith.addf %217, %221 : vector<16x16xf32>
      %c13_120 = arith.constant 13 : index
      %223 = memref.load %arg3[%c13_120] : memref<98xf32, #tpu.memory_space<smem>>
      %224 = vector.extract_strided_slice %192 {offsets = [0, 6], sizes = [16, 16], strides = [1, 1]} : vector<16x22xf32> to vector<16x16xf32>
      %225 = vector.broadcast %223 : f32 to vector<16x16xf32>
      %226 = arith.mulf %225, %224 : vector<16x16xf32>
      %227 = arith.addf %222, %226 : vector<16x16xf32>
      %c0_121 = arith.constant 0 : index
      %c2_122 = arith.constant 2 : index
      %c0_123 = arith.constant 0 : index
      %228 = vector.load %arg7[%c0_121, %c2_122, %c0_123] : memref<2x22x22xf32, #tpu.memory_space<vmem>>, vector<1x16x22xf32>
      %229 = vector.shape_cast %228 : vector<1x16x22xf32> to vector<16x22xf32>
      %c14_124 = arith.constant 14 : index
      %230 = memref.load %arg3[%c14_124] : memref<98xf32, #tpu.memory_space<smem>>
      %231 = vector.extract_strided_slice %229 {offsets = [0, 0], sizes = [16, 16], strides = [1, 1]} : vector<16x22xf32> to vector<16x16xf32>
      %232 = vector.broadcast %230 : f32 to vector<16x16xf32>
      %233 = arith.mulf %232, %231 : vector<16x16xf32>
      %234 = arith.addf %190, %233 : vector<16x16xf32>
      %c15_125 = arith.constant 15 : index
      %235 = memref.load %arg3[%c15_125] : memref<98xf32, #tpu.memory_space<smem>>
      %236 = vector.extract_strided_slice %229 {offsets = [0, 1], sizes = [16, 16], strides = [1, 1]} : vector<16x22xf32> to vector<16x16xf32>
      %237 = vector.broadcast %235 : f32 to vector<16x16xf32>
      %238 = arith.mulf %237, %236 : vector<16x16xf32>
      %239 = arith.addf %234, %238 : vector<16x16xf32>
      %c16_126 = arith.constant 16 : index
      %240 = memref.load %arg3[%c16_126] : memref<98xf32, #tpu.memory_space<smem>>
      %241 = vector.extract_strided_slice %229 {offsets = [0, 2], sizes = [16, 16], strides = [1, 1]} : vector<16x22xf32> to vector<16x16xf32>
      %242 = vector.broadcast %240 : f32 to vector<16x16xf32>
      %243 = arith.mulf %242, %241 : vector<16x16xf32>
      %244 = arith.addf %239, %243 : vector<16x16xf32>
      %c17_127 = arith.constant 17 : index
      %245 = memref.load %arg3[%c17_127] : memref<98xf32, #tpu.memory_space<smem>>
      %246 = vector.extract_strided_slice %229 {offsets = [0, 3], sizes = [16, 16], strides = [1, 1]} : vector<16x22xf32> to vector<16x16xf32>
      %247 = vector.broadcast %245 : f32 to vector<16x16xf32>
      %248 = arith.mulf %247, %246 : vector<16x16xf32>
      %249 = arith.addf %244, %248 : vector<16x16xf32>
      %c18_128 = arith.constant 18 : index
      %250 = memref.load %arg3[%c18_128] : memref<98xf32, #tpu.memory_space<smem>>
      %251 = vector.extract_strided_slice %229 {offsets = [0, 4], sizes = [16, 16], strides = [1, 1]} : vector<16x22xf32> to vector<16x16xf32>
      %252 = vector.broadcast %250 : f32 to vector<16x16xf32>
      %253 = arith.mulf %252, %251 : vector<16x16xf32>
      %254 = arith.addf %249, %253 : vector<16x16xf32>
      %c19 = arith.constant 19 : index
      %255 = memref.load %arg3[%c19] : memref<98xf32, #tpu.memory_space<smem>>
      %256 = vector.extract_strided_slice %229 {offsets = [0, 5], sizes = [16, 16], strides = [1, 1]} : vector<16x22xf32> to vector<16x16xf32>
      %257 = vector.broadcast %255 : f32 to vector<16x16xf32>
      %258 = arith.mulf %257, %256 : vector<16x16xf32>
      %259 = arith.addf %254, %258 : vector<16x16xf32>
      %c20 = arith.constant 20 : index
      %260 = memref.load %arg3[%c20] : memref<98xf32, #tpu.memory_space<smem>>
      %261 = vector.extract_strided_slice %229 {offsets = [0, 6], sizes = [16, 16], strides = [1, 1]} : vector<16x22xf32> to vector<16x16xf32>
      %262 = vector.broadcast %260 : f32 to vector<16x16xf32>
      %263 = arith.mulf %262, %261 : vector<16x16xf32>
      %264 = arith.addf %259, %263 : vector<16x16xf32>
      %c0_129 = arith.constant 0 : index
      %c3_130 = arith.constant 3 : index
      %c0_131 = arith.constant 0 : index
      %265 = vector.load %arg7[%c0_129, %c3_130, %c0_131] : memref<2x22x22xf32, #tpu.memory_space<vmem>>, vector<1x16x22xf32>
      %266 = vector.shape_cast %265 : vector<1x16x22xf32> to vector<16x22xf32>
      %c21 = arith.constant 21 : index
      %267 = memref.load %arg3[%c21] : memref<98xf32, #tpu.memory_space<smem>>
      %268 = vector.extract_strided_slice %266 {offsets = [0, 0], sizes = [16, 16], strides = [1, 1]} : vector<16x22xf32> to vector<16x16xf32>
      %269 = vector.broadcast %267 : f32 to vector<16x16xf32>
      %270 = arith.mulf %269, %268 : vector<16x16xf32>
      %271 = arith.addf %227, %270 : vector<16x16xf32>
      %c22 = arith.constant 22 : index
      %272 = memref.load %arg3[%c22] : memref<98xf32, #tpu.memory_space<smem>>
      %273 = vector.extract_strided_slice %266 {offsets = [0, 1], sizes = [16, 16], strides = [1, 1]} : vector<16x22xf32> to vector<16x16xf32>
      %274 = vector.broadcast %272 : f32 to vector<16x16xf32>
      %275 = arith.mulf %274, %273 : vector<16x16xf32>
      %276 = arith.addf %271, %275 : vector<16x16xf32>
      %c23 = arith.constant 23 : index
      %277 = memref.load %arg3[%c23] : memref<98xf32, #tpu.memory_space<smem>>
      %278 = vector.extract_strided_slice %266 {offsets = [0, 2], sizes = [16, 16], strides = [1, 1]} : vector<16x22xf32> to vector<16x16xf32>
      %279 = vector.broadcast %277 : f32 to vector<16x16xf32>
      %280 = arith.mulf %279, %278 : vector<16x16xf32>
      %281 = arith.addf %276, %280 : vector<16x16xf32>
      %c24 = arith.constant 24 : index
      %282 = memref.load %arg3[%c24] : memref<98xf32, #tpu.memory_space<smem>>
      %283 = vector.extract_strided_slice %266 {offsets = [0, 3], sizes = [16, 16], strides = [1, 1]} : vector<16x22xf32> to vector<16x16xf32>
      %284 = vector.broadcast %282 : f32 to vector<16x16xf32>
      %285 = arith.mulf %284, %283 : vector<16x16xf32>
      %286 = arith.addf %281, %285 : vector<16x16xf32>
      %c25 = arith.constant 25 : index
      %287 = memref.load %arg3[%c25] : memref<98xf32, #tpu.memory_space<smem>>
      %288 = vector.extract_strided_slice %266 {offsets = [0, 4], sizes = [16, 16], strides = [1, 1]} : vector<16x22xf32> to vector<16x16xf32>
      %289 = vector.broadcast %287 : f32 to vector<16x16xf32>
      %290 = arith.mulf %289, %288 : vector<16x16xf32>
      %291 = arith.addf %286, %290 : vector<16x16xf32>
      %c26 = arith.constant 26 : index
      %292 = memref.load %arg3[%c26] : memref<98xf32, #tpu.memory_space<smem>>
      %293 = vector.extract_strided_slice %266 {offsets = [0, 5], sizes = [16, 16], strides = [1, 1]} : vector<16x22xf32> to vector<16x16xf32>
      %294 = vector.broadcast %292 : f32 to vector<16x16xf32>
      %295 = arith.mulf %294, %293 : vector<16x16xf32>
      %296 = arith.addf %291, %295 : vector<16x16xf32>
      %c27 = arith.constant 27 : index
      %297 = memref.load %arg3[%c27] : memref<98xf32, #tpu.memory_space<smem>>
      %298 = vector.extract_strided_slice %266 {offsets = [0, 6], sizes = [16, 16], strides = [1, 1]} : vector<16x22xf32> to vector<16x16xf32>
      %299 = vector.broadcast %297 : f32 to vector<16x16xf32>
      %300 = arith.mulf %299, %298 : vector<16x16xf32>
      %301 = arith.addf %296, %300 : vector<16x16xf32>
      %c0_132 = arith.constant 0 : index
      %c4_133 = arith.constant 4 : index
      %c0_134 = arith.constant 0 : index
      %302 = vector.load %arg7[%c0_132, %c4_133, %c0_134] : memref<2x22x22xf32, #tpu.memory_space<vmem>>, vector<1x16x22xf32>
      %303 = vector.shape_cast %302 : vector<1x16x22xf32> to vector<16x22xf32>
      %c28 = arith.constant 28 : index
      %304 = memref.load %arg3[%c28] : memref<98xf32, #tpu.memory_space<smem>>
      %305 = vector.extract_strided_slice %303 {offsets = [0, 0], sizes = [16, 16], strides = [1, 1]} : vector<16x22xf32> to vector<16x16xf32>
      %306 = vector.broadcast %304 : f32 to vector<16x16xf32>
      %307 = arith.mulf %306, %305 : vector<16x16xf32>
      %308 = arith.addf %264, %307 : vector<16x16xf32>
      %c29 = arith.constant 29 : index
      %309 = memref.load %arg3[%c29] : memref<98xf32, #tpu.memory_space<smem>>
      %310 = vector.extract_strided_slice %303 {offsets = [0, 1], sizes = [16, 16], strides = [1, 1]} : vector<16x22xf32> to vector<16x16xf32>
      %311 = vector.broadcast %309 : f32 to vector<16x16xf32>
      %312 = arith.mulf %311, %310 : vector<16x16xf32>
      %313 = arith.addf %308, %312 : vector<16x16xf32>
      %c30 = arith.constant 30 : index
      %314 = memref.load %arg3[%c30] : memref<98xf32, #tpu.memory_space<smem>>
      %315 = vector.extract_strided_slice %303 {offsets = [0, 2], sizes = [16, 16], strides = [1, 1]} : vector<16x22xf32> to vector<16x16xf32>
      %316 = vector.broadcast %314 : f32 to vector<16x16xf32>
      %317 = arith.mulf %316, %315 : vector<16x16xf32>
      %318 = arith.addf %313, %317 : vector<16x16xf32>
      %c31 = arith.constant 31 : index
      %319 = memref.load %arg3[%c31] : memref<98xf32, #tpu.memory_space<smem>>
      %320 = vector.extract_strided_slice %303 {offsets = [0, 3], sizes = [16, 16], strides = [1, 1]} : vector<16x22xf32> to vector<16x16xf32>
      %321 = vector.broadcast %319 : f32 to vector<16x16xf32>
      %322 = arith.mulf %321, %320 : vector<16x16xf32>
      %323 = arith.addf %318, %322 : vector<16x16xf32>
      %c32 = arith.constant 32 : index
      %324 = memref.load %arg3[%c32] : memref<98xf32, #tpu.memory_space<smem>>
      %325 = vector.extract_strided_slice %303 {offsets = [0, 4], sizes = [16, 16], strides = [1, 1]} : vector<16x22xf32> to vector<16x16xf32>
      %326 = vector.broadcast %324 : f32 to vector<16x16xf32>
      %327 = arith.mulf %326, %325 : vector<16x16xf32>
      %328 = arith.addf %323, %327 : vector<16x16xf32>
      %c33 = arith.constant 33 : index
      %329 = memref.load %arg3[%c33] : memref<98xf32, #tpu.memory_space<smem>>
      %330 = vector.extract_strided_slice %303 {offsets = [0, 5], sizes = [16, 16], strides = [1, 1]} : vector<16x22xf32> to vector<16x16xf32>
      %331 = vector.broadcast %329 : f32 to vector<16x16xf32>
      %332 = arith.mulf %331, %330 : vector<16x16xf32>
      %333 = arith.addf %328, %332 : vector<16x16xf32>
      %c34 = arith.constant 34 : index
      %334 = memref.load %arg3[%c34] : memref<98xf32, #tpu.memory_space<smem>>
      %335 = vector.extract_strided_slice %303 {offsets = [0, 6], sizes = [16, 16], strides = [1, 1]} : vector<16x22xf32> to vector<16x16xf32>
      %336 = vector.broadcast %334 : f32 to vector<16x16xf32>
      %337 = arith.mulf %336, %335 : vector<16x16xf32>
      %338 = arith.addf %333, %337 : vector<16x16xf32>
      %c0_135 = arith.constant 0 : index
      %c5_136 = arith.constant 5 : index
      %c0_137 = arith.constant 0 : index
      %339 = vector.load %arg7[%c0_135, %c5_136, %c0_137] : memref<2x22x22xf32, #tpu.memory_space<vmem>>, vector<1x16x22xf32>
      %340 = vector.shape_cast %339 : vector<1x16x22xf32> to vector<16x22xf32>
      %c35 = arith.constant 35 : index
      %341 = memref.load %arg3[%c35] : memref<98xf32, #tpu.memory_space<smem>>
      %342 = vector.extract_strided_slice %340 {offsets = [0, 0], sizes = [16, 16], strides = [1, 1]} : vector<16x22xf32> to vector<16x16xf32>
      %343 = vector.broadcast %341 : f32 to vector<16x16xf32>
      %344 = arith.mulf %343, %342 : vector<16x16xf32>
      %345 = arith.addf %301, %344 : vector<16x16xf32>
      %c36 = arith.constant 36 : index
      %346 = memref.load %arg3[%c36] : memref<98xf32, #tpu.memory_space<smem>>
      %347 = vector.extract_strided_slice %340 {offsets = [0, 1], sizes = [16, 16], strides = [1, 1]} : vector<16x22xf32> to vector<16x16xf32>
      %348 = vector.broadcast %346 : f32 to vector<16x16xf32>
      %349 = arith.mulf %348, %347 : vector<16x16xf32>
      %350 = arith.addf %345, %349 : vector<16x16xf32>
      %c37 = arith.constant 37 : index
      %351 = memref.load %arg3[%c37] : memref<98xf32, #tpu.memory_space<smem>>
      %352 = vector.extract_strided_slice %340 {offsets = [0, 2], sizes = [16, 16], strides = [1, 1]} : vector<16x22xf32> to vector<16x16xf32>
      %353 = vector.broadcast %351 : f32 to vector<16x16xf32>
      %354 = arith.mulf %353, %352 : vector<16x16xf32>
      %355 = arith.addf %350, %354 : vector<16x16xf32>
      %c38 = arith.constant 38 : index
      %356 = memref.load %arg3[%c38] : memref<98xf32, #tpu.memory_space<smem>>
      %357 = vector.extract_strided_slice %340 {offsets = [0, 3], sizes = [16, 16], strides = [1, 1]} : vector<16x22xf32> to vector<16x16xf32>
      %358 = vector.broadcast %356 : f32 to vector<16x16xf32>
      %359 = arith.mulf %358, %357 : vector<16x16xf32>
      %360 = arith.addf %355, %359 : vector<16x16xf32>
      %c39 = arith.constant 39 : index
      %361 = memref.load %arg3[%c39] : memref<98xf32, #tpu.memory_space<smem>>
      %362 = vector.extract_strided_slice %340 {offsets = [0, 4], sizes = [16, 16], strides = [1, 1]} : vector<16x22xf32> to vector<16x16xf32>
      %363 = vector.broadcast %361 : f32 to vector<16x16xf32>
      %364 = arith.mulf %363, %362 : vector<16x16xf32>
      %365 = arith.addf %360, %364 : vector<16x16xf32>
      %c40 = arith.constant 40 : index
      %366 = memref.load %arg3[%c40] : memref<98xf32, #tpu.memory_space<smem>>
      %367 = vector.extract_strided_slice %340 {offsets = [0, 5], sizes = [16, 16], strides = [1, 1]} : vector<16x22xf32> to vector<16x16xf32>
      %368 = vector.broadcast %366 : f32 to vector<16x16xf32>
      %369 = arith.mulf %368, %367 : vector<16x16xf32>
      %370 = arith.addf %365, %369 : vector<16x16xf32>
      %c41 = arith.constant 41 : index
      %371 = memref.load %arg3[%c41] : memref<98xf32, #tpu.memory_space<smem>>
      %372 = vector.extract_strided_slice %340 {offsets = [0, 6], sizes = [16, 16], strides = [1, 1]} : vector<16x22xf32> to vector<16x16xf32>
      %373 = vector.broadcast %371 : f32 to vector<16x16xf32>
      %374 = arith.mulf %373, %372 : vector<16x16xf32>
      %375 = arith.addf %370, %374 : vector<16x16xf32>
      %c0_138 = arith.constant 0 : index
      %c6_139 = arith.constant 6 : index
      %c0_140 = arith.constant 0 : index
      %376 = vector.load %arg7[%c0_138, %c6_139, %c0_140] : memref<2x22x22xf32, #tpu.memory_space<vmem>>, vector<1x16x22xf32>
      %377 = vector.shape_cast %376 : vector<1x16x22xf32> to vector<16x22xf32>
      %c42 = arith.constant 42 : index
      %378 = memref.load %arg3[%c42] : memref<98xf32, #tpu.memory_space<smem>>
      %379 = vector.extract_strided_slice %377 {offsets = [0, 0], sizes = [16, 16], strides = [1, 1]} : vector<16x22xf32> to vector<16x16xf32>
      %380 = vector.broadcast %378 : f32 to vector<16x16xf32>
      %381 = arith.mulf %380, %379 : vector<16x16xf32>
      %382 = arith.addf %338, %381 : vector<16x16xf32>
      %c43 = arith.constant 43 : index
      %383 = memref.load %arg3[%c43] : memref<98xf32, #tpu.memory_space<smem>>
      %384 = vector.extract_strided_slice %377 {offsets = [0, 1], sizes = [16, 16], strides = [1, 1]} : vector<16x22xf32> to vector<16x16xf32>
      %385 = vector.broadcast %383 : f32 to vector<16x16xf32>
      %386 = arith.mulf %385, %384 : vector<16x16xf32>
      %387 = arith.addf %382, %386 : vector<16x16xf32>
      %c44 = arith.constant 44 : index
      %388 = memref.load %arg3[%c44] : memref<98xf32, #tpu.memory_space<smem>>
      %389 = vector.extract_strided_slice %377 {offsets = [0, 2], sizes = [16, 16], strides = [1, 1]} : vector<16x22xf32> to vector<16x16xf32>
      %390 = vector.broadcast %388 : f32 to vector<16x16xf32>
      %391 = arith.mulf %390, %389 : vector<16x16xf32>
      %392 = arith.addf %387, %391 : vector<16x16xf32>
      %c45 = arith.constant 45 : index
      %393 = memref.load %arg3[%c45] : memref<98xf32, #tpu.memory_space<smem>>
      %394 = vector.extract_strided_slice %377 {offsets = [0, 3], sizes = [16, 16], strides = [1, 1]} : vector<16x22xf32> to vector<16x16xf32>
      %395 = vector.broadcast %393 : f32 to vector<16x16xf32>
      %396 = arith.mulf %395, %394 : vector<16x16xf32>
      %397 = arith.addf %392, %396 : vector<16x16xf32>
      %c46 = arith.constant 46 : index
      %398 = memref.load %arg3[%c46] : memref<98xf32, #tpu.memory_space<smem>>
      %399 = vector.extract_strided_slice %377 {offsets = [0, 4], sizes = [16, 16], strides = [1, 1]} : vector<16x22xf32> to vector<16x16xf32>
      %400 = vector.broadcast %398 : f32 to vector<16x16xf32>
      %401 = arith.mulf %400, %399 : vector<16x16xf32>
      %402 = arith.addf %397, %401 : vector<16x16xf32>
      %c47 = arith.constant 47 : index
      %403 = memref.load %arg3[%c47] : memref<98xf32, #tpu.memory_space<smem>>
      %404 = vector.extract_strided_slice %377 {offsets = [0, 5], sizes = [16, 16], strides = [1, 1]} : vector<16x22xf32> to vector<16x16xf32>
      %405 = vector.broadcast %403 : f32 to vector<16x16xf32>
      %406 = arith.mulf %405, %404 : vector<16x16xf32>
      %407 = arith.addf %402, %406 : vector<16x16xf32>
      %c48 = arith.constant 48 : index
      %408 = memref.load %arg3[%c48] : memref<98xf32, #tpu.memory_space<smem>>
      %409 = vector.extract_strided_slice %377 {offsets = [0, 6], sizes = [16, 16], strides = [1, 1]} : vector<16x22xf32> to vector<16x16xf32>
      %410 = vector.broadcast %408 : f32 to vector<16x16xf32>
      %411 = arith.mulf %410, %409 : vector<16x16xf32>
      %412 = arith.addf %407, %411 : vector<16x16xf32>
      %c1_141 = arith.constant 1 : index
      %c0_142 = arith.constant 0 : index
      %c0_143 = arith.constant 0 : index
      %413 = vector.load %arg7[%c1_141, %c0_142, %c0_143] : memref<2x22x22xf32, #tpu.memory_space<vmem>>, vector<1x16x22xf32>
      %414 = vector.shape_cast %413 : vector<1x16x22xf32> to vector<16x22xf32>
      %c49 = arith.constant 49 : index
      %415 = memref.load %arg3[%c49] : memref<98xf32, #tpu.memory_space<smem>>
      %416 = vector.extract_strided_slice %414 {offsets = [0, 0], sizes = [16, 16], strides = [1, 1]} : vector<16x22xf32> to vector<16x16xf32>
      %417 = vector.broadcast %415 : f32 to vector<16x16xf32>
      %418 = arith.mulf %417, %416 : vector<16x16xf32>
      %419 = arith.addf %152, %418 : vector<16x16xf32>
      %c50 = arith.constant 50 : index
      %420 = memref.load %arg3[%c50] : memref<98xf32, #tpu.memory_space<smem>>
      %421 = vector.extract_strided_slice %414 {offsets = [0, 1], sizes = [16, 16], strides = [1, 1]} : vector<16x22xf32> to vector<16x16xf32>
      %422 = vector.broadcast %420 : f32 to vector<16x16xf32>
      %423 = arith.mulf %422, %421 : vector<16x16xf32>
      %424 = arith.addf %419, %423 : vector<16x16xf32>
      %c51 = arith.constant 51 : index
      %425 = memref.load %arg3[%c51] : memref<98xf32, #tpu.memory_space<smem>>
      %426 = vector.extract_strided_slice %414 {offsets = [0, 2], sizes = [16, 16], strides = [1, 1]} : vector<16x22xf32> to vector<16x16xf32>
      %427 = vector.broadcast %425 : f32 to vector<16x16xf32>
      %428 = arith.mulf %427, %426 : vector<16x16xf32>
      %429 = arith.addf %424, %428 : vector<16x16xf32>
      %c52 = arith.constant 52 : index
      %430 = memref.load %arg3[%c52] : memref<98xf32, #tpu.memory_space<smem>>
      %431 = vector.extract_strided_slice %414 {offsets = [0, 3], sizes = [16, 16], strides = [1, 1]} : vector<16x22xf32> to vector<16x16xf32>
      %432 = vector.broadcast %430 : f32 to vector<16x16xf32>
      %433 = arith.mulf %432, %431 : vector<16x16xf32>
      %434 = arith.addf %429, %433 : vector<16x16xf32>
      %c53 = arith.constant 53 : index
      %435 = memref.load %arg3[%c53] : memref<98xf32, #tpu.memory_space<smem>>
      %436 = vector.extract_strided_slice %414 {offsets = [0, 4], sizes = [16, 16], strides = [1, 1]} : vector<16x22xf32> to vector<16x16xf32>
      %437 = vector.broadcast %435 : f32 to vector<16x16xf32>
      %438 = arith.mulf %437, %436 : vector<16x16xf32>
      %439 = arith.addf %434, %438 : vector<16x16xf32>
      %c54 = arith.constant 54 : index
      %440 = memref.load %arg3[%c54] : memref<98xf32, #tpu.memory_space<smem>>
      %441 = vector.extract_strided_slice %414 {offsets = [0, 5], sizes = [16, 16], strides = [1, 1]} : vector<16x22xf32> to vector<16x16xf32>
      %442 = vector.broadcast %440 : f32 to vector<16x16xf32>
      %443 = arith.mulf %442, %441 : vector<16x16xf32>
      %444 = arith.addf %439, %443 : vector<16x16xf32>
      %c55 = arith.constant 55 : index
      %445 = memref.load %arg3[%c55] : memref<98xf32, #tpu.memory_space<smem>>
      %446 = vector.extract_strided_slice %414 {offsets = [0, 6], sizes = [16, 16], strides = [1, 1]} : vector<16x22xf32> to vector<16x16xf32>
      %447 = vector.broadcast %445 : f32 to vector<16x16xf32>
      %448 = arith.mulf %447, %446 : vector<16x16xf32>
      %449 = arith.addf %444, %448 : vector<16x16xf32>
      %c1_144 = arith.constant 1 : index
      %c1_145 = arith.constant 1 : index
      %c0_146 = arith.constant 0 : index
      %450 = vector.load %arg7[%c1_144, %c1_145, %c0_146] : memref<2x22x22xf32, #tpu.memory_space<vmem>>, vector<1x16x22xf32>
      %451 = vector.shape_cast %450 : vector<1x16x22xf32> to vector<16x22xf32>
      %c56 = arith.constant 56 : index
      %452 = memref.load %arg3[%c56] : memref<98xf32, #tpu.memory_space<smem>>
      %453 = vector.extract_strided_slice %451 {offsets = [0, 0], sizes = [16, 16], strides = [1, 1]} : vector<16x22xf32> to vector<16x16xf32>
      %454 = vector.broadcast %452 : f32 to vector<16x16xf32>
      %455 = arith.mulf %454, %453 : vector<16x16xf32>
      %456 = arith.addf %153, %455 : vector<16x16xf32>
      %c57 = arith.constant 57 : index
      %457 = memref.load %arg3[%c57] : memref<98xf32, #tpu.memory_space<smem>>
      %458 = vector.extract_strided_slice %451 {offsets = [0, 1], sizes = [16, 16], strides = [1, 1]} : vector<16x22xf32> to vector<16x16xf32>
      %459 = vector.broadcast %457 : f32 to vector<16x16xf32>
      %460 = arith.mulf %459, %458 : vector<16x16xf32>
      %461 = arith.addf %456, %460 : vector<16x16xf32>
      %c58 = arith.constant 58 : index
      %462 = memref.load %arg3[%c58] : memref<98xf32, #tpu.memory_space<smem>>
      %463 = vector.extract_strided_slice %451 {offsets = [0, 2], sizes = [16, 16], strides = [1, 1]} : vector<16x22xf32> to vector<16x16xf32>
      %464 = vector.broadcast %462 : f32 to vector<16x16xf32>
      %465 = arith.mulf %464, %463 : vector<16x16xf32>
      %466 = arith.addf %461, %465 : vector<16x16xf32>
      %c59 = arith.constant 59 : index
      %467 = memref.load %arg3[%c59] : memref<98xf32, #tpu.memory_space<smem>>
      %468 = vector.extract_strided_slice %451 {offsets = [0, 3], sizes = [16, 16], strides = [1, 1]} : vector<16x22xf32> to vector<16x16xf32>
      %469 = vector.broadcast %467 : f32 to vector<16x16xf32>
      %470 = arith.mulf %469, %468 : vector<16x16xf32>
      %471 = arith.addf %466, %470 : vector<16x16xf32>
      %c60 = arith.constant 60 : index
      %472 = memref.load %arg3[%c60] : memref<98xf32, #tpu.memory_space<smem>>
      %473 = vector.extract_strided_slice %451 {offsets = [0, 4], sizes = [16, 16], strides = [1, 1]} : vector<16x22xf32> to vector<16x16xf32>
      %474 = vector.broadcast %472 : f32 to vector<16x16xf32>
      %475 = arith.mulf %474, %473 : vector<16x16xf32>
      %476 = arith.addf %471, %475 : vector<16x16xf32>
      %c61 = arith.constant 61 : index
      %477 = memref.load %arg3[%c61] : memref<98xf32, #tpu.memory_space<smem>>
      %478 = vector.extract_strided_slice %451 {offsets = [0, 5], sizes = [16, 16], strides = [1, 1]} : vector<16x22xf32> to vector<16x16xf32>
      %479 = vector.broadcast %477 : f32 to vector<16x16xf32>
      %480 = arith.mulf %479, %478 : vector<16x16xf32>
      %481 = arith.addf %476, %480 : vector<16x16xf32>
      %c62 = arith.constant 62 : index
      %482 = memref.load %arg3[%c62] : memref<98xf32, #tpu.memory_space<smem>>
      %483 = vector.extract_strided_slice %451 {offsets = [0, 6], sizes = [16, 16], strides = [1, 1]} : vector<16x22xf32> to vector<16x16xf32>
      %484 = vector.broadcast %482 : f32 to vector<16x16xf32>
      %485 = arith.mulf %484, %483 : vector<16x16xf32>
      %486 = arith.addf %481, %485 : vector<16x16xf32>
      %c1_147 = arith.constant 1 : index
      %c2_148 = arith.constant 2 : index
      %c0_149 = arith.constant 0 : index
      %487 = vector.load %arg7[%c1_147, %c2_148, %c0_149] : memref<2x22x22xf32, #tpu.memory_space<vmem>>, vector<1x16x22xf32>
      %488 = vector.shape_cast %487 : vector<1x16x22xf32> to vector<16x22xf32>
      %c63 = arith.constant 63 : index
      %489 = memref.load %arg3[%c63] : memref<98xf32, #tpu.memory_space<smem>>
      %490 = vector.extract_strided_slice %488 {offsets = [0, 0], sizes = [16, 16], strides = [1, 1]} : vector<16x22xf32> to vector<16x16xf32>
      %491 = vector.broadcast %489 : f32 to vector<16x16xf32>
      %492 = arith.mulf %491, %490 : vector<16x16xf32>
      %493 = arith.addf %449, %492 : vector<16x16xf32>
      %c64 = arith.constant 64 : index
      %494 = memref.load %arg3[%c64] : memref<98xf32, #tpu.memory_space<smem>>
      %495 = vector.extract_strided_slice %488 {offsets = [0, 1], sizes = [16, 16], strides = [1, 1]} : vector<16x22xf32> to vector<16x16xf32>
      %496 = vector.broadcast %494 : f32 to vector<16x16xf32>
      %497 = arith.mulf %496, %495 : vector<16x16xf32>
      %498 = arith.addf %493, %497 : vector<16x16xf32>
      %c65 = arith.constant 65 : index
      %499 = memref.load %arg3[%c65] : memref<98xf32, #tpu.memory_space<smem>>
      %500 = vector.extract_strided_slice %488 {offsets = [0, 2], sizes = [16, 16], strides = [1, 1]} : vector<16x22xf32> to vector<16x16xf32>
      %501 = vector.broadcast %499 : f32 to vector<16x16xf32>
      %502 = arith.mulf %501, %500 : vector<16x16xf32>
      %503 = arith.addf %498, %502 : vector<16x16xf32>
      %c66 = arith.constant 66 : index
      %504 = memref.load %arg3[%c66] : memref<98xf32, #tpu.memory_space<smem>>
      %505 = vector.extract_strided_slice %488 {offsets = [0, 3], sizes = [16, 16], strides = [1, 1]} : vector<16x22xf32> to vector<16x16xf32>
      %506 = vector.broadcast %504 : f32 to vector<16x16xf32>
      %507 = arith.mulf %506, %505 : vector<16x16xf32>
      %508 = arith.addf %503, %507 : vector<16x16xf32>
      %c67 = arith.constant 67 : index
      %509 = memref.load %arg3[%c67] : memref<98xf32, #tpu.memory_space<smem>>
      %510 = vector.extract_strided_slice %488 {offsets = [0, 4], sizes = [16, 16], strides = [1, 1]} : vector<16x22xf32> to vector<16x16xf32>
      %511 = vector.broadcast %509 : f32 to vector<16x16xf32>
      %512 = arith.mulf %511, %510 : vector<16x16xf32>
      %513 = arith.addf %508, %512 : vector<16x16xf32>
      %c68 = arith.constant 68 : index
      %514 = memref.load %arg3[%c68] : memref<98xf32, #tpu.memory_space<smem>>
      %515 = vector.extract_strided_slice %488 {offsets = [0, 5], sizes = [16, 16], strides = [1, 1]} : vector<16x22xf32> to vector<16x16xf32>
      %516 = vector.broadcast %514 : f32 to vector<16x16xf32>
      %517 = arith.mulf %516, %515 : vector<16x16xf32>
      %518 = arith.addf %513, %517 : vector<16x16xf32>
      %c69 = arith.constant 69 : index
      %519 = memref.load %arg3[%c69] : memref<98xf32, #tpu.memory_space<smem>>
      %520 = vector.extract_strided_slice %488 {offsets = [0, 6], sizes = [16, 16], strides = [1, 1]} : vector<16x22xf32> to vector<16x16xf32>
      %521 = vector.broadcast %519 : f32 to vector<16x16xf32>
      %522 = arith.mulf %521, %520 : vector<16x16xf32>
      %523 = arith.addf %518, %522 : vector<16x16xf32>
      %c1_150 = arith.constant 1 : index
      %c3_151 = arith.constant 3 : index
      %c0_152 = arith.constant 0 : index
      %524 = vector.load %arg7[%c1_150, %c3_151, %c0_152] : memref<2x22x22xf32, #tpu.memory_space<vmem>>, vector<1x16x22xf32>
      %525 = vector.shape_cast %524 : vector<1x16x22xf32> to vector<16x22xf32>
      %c70 = arith.constant 70 : index
      %526 = memref.load %arg3[%c70] : memref<98xf32, #tpu.memory_space<smem>>
      %527 = vector.extract_strided_slice %525 {offsets = [0, 0], sizes = [16, 16], strides = [1, 1]} : vector<16x22xf32> to vector<16x16xf32>
      %528 = vector.broadcast %526 : f32 to vector<16x16xf32>
      %529 = arith.mulf %528, %527 : vector<16x16xf32>
      %530 = arith.addf %486, %529 : vector<16x16xf32>
      %c71 = arith.constant 71 : index
      %531 = memref.load %arg3[%c71] : memref<98xf32, #tpu.memory_space<smem>>
      %532 = vector.extract_strided_slice %525 {offsets = [0, 1], sizes = [16, 16], strides = [1, 1]} : vector<16x22xf32> to vector<16x16xf32>
      %533 = vector.broadcast %531 : f32 to vector<16x16xf32>
      %534 = arith.mulf %533, %532 : vector<16x16xf32>
      %535 = arith.addf %530, %534 : vector<16x16xf32>
      %c72 = arith.constant 72 : index
      %536 = memref.load %arg3[%c72] : memref<98xf32, #tpu.memory_space<smem>>
      %537 = vector.extract_strided_slice %525 {offsets = [0, 2], sizes = [16, 16], strides = [1, 1]} : vector<16x22xf32> to vector<16x16xf32>
      %538 = vector.broadcast %536 : f32 to vector<16x16xf32>
      %539 = arith.mulf %538, %537 : vector<16x16xf32>
      %540 = arith.addf %535, %539 : vector<16x16xf32>
      %c73 = arith.constant 73 : index
      %541 = memref.load %arg3[%c73] : memref<98xf32, #tpu.memory_space<smem>>
      %542 = vector.extract_strided_slice %525 {offsets = [0, 3], sizes = [16, 16], strides = [1, 1]} : vector<16x22xf32> to vector<16x16xf32>
      %543 = vector.broadcast %541 : f32 to vector<16x16xf32>
      %544 = arith.mulf %543, %542 : vector<16x16xf32>
      %545 = arith.addf %540, %544 : vector<16x16xf32>
      %c74 = arith.constant 74 : index
      %546 = memref.load %arg3[%c74] : memref<98xf32, #tpu.memory_space<smem>>
      %547 = vector.extract_strided_slice %525 {offsets = [0, 4], sizes = [16, 16], strides = [1, 1]} : vector<16x22xf32> to vector<16x16xf32>
      %548 = vector.broadcast %546 : f32 to vector<16x16xf32>
      %549 = arith.mulf %548, %547 : vector<16x16xf32>
      %550 = arith.addf %545, %549 : vector<16x16xf32>
      %c75 = arith.constant 75 : index
      %551 = memref.load %arg3[%c75] : memref<98xf32, #tpu.memory_space<smem>>
      %552 = vector.extract_strided_slice %525 {offsets = [0, 5], sizes = [16, 16], strides = [1, 1]} : vector<16x22xf32> to vector<16x16xf32>
      %553 = vector.broadcast %551 : f32 to vector<16x16xf32>
      %554 = arith.mulf %553, %552 : vector<16x16xf32>
      %555 = arith.addf %550, %554 : vector<16x16xf32>
      %c76 = arith.constant 76 : index
      %556 = memref.load %arg3[%c76] : memref<98xf32, #tpu.memory_space<smem>>
      %557 = vector.extract_strided_slice %525 {offsets = [0, 6], sizes = [16, 16], strides = [1, 1]} : vector<16x22xf32> to vector<16x16xf32>
      %558 = vector.broadcast %556 : f32 to vector<16x16xf32>
      %559 = arith.mulf %558, %557 : vector<16x16xf32>
      %560 = arith.addf %555, %559 : vector<16x16xf32>
      %c1_153 = arith.constant 1 : index
      %c4_154 = arith.constant 4 : index
      %c0_155 = arith.constant 0 : index
      %561 = vector.load %arg7[%c1_153, %c4_154, %c0_155] : memref<2x22x22xf32, #tpu.memory_space<vmem>>, vector<1x16x22xf32>
      %562 = vector.shape_cast %561 : vector<1x16x22xf32> to vector<16x22xf32>
      %c77 = arith.constant 77 : index
      %563 = memref.load %arg3[%c77] : memref<98xf32, #tpu.memory_space<smem>>
      %564 = vector.extract_strided_slice %562 {offsets = [0, 0], sizes = [16, 16], strides = [1, 1]} : vector<16x22xf32> to vector<16x16xf32>
      %565 = vector.broadcast %563 : f32 to vector<16x16xf32>
      %566 = arith.mulf %565, %564 : vector<16x16xf32>
      %567 = arith.addf %523, %566 : vector<16x16xf32>
      %c78 = arith.constant 78 : index
      %568 = memref.load %arg3[%c78] : memref<98xf32, #tpu.memory_space<smem>>
      %569 = vector.extract_strided_slice %562 {offsets = [0, 1], sizes = [16, 16], strides = [1, 1]} : vector<16x22xf32> to vector<16x16xf32>
      %570 = vector.broadcast %568 : f32 to vector<16x16xf32>
      %571 = arith.mulf %570, %569 : vector<16x16xf32>
      %572 = arith.addf %567, %571 : vector<16x16xf32>
      %c79 = arith.constant 79 : index
      %573 = memref.load %arg3[%c79] : memref<98xf32, #tpu.memory_space<smem>>
      %574 = vector.extract_strided_slice %562 {offsets = [0, 2], sizes = [16, 16], strides = [1, 1]} : vector<16x22xf32> to vector<16x16xf32>
      %575 = vector.broadcast %573 : f32 to vector<16x16xf32>
      %576 = arith.mulf %575, %574 : vector<16x16xf32>
      %577 = arith.addf %572, %576 : vector<16x16xf32>
      %c80 = arith.constant 80 : index
      %578 = memref.load %arg3[%c80] : memref<98xf32, #tpu.memory_space<smem>>
      %579 = vector.extract_strided_slice %562 {offsets = [0, 3], sizes = [16, 16], strides = [1, 1]} : vector<16x22xf32> to vector<16x16xf32>
      %580 = vector.broadcast %578 : f32 to vector<16x16xf32>
      %581 = arith.mulf %580, %579 : vector<16x16xf32>
      %582 = arith.addf %577, %581 : vector<16x16xf32>
      %c81 = arith.constant 81 : index
      %583 = memref.load %arg3[%c81] : memref<98xf32, #tpu.memory_space<smem>>
      %584 = vector.extract_strided_slice %562 {offsets = [0, 4], sizes = [16, 16], strides = [1, 1]} : vector<16x22xf32> to vector<16x16xf32>
      %585 = vector.broadcast %583 : f32 to vector<16x16xf32>
      %586 = arith.mulf %585, %584 : vector<16x16xf32>
      %587 = arith.addf %582, %586 : vector<16x16xf32>
      %c82 = arith.constant 82 : index
      %588 = memref.load %arg3[%c82] : memref<98xf32, #tpu.memory_space<smem>>
      %589 = vector.extract_strided_slice %562 {offsets = [0, 5], sizes = [16, 16], strides = [1, 1]} : vector<16x22xf32> to vector<16x16xf32>
      %590 = vector.broadcast %588 : f32 to vector<16x16xf32>
      %591 = arith.mulf %590, %589 : vector<16x16xf32>
      %592 = arith.addf %587, %591 : vector<16x16xf32>
      %c83 = arith.constant 83 : index
      %593 = memref.load %arg3[%c83] : memref<98xf32, #tpu.memory_space<smem>>
      %594 = vector.extract_strided_slice %562 {offsets = [0, 6], sizes = [16, 16], strides = [1, 1]} : vector<16x22xf32> to vector<16x16xf32>
      %595 = vector.broadcast %593 : f32 to vector<16x16xf32>
      %596 = arith.mulf %595, %594 : vector<16x16xf32>
      %597 = arith.addf %592, %596 : vector<16x16xf32>
      %c1_156 = arith.constant 1 : index
      %c5_157 = arith.constant 5 : index
      %c0_158 = arith.constant 0 : index
      %598 = vector.load %arg7[%c1_156, %c5_157, %c0_158] : memref<2x22x22xf32, #tpu.memory_space<vmem>>, vector<1x16x22xf32>
      %599 = vector.shape_cast %598 : vector<1x16x22xf32> to vector<16x22xf32>
      %c84 = arith.constant 84 : index
      %600 = memref.load %arg3[%c84] : memref<98xf32, #tpu.memory_space<smem>>
      %601 = vector.extract_strided_slice %599 {offsets = [0, 0], sizes = [16, 16], strides = [1, 1]} : vector<16x22xf32> to vector<16x16xf32>
      %602 = vector.broadcast %600 : f32 to vector<16x16xf32>
      %603 = arith.mulf %602, %601 : vector<16x16xf32>
      %604 = arith.addf %560, %603 : vector<16x16xf32>
      %c85 = arith.constant 85 : index
      %605 = memref.load %arg3[%c85] : memref<98xf32, #tpu.memory_space<smem>>
      %606 = vector.extract_strided_slice %599 {offsets = [0, 1], sizes = [16, 16], strides = [1, 1]} : vector<16x22xf32> to vector<16x16xf32>
      %607 = vector.broadcast %605 : f32 to vector<16x16xf32>
      %608 = arith.mulf %607, %606 : vector<16x16xf32>
      %609 = arith.addf %604, %608 : vector<16x16xf32>
      %c86 = arith.constant 86 : index
      %610 = memref.load %arg3[%c86] : memref<98xf32, #tpu.memory_space<smem>>
      %611 = vector.extract_strided_slice %599 {offsets = [0, 2], sizes = [16, 16], strides = [1, 1]} : vector<16x22xf32> to vector<16x16xf32>
      %612 = vector.broadcast %610 : f32 to vector<16x16xf32>
      %613 = arith.mulf %612, %611 : vector<16x16xf32>
      %614 = arith.addf %609, %613 : vector<16x16xf32>
      %c87 = arith.constant 87 : index
      %615 = memref.load %arg3[%c87] : memref<98xf32, #tpu.memory_space<smem>>
      %616 = vector.extract_strided_slice %599 {offsets = [0, 3], sizes = [16, 16], strides = [1, 1]} : vector<16x22xf32> to vector<16x16xf32>
      %617 = vector.broadcast %615 : f32 to vector<16x16xf32>
      %618 = arith.mulf %617, %616 : vector<16x16xf32>
      %619 = arith.addf %614, %618 : vector<16x16xf32>
      %c88 = arith.constant 88 : index
      %620 = memref.load %arg3[%c88] : memref<98xf32, #tpu.memory_space<smem>>
      %621 = vector.extract_strided_slice %599 {offsets = [0, 4], sizes = [16, 16], strides = [1, 1]} : vector<16x22xf32> to vector<16x16xf32>
      %622 = vector.broadcast %620 : f32 to vector<16x16xf32>
      %623 = arith.mulf %622, %621 : vector<16x16xf32>
      %624 = arith.addf %619, %623 : vector<16x16xf32>
      %c89 = arith.constant 89 : index
      %625 = memref.load %arg3[%c89] : memref<98xf32, #tpu.memory_space<smem>>
      %626 = vector.extract_strided_slice %599 {offsets = [0, 5], sizes = [16, 16], strides = [1, 1]} : vector<16x22xf32> to vector<16x16xf32>
      %627 = vector.broadcast %625 : f32 to vector<16x16xf32>
      %628 = arith.mulf %627, %626 : vector<16x16xf32>
      %629 = arith.addf %624, %628 : vector<16x16xf32>
      %c90 = arith.constant 90 : index
      %630 = memref.load %arg3[%c90] : memref<98xf32, #tpu.memory_space<smem>>
      %631 = vector.extract_strided_slice %599 {offsets = [0, 6], sizes = [16, 16], strides = [1, 1]} : vector<16x22xf32> to vector<16x16xf32>
      %632 = vector.broadcast %630 : f32 to vector<16x16xf32>
      %633 = arith.mulf %632, %631 : vector<16x16xf32>
      %634 = arith.addf %629, %633 : vector<16x16xf32>
      %c1_159 = arith.constant 1 : index
      %c6_160 = arith.constant 6 : index
      %c0_161 = arith.constant 0 : index
      %635 = vector.load %arg7[%c1_159, %c6_160, %c0_161] : memref<2x22x22xf32, #tpu.memory_space<vmem>>, vector<1x16x22xf32>
      %636 = vector.shape_cast %635 : vector<1x16x22xf32> to vector<16x22xf32>
      %c91 = arith.constant 91 : index
      %637 = memref.load %arg3[%c91] : memref<98xf32, #tpu.memory_space<smem>>
      %638 = vector.extract_strided_slice %636 {offsets = [0, 0], sizes = [16, 16], strides = [1, 1]} : vector<16x22xf32> to vector<16x16xf32>
      %639 = vector.broadcast %637 : f32 to vector<16x16xf32>
      %640 = arith.mulf %639, %638 : vector<16x16xf32>
      %641 = arith.addf %597, %640 : vector<16x16xf32>
      %c92 = arith.constant 92 : index
      %642 = memref.load %arg3[%c92] : memref<98xf32, #tpu.memory_space<smem>>
      %643 = vector.extract_strided_slice %636 {offsets = [0, 1], sizes = [16, 16], strides = [1, 1]} : vector<16x22xf32> to vector<16x16xf32>
      %644 = vector.broadcast %642 : f32 to vector<16x16xf32>
      %645 = arith.mulf %644, %643 : vector<16x16xf32>
      %646 = arith.addf %641, %645 : vector<16x16xf32>
      %c93 = arith.constant 93 : index
      %647 = memref.load %arg3[%c93] : memref<98xf32, #tpu.memory_space<smem>>
      %648 = vector.extract_strided_slice %636 {offsets = [0, 2], sizes = [16, 16], strides = [1, 1]} : vector<16x22xf32> to vector<16x16xf32>
      %649 = vector.broadcast %647 : f32 to vector<16x16xf32>
      %650 = arith.mulf %649, %648 : vector<16x16xf32>
      %651 = arith.addf %646, %650 : vector<16x16xf32>
      %c94 = arith.constant 94 : index
      %652 = memref.load %arg3[%c94] : memref<98xf32, #tpu.memory_space<smem>>
      %653 = vector.extract_strided_slice %636 {offsets = [0, 3], sizes = [16, 16], strides = [1, 1]} : vector<16x22xf32> to vector<16x16xf32>
      %654 = vector.broadcast %652 : f32 to vector<16x16xf32>
      %655 = arith.mulf %654, %653 : vector<16x16xf32>
      %656 = arith.addf %651, %655 : vector<16x16xf32>
      %c95 = arith.constant 95 : index
      %657 = memref.load %arg3[%c95] : memref<98xf32, #tpu.memory_space<smem>>
      %658 = vector.extract_strided_slice %636 {offsets = [0, 4], sizes = [16, 16], strides = [1, 1]} : vector<16x22xf32> to vector<16x16xf32>
      %659 = vector.broadcast %657 : f32 to vector<16x16xf32>
      %660 = arith.mulf %659, %658 : vector<16x16xf32>
      %661 = arith.addf %656, %660 : vector<16x16xf32>
      %c96 = arith.constant 96 : index
      %662 = memref.load %arg3[%c96] : memref<98xf32, #tpu.memory_space<smem>>
      %663 = vector.extract_strided_slice %636 {offsets = [0, 5], sizes = [16, 16], strides = [1, 1]} : vector<16x22xf32> to vector<16x16xf32>
      %664 = vector.broadcast %662 : f32 to vector<16x16xf32>
      %665 = arith.mulf %664, %663 : vector<16x16xf32>
      %666 = arith.addf %661, %665 : vector<16x16xf32>
      %c97 = arith.constant 97 : index
      %667 = memref.load %arg3[%c97] : memref<98xf32, #tpu.memory_space<smem>>
      %668 = vector.extract_strided_slice %636 {offsets = [0, 6], sizes = [16, 16], strides = [1, 1]} : vector<16x22xf32> to vector<16x16xf32>
      %669 = vector.broadcast %667 : f32 to vector<16x16xf32>
      %670 = arith.mulf %669, %668 : vector<16x16xf32>
      %671 = arith.addf %666, %670 : vector<16x16xf32>
      %672 = arith.addf %412, %375 : vector<16x16xf32>
      %673 = arith.addf %671, %634 : vector<16x16xf32>
      %674 = arith.addf %672, %673 : vector<16x16xf32>
      %cst_162 = arith.constant 0.000000e+00 : f32
      %675 = vector.broadcast %cst_162 : f32 to vector<16x16xf32>
      %676 = arith.subf %675, %674 : vector<16x16xf32>
      %677 = math.exp %676 : vector<16x16xf32>
      %cst_163 = arith.constant 1.000000e+00 : f32
      %678 = vector.broadcast %cst_163 : f32 to vector<16x16xf32>
      %679 = arith.addf %678, %677 : vector<16x16xf32>
      %cst_164 = arith.constant 1.000000e+00 : f32
      %680 = vector.broadcast %cst_164 : f32 to vector<16x16xf32>
      %681 = arith.divf %680, %679 : vector<16x16xf32>
      %c0_165 = arith.constant 0 : index
      %c0_166 = arith.constant 0 : index
      %c0_167 = arith.constant 0 : index
      %c0_168 = arith.constant 0 : index
      %682 = vector.load %arg4[%c0_165, %c0_166, %c0_167, %c0_168] : memref<1x1x16x16xf32, #tpu.memory_space<vmem>>, vector<1x1x16x16xf32>
      %683 = vector.shape_cast %682 : vector<1x1x16x16xf32> to vector<16x16xf32>
      %684 = vector.shape_cast %681 : vector<16x16xf32> to vector<1x1x16x16xf32>
      tpu.vector_store %arg4[%c0_165, %c0_166, %c0_167, %c0_168], %684 {strides = array<i32>} : memref<1x1x16x16xf32, #tpu.memory_space<vmem>>, vector<1x1x16x16xf32>,
    } else {
    }
    return
  }
  func.func @transform_0(%arg0: i32, %arg1: i32) -> (i32, i32, i32) {
    %c0_i32 = arith.constant 0 : i32
    %c0_i32_0 = arith.constant 0 : i32
    return %arg0, %arg1, %c0_i32 : i32, i32, i32
  }
  func.func @transform_1(%arg0: i32, %arg1: i32) -> i32 {
    %c0_i32 = arith.constant 0 : i32
    %c0_i32_0 = arith.constant 0 : i32
    return %c0_i32 : i32
  }
  func.func @transform_2(%arg0: i32, %arg1: i32) -> (i32, i32, i32, i32) {
    %c0_i32 = arith.constant 0 : i32
    %c0_i32_0 = arith.constant 0 : i32
    %c0_i32_1 = arith.constant 0 : i32
    %c0_i32_2 = arith.constant 0 : i32
    return %arg0, %c0_i32, %c0_i32_0, %c0_i32_1 : i32, i32, i32, i32
  }
}

</mosaic_0001>

<bundles_post_ra>
// kernel: spatial_attention.1
= control target key start
LH: loop header
LB: loop body
LE: loop exit
PB: predicated region body
PF: predicated region fallthrough
CT: control target
= control target key end

     0   :  { %s3224_s0 = inlined_call_operand.vmem [shape: f32[2,4,256], index: 0, kind: input, shape index: {}]   ;;  %s3225_s1 = inlined_call_operand.vmem [shape: f32[98], index: 1, kind: input, shape index: {}]   ;;  %s3226_s2 = inlined_call_operand.hbm [shape: f32[2,1,16,16], index: 2, kind: output, shape index: {}]  }
   0x1   :  { %3257 = sst [smem:[#allocation26_spill]] %s3224_s0 }
   0x2   :  { %3258 = sst [smem:[#allocation27_spill]] %s3225_s1 }
   0x3   :  { %3259 = sst [smem:[#allocation28_spill]] %s3226_s2 }
   0x4   :  { %7 = vsyncpa [#allocation7], 0 }
   0x5   :  { %8 = vsyncpa [#allocation6], 0 }
   0x6   :  { %10 = vsyncpa [#allocation6 + $0x1], 0  ;;  %s2257_s9 = smov 0   ;;  %s2259_s10 = smov 0  }
   0x7   :  { %s2261_s11 = smov 0   ;;  %s2263_s12 = smov 0  }
   0x8   :  { %s2265_s13 = smov 0   ;;  %s2267_s14 = smov 0  }
   0x9 LB: > { %3260 = sst [smem:[#allocation11_spill]] %s2194_s9  ;;  %s1904_s15 = sadd.s32 4294967295, %s2214_s14   ;;  %s2214_s14 = sphi %s2267_s14, %s16_s14   ;;  %s2210_s13 = sphi %s2265_s13, %s3303_s13   ;;  %s2206_s12 = sphi %s2263_s12, %s3302_s12   ;;  %s2202_s11 = sphi %s2261_s11, %s3301_s11   ;;  %s2198_s10 = sphi %s2259_s10, %s3300_s10   ;;  %s2194_s9 = sphi %s2257_s9, %s3299_s9  }
   0xa   : > { %3261 = sst [smem:[#allocation12_spill]] %s2198_s10  ;;  %s1905_s16 = sadd.s32 4294967294, %s2214_s14  }
   0xb   : > { %3262 = sst [smem:[#allocation13_spill]] %s2202_s11  ;;  %s28_s17 = sadd.s32 1, %s2210_s13 }
   0xc   : > { %3263 = sst [smem:[#allocation14_spill]] %s2206_s12  ;;  %s84_s18 = sadd.s32 1, %s2202_s11 }
   0xd   : > { %3264 = sst [smem:[#allocation15_spill]] %s2210_s13  ;;  %p30_p0 = scmp.ge.s32.totalorder %s28_s17, 2 }
   0xe   : > { %3265 = sst [smem:[#allocation16_spill]] %s2214_s14  ;;  %p94_p1 = scmp.ne.s32.totalorder %s2202_s11, %s2198_s10 }
   0xf   : > { %p95_p2 = scmp.eq.s32.totalorder %s1904_s15, 1  ;;  %p100_p3 = scmp.ne.s32.totalorder %s2198_s10, %s2194_s9 }
  0x10   : > { %s3305_s17 = smov (%p30_p0, %s28_s17), 0  ;;  %p101_p5 = scmp.eq.s32.totalorder %s1905_s16, 1 }
  0x11   : > { %3266 = sst [smem:[#allocation17_spill]] %s3305_s17  ;;  %p2297_p4 = por %p95_p2, %p94_p1 }
  0x12   : > { %s81_s20 = ssub.s32 %s2210_s13, %s3305_s17  ;;  %p1906_p6 = scmp.ge.s32.totalorder %s2214_s14, 1 }
  0x13   : > { %s3267_s19 = scalar_select %p2297_p4, 1, 0 }
  0x14   : > { %p82_p7 = scmp.eq.s32.totalorder %s81_s20, 0  ;;  %p2304_p8 = por %p101_p5, %p100_p3 }
  0x15   : > { %3268 = sst [smem:[#allocation18_spill]] %s3267_s19  ;;  %p108_p9 = scmp.lt.s32.totalorder %s2214_s14, 3 }
  0x16   : > { %s3269_s21 = scalar_select %p2304_p8, 1, 0 }
  0x17   : > { %s2310_s22 = scalar_select %p82_p7, %s2202_s11, %s84_s18  }
  0x18   : > { %3270 = sst [smem:[#allocation19_spill]] %s3269_s21  ;;  %p109_p10 = pnand %p1906_p6, %p108_p9 }
  0x19   : > { %3271 = sst [smem:[#allocation20_spill]] %s2310_s22  ;;  %p2032_p11 = scmp.eq.s32.totalorder %s1904_s15, 0 }
  0x1a   : > { %s3272_s1 = sld [smem:[#allocation27_spill]]  ;;  %p2024_p12 = pneg %p109_p10 }
  0x1b   : > { %s2216_s26 = smov [#allocation5]  }
  0x1c   : > { %p2025_p13 = pnand %p2032_p11, %p2024_p12 }
  0x1d   : > { %145 = sbr.rel (%p109_p10) target bundleno = 904 (0x388), region = 28 }
  0x20   : > { %s120_s25 = sshll.u32 %s3272_s1, 4  ;;  %s121_s25 = int_to_ptr.vmem [resolvable:$true] %s120_s25 }
  0x21   : > { %2027 = dma.vmem_to_smem (!%p2025_p13), %s121_s25, 16, %s2216_s26, [#allocation7]  }
  0x22   : > { %2185 = dma.done.wait (%p2032_p11), [#allocation7], 16  }
  0x23   : > { %2187 = vsyncadd (%p2032_p11), [#allocation7], 4294967280 }
  0x24   : > { %152 = sfence }
  0x25   : > { %p173_p0 = scmp.lt.s32.totalorder %s2206_s12, 1  ;;  %v186_v0 = vlaneseq  ;;  %v2217_v2 = vmov 0.0   ;;  %s3275_s0 = sld [smem:[#allocation26_spill]]  ;;  %vm208_vm1 = vcmask 1043456   ;;  %v2218_v12 = vmov -inf  }
  0x26   : > { %vm226_vm2 = vcmask 1040384   ;;  %s2219_s4 = smov 96   ;;  %s2220_s5 = smov 112   ;;  %vm192_vm3 = vcmask 179200   ;;  %vm273_vm4 = vcmask 147480   ;;  %vm195_vm5 = vcmask 177152  }
  0x27   : > { %s174_s27 = scalar_select %p173_p0, %s2206_s12, 1  ;;  %vm2317_vm0 = vcmp.lt.s32.totalorder %v186_v0, 256  ;;  %193 = vst.msk [vmem:[#allocation4] sm:$0xff] %vm192_vm3, %v2217_v2  ;;  %vm1794_vm9 = vcmask 130048  }
  0x28   : > { %190 = vst.msk [vmem:[#allocation2] sm:$0x3] %vm2317_vm0, %v2217_v2  ;;  %s2221_s6 = smov 99   ;;  %s2222_s7 = smov 115  }
  0x29   : > { %s2016_s28 = sshll.u32 %s174_s27, 3  ;;  %191 = vst.msk [vmem:[#allocation3] sm:$0x3] %vm2317_vm0, %v2218_v12  ;;  %s2223_s8 = smov 3  }
  0x2a   : > { %s2224_s15 = smov 67   ;;  %s2225_s16 = smov 51   ;;  %194 = vst.msk [vmem:[#allocation4 + $0x8] sm:$0xff] %vm192_vm3, %v2217_v2 }
  0x2b   : > { %s181_s3 = scalar_lea.vmem %s3275_s0, %s2016_s28  ;;  %s2226_s18 = smov 83   ;;  %197 = vst.msk [vmem:[#allocation4 + $0x18] sm:$0xff] %vm192_vm3, %v2217_v2 }
  0x2c   : > { %v200_v3 = vld [vmem:[%s181_s3] sm:$0xff]  ;;  %s2227_s20 = smov 19   ;;  %s2228_s23 = smov 35   ;;  %198 = vst.msk [vmem:[#allocation4 + $0x20] sm:$0xff] %vm192_vm3, %v2217_v2 }
  0x2d   : > { %203 = vst [vmem:[#allocation1] ss:$2 sm:$0xff] %v200_v3  ;;  %s2229_s24 = smov 80   ;;  %s2230_s25 = smov 48  }
  0x2e   : > { %s2231_s26 = smov 64   ;;  %s2232_s27 = smov 32   ;;  %196 = vst.msk [vmem:[#allocation4 + $0x10] sm:$0x3f] %vm195_vm5, %v2217_v2 }
  0x2f   : > { %v201_v29 = vld [vmem:[#allocation2] sm:$0x3]  ;;  %s2233_s28 = smov 16   ;;  %s2375_s29 = sld [smem:[#allocation5 + $0x2]]  ;;  %199 = vst.msk [vmem:[#allocation4 + $0x28] sm:$0x3f] %vm195_vm5, %v2217_v2 }
  0x30   : > { %v235_v41 = vld [vmem:[#allocation3] sm:$0x3]  ;;  %s2379_s30 = sld [smem:[#allocation5 + $0x3]]  ;;  %s3279_s1 = smov 123  }
  0x31   : > { %s2384_s3 = sld [smem:[#allocation5 + $0x5]]  ;;  %s3281_s11 = smov 122  }
  0x32   : > { %s2476_s0 = sld [smem:[#allocation5 + $0xb]]  ;;  %s3282_s21 = smov 124  }
  0x33   : > { %s2494_s17 = sld [smem:[#allocation5 + $0x18]]  ;;  %s3283_s9 = smov 126  }
  0x34   : > { %v204_v4 = vld.sshfl [vmem:[#allocation1] sm:$0xff pattern:$0x75316420]  ;;  %v205_v5 = vld.sshfl [vmem:[#allocation1 + $0x8] sm:$0xff pattern:$0x75316420] }
  0x35   : > { %v209_v6 = vsel %vm208_vm1, %v204_v4, 0.0  ;;  %v216_v7 = vsel %vm208_vm1, %v205_v5, 0.0  ;;  %236 = vst [vmem:[#allocation1] ss:$2 sm:$0xff] %v200_v3  ;;  %s2499_s13 = sld [smem:[#allocation5 + $0xf]] }
  0x36   : > { %v210_v8 = vrot.slane %v209_v6, 4  ;;  %v217_v9 = vrot.slane %v216_v7, 4  ;;  %s2504_s22 = sld [smem:[#allocation5 + $0x1a]] }
  0x37   : > { %s2518_s14 = sld [smem:[#allocation5 + $0x1b]] }
  0x38   : > { %v211_v10 = vadd.f32 %v210_v8, %v209_v6  ;;  %v218_v11 = vadd.f32 %v217_v9, %v216_v7  ;;  %s2522_s19 = sld [smem:[#allocation5 + $0x12]] }
  0x39   : > { %s2525_s2 = sld [smem:[#allocation5 + $0x1e]] }
  0x3a   : > { %v212_v13 = vrot.slane %v211_v10, 2  ;;  %v219_v14 = vrot.slane %v218_v11, 2  ;;  %s2539_s12 = sld [smem:[#allocation5 + $0x1f]] }
  0x3b   : > { %s2543_s10 = sld [smem:[#allocation5 + $0x16]] }
  0x3c   : > { %v213_v15 = vadd.f32 %v212_v13, %v211_v10  ;;  %v220_v16 = vadd.f32 %v219_v14, %v218_v11  ;;  %v237_v17 = vld.sshfl [vmem:[#allocation1] sm:$0xff pattern:$0x75316420]  ;;  %v238_v18 = vld.sshfl [vmem:[#allocation1 + $0x8] sm:$0xff pattern:$0x75316420] }
  0x3d   : > { %v241_v19 = vsel %vm208_vm1, %v237_v17, -inf  ;;  %v248_v20 = vsel %vm208_vm1, %v238_v18, -inf  ;;  %3280 = sst [smem:[#allocation22_spill]] %s2504_s22 }
  0x3e   : > { %v214_v21 = vrot.slane %v213_v15, 1  ;;  %v221_v22 = vrot.slane %v220_v16, 1  ;;  %v242_v23 = vrot.slane %v241_v19, 4  ;;  %v249_v24 = vrot.slane %v248_v20, 4  ;;  %3284 = sst [smem:[#allocation23_spill]] %s2518_s14 }
  0x3f   : > { %3285 = sst [smem:[#allocation24_spill]] %s2525_s2 }
  0x40   : > { %v215_v25 = vadd.f32 %v214_v21, %v213_v15  ;;  %v222_v26 = vadd.f32 %v221_v22, %v220_v16  ;;  %v243_v27 = vmax.f32 %v241_v19, %v242_v23  ;;  %v250_v28 = vmax.f32 %v248_v20, %v249_v24 }
  0x42   : > { %v225_v30 = vrot.slane %v222_v26, 7  ;;  %v244_v31 = vrot.slane %v243_v27, 2  ;;  %v251_v32 = vrot.slane %v250_v28, 2 }
  0x44   : > { %v227_v33 = vsel %vm226_vm2, %v215_v25, %v225_v30  ;;  %v245_v34 = vmax.f32 %v243_v27, %v244_v31  ;;  %v252_v35 = vmax.f32 %v250_v28, %v251_v32 }
  0x45   : > { %v229_v36 = vadd.f32 %v227_v33, %v201_v29 }
  0x46   : > { %v246_v37 = vrot.slane %v245_v34, 1  ;;  %v253_v38 = vrot.slane %v252_v35, 1 }
  0x47   : > { %234 = vst.msk [vmem:[#allocation2] sm:$0x3] %vm2317_vm0, %v229_v36 }
  0x48   : > { %v247_v39 = vmax.f32 %v245_v34, %v246_v37  ;;  %v254_v40 = vmax.f32 %v252_v35, %v253_v38 }
  0x4a   : > { %v257_v42 = vrot.slane %v254_v40, 7 }
  0x4c   : > { %v258_v43 = vsel %vm226_vm2, %v247_v39, %v257_v42 }
  0x4d   : > { %v260_v44 = vmax.f32 %v235_v41, %v258_v43 }
  0x4e   : > { %v265_v45 = vld [vmem:[#allocation2] sm:$0x3] }
  0x4f   : > { %v266_v46 = vmul.f32 0.25, %v265_v45  ;;  %261 = vst.msk [vmem:[#allocation3] sm:$0x3] %vm2317_vm0, %v260_v44 }
  0x51   : > { %366 = vrot.lane.b32.xlu1 %v266_v46, %s2219_s4  ;;  %350 = vrot.lane.b32.xlu0 %v266_v46, %s2220_s5  ;;  %v269_v47 = vperm.slane %v266_v46, 0  ;;  %v338_v48 = vrot.slane %v266_v46, 1 }
  0x53   : > { %290 = vrot.lane.b32.xlu2 %v269_v47, %s2221_s6  ;;  %v339_v49 = vperm.slane %v338_v48, 0 }
  0x56   : > { %v267_v50 = vld [vmem:[#allocation3] sm:$0x3] }
  0x57   : > { %v276_v51 = vperm.slane %v267_v50, 0  ;;  %v344_v52 = vrot.slane %v267_v50, 1 }
  0x59   : > { %282 = vrot.lane.b32.xlu1 %v269_v47, %s2222_s7  ;;  %270 = vrot.lane.b32.xlu0 %v269_v47, %s2223_s8  ;;  %v345_v53 = vperm.slane %v344_v52, 0  ;;  %v527_v52 = vstv %s2384_s3  ;;  %s2907_s3 = sld [smem:[#allocation5 + $0x3a]] }
  0x5b   : > { %306 = vrot.lane.b32.xlu2 %v269_v47, %s2224_s15 }
  0x61   : > { %314 = vrot.lane.b32.xlu1 %v269_v47, %s2225_s16  ;;  %298 = vrot.lane.b32.xlu0 %v269_v47, %s2226_s18 }
  0x63   : > { %330 = vrot.lane.b32.xlu2 %v269_v47, %s2227_s20 }
  0x69   : > { %340 = vrot.lane.b32.xlu1 %v339_v49, %s2223_s8  ;;  %322 = vrot.lane.b32.xlu0 %v269_v47, %s2228_s23  ;;  %v485_v47 = vstv %s2375_s29  ;;  %s2658_s29 = sld [smem:[#allocation5]] }
  0x6b   : > { %358 = vrot.lane.b32.xlu2 %v267_v50, %s2220_s5  ;;  %s2393_s5 = sld [smem:[#allocation5 + $0x6]] }
  0x71   : > { %286 = vrot.lane.b32.xlu1 %v276_v51, %s2222_s7  ;;  %277 = vrot.lane.b32.xlu0 %v276_v51, %s2223_s8  ;;  %s3227_s7 = smov 125  }
  0x73   : > { %294 = vrot.lane.b32.xlu2 %v276_v51, %s2221_s6  ;;  %s2396_s6 = sld [smem:[#allocation5 + $0x9]] }
  0x79   : > { %302 = vrot.lane.b32.xlu1 %v276_v51, %s2226_s18  ;;  %310 = vrot.lane.b32.xlu0 %v276_v51, %s2224_s15  ;;  %s3229_s15 = smov 123   ;;  %s2410_s18 = sld [smem:[#allocation5 + $0x1]] }
  0x7b   : > { %318 = vrot.lane.b32.xlu2 %v276_v51, %s2225_s16  ;;  %s2407_s16 = sld [smem:[#allocation5 + $0xa]] }
  0x81   : > { %326 = vrot.lane.b32.xlu1 %v276_v51, %s2228_s23  ;;  %334 = vrot.lane.b32.xlu0 %v276_v51, %s2227_s20  ;;  %v499_v51 = vstv %s2379_s30  ;;  %s2416_s20 = sld [smem:[#allocation5 + $0xc]]  ;;  %s3233_s23 = smov 122  }
  0x82   : > { %s2697_s30 = sld [smem:[#allocation5 + $0x7]] }
  0x83   : > { %346 = vrot.lane.b32.xlu2 %v345_v53, %s2223_s8 }
  0x89   : > { %390 = vrot.lane.b32.xlu1 %v267_v50, %s2229_s24  ;;  %374 = vrot.lane.b32.xlu0 %v267_v50, %s2219_s4  ;;  %s3235_s4 = smov 126  }
  0x8b   : > { %382 = vrot.lane.b32.xlu2 %v266_v46, %s2229_s24  ;;  %s2427_s24 = sld [smem:[#allocation5 + $0xd]] }
  0x91   : > { %414 = vrot.lane.b32.xlu1 %v266_v46, %s2230_s25  ;;  %398 = vrot.lane.b32.xlu0 %v266_v46, %s2231_s26 }
  0x93   : > { %406 = vrot.lane.b32.xlu2 %v267_v50, %s2231_s26  ;;  %s2434_s26 = sld [smem:[#allocation5 + $0x10]] }
  0x99   : > { %422 = vrot.lane.b32.xlu0 %v267_v50, %s2230_s25  ;;  %438 = vrot.lane.b32.xlu1 %v267_v50, %s2232_s27  ;;  %s2431_s25 = sld [smem:[#allocation5 + $0x4]] }
  0x9b   : > { %430 = vrot.lane.b32.xlu2 %v266_v46, %s2232_s27  ;;  %s2448_s27 = sld [smem:[#allocation5 + $0x11]] }
  0xa1   : > { %446 = vrot.lane.b32.xlu0 %v266_v46, %s2233_s28 }
  0xa3   : > { %454 = vrot.lane.b32.xlu2 %v267_v50, %s2233_s28  ;;  %s2452_s28 = sld [smem:[#allocation5 + $0x8]] }
  0xad   : > { %v291_v54 = vpop.permute.xlu2 %290 }
  0xae   : > { %293 = vst.msk [vmem:[#allocation4 + $0x5] sm:$0x1] %vm273_vm4, %v291_v54 }
  0xb5   : > { %v307_v55 = vpop.permute.xlu2 %306 }
  0xb6   : > { %309 = vst.msk [vmem:[#allocation4 + $0x7] sm:$0x1] %vm273_vm4, %v307_v55 }
  0xbd   : > { %v331_v56 = vpop.permute.xlu2 %330 }
  0xbe   : > { %333 = vst.msk [vmem:[#allocation4 + $0xa] sm:$0x1] %vm273_vm4, %v331_v56 }
  0xc3   : > { %v367_v57 = vpop.permute.xlu1 %366  ;;  %v351_v58 = vpop.permute.xlu0 %350 }
  0xc4   : > { %v368_v59 = vrot.slane %v367_v57, 1  ;;  %v352_v60 = vrot.slane %v351_v58, 1  ;;  %v541_v58 = vstv %s2393_s5  ;;  %s2730_s5 = sld [smem:[#allocation5 + $0x15]] }
  0xc5   : > { %v359_v61 = vpop.permute.xlu2 %358 }
  0xc6   : > { %v369_v62 = vperm.slane %v368_v59, 0  ;;  %v353_v63 = vperm.slane %v352_v60, 0  ;;  %v360_v25 = vrot.slane %v359_v61, 1  ;;  %v577_v60 = vstv %s2396_s6  ;;  %s1949_s6 = sld [smem:[#allocation5 + $0x24]] }
  0xc8   : > { %354 = vrot.lane.b32.xlu1 %v353_v63, %s2223_s8  ;;  %370 = vrot.lane.b32.xlu2 %v369_v62, %s2223_s8  ;;  %v361_v26 = vperm.slane %v360_v25, 0 }
  0xcb   : > { %v283_v0 = vpop.permute.xlu1 %282  ;;  %v271_v1 = vpop.permute.xlu0 %270 }
  0xcc   : > { %285 = vst.msk [vmem:[#allocation4 + $0x4] sm:$0x1] %vm273_vm4, %v283_v0  ;;  %v591_v0 = vstv %s2407_s16  ;;  %s1952_s16 = sld [smem:[#allocation5 + $0x27]] }
  0xcd   : > { %274 = vst.msk [vmem:[#allocation4 + $0x3] sm:$0x1] %vm273_vm4, %v271_v1  ;;  %v295_v3 = vpop.permute.xlu2 %294  ;;  %v471_v1 = vstv %s2410_s18  ;;  %s1954_s18 = sld [smem:[#allocation5 + $0x29]] }
  0xce   : > { %297 = vst.msk [vmem:[#allocation4 + $0x1d] sm:$0x1] %vm273_vm4, %v295_v3  ;;  %v619_v3 = vstv %s2416_s20  ;;  %s2817_s20 = sld [smem:[#allocation5 + $0x2a]] }
  0xd3   : > { %v315_v4 = vpop.permute.xlu1 %314  ;;  %v299_v5 = vpop.permute.xlu0 %298 }
  0xd4   : > { %317 = vst.msk [vmem:[#allocation4 + $0x8] sm:$0x1] %vm273_vm4, %v315_v4 }
  0xd5   : > { %301 = vst.msk [vmem:[#allocation4 + $0x6] sm:$0x1] %vm273_vm4, %v299_v5  ;;  %v319_v6 = vpop.permute.xlu2 %318 }
  0xd6   : > { %321 = vst.msk [vmem:[#allocation4 + $0x20] sm:$0x1] %vm273_vm4, %v319_v6 }
  0xdb   : > { %v341_v7 = vpop.permute.xlu1 %340  ;;  %v323_v8 = vpop.permute.xlu0 %322 }
  0xdc   : > { %343 = vst.msk [vmem:[#allocation4 + $0xb] sm:$0x1] %vm273_vm4, %v341_v7  ;;  %v2381_v46 = vld [vmem:[#allocation4] sm:$0xff]  ;;  %v633_v7 = vstv %s2427_s24  ;;  %s1956_s24 = sld [smem:[#allocation5 + $0x2b]] }
  0xdd   : > { %325 = vst.msk [vmem:[#allocation4 + $0x9] sm:$0x1] %vm273_vm4, %v323_v8  ;;  %v347_v9 = vpop.permute.xlu2 %346  ;;  %v486_v49 = vmul.f32 %v485_v47, %v2381_v46  ;;  %v500_v54 = vmul.f32 %v499_v51, %v2381_v46  ;;  %v528_v55 = vmul.f32 %v527_v52, %v2381_v46  ;;  %v2413_v59 = vld [vmem:[#allocation4 + $0x1] sm:$0xff]  ;;  %v542_v62 = vmul.f32 %v541_v58, %v2381_v46 }
  0xde   : > { %349 = vst.msk [vmem:[#allocation4 + $0x23] sm:$0x1] %vm273_vm4, %v347_v9  ;;  %v578_v63 = vmul.f32 %v577_v60, %v2413_v59  ;;  %v592_v4 = vmul.f32 %v591_v0, %v2413_v59  ;;  %v472_v5 = vmul.f32 %v471_v1, %v2381_v46  ;;  %v620_v6 = vmul.f32 %v619_v3, %v2413_v59 }
  0xdf   : > { %v513_v8 = vstv %s2431_s25  ;;  %s1958_s25 = sld [smem:[#allocation5 + $0x2d]] }
  0xe3   : > { %v287_v10 = vpop.permute.xlu1 %286  ;;  %v278_v11 = vpop.permute.xlu0 %277 }
  0xe4   : > { %289 = vst.msk [vmem:[#allocation4 + $0x1c] sm:$0x1] %vm273_vm4, %v287_v10  ;;  %v2454_v9 = vld [vmem:[#allocation4 + $0x2] sm:$0xff]  ;;  %v669_v10 = vstv %s2434_s26  ;;  %s2849_s26 = sld [smem:[#allocation5 + $0x2f]] }
  0xe5   : > { %281 = vst.msk [vmem:[#allocation4 + $0x1b] sm:$0x1] %vm273_vm4, %v278_v11  ;;  %v383_v12 = vpop.permute.xlu2 %382  ;;  %v634_v11 = vmul.f32 %v633_v7, %v2413_v59 }
  0xe6   : > { %v384_v13 = vrot.slane %v383_v12, 1  ;;  %v514_v12 = vmul.f32 %v513_v8, %v2381_v46 }
  0xe8   : > { %v385_v14 = vperm.slane %v384_v13, 0  ;;  %v670_v13 = vmul.f32 %v669_v10, %v2454_v9 }
  0xea   : > { %386 = vrot.lane.b32.xlu0 %v385_v14, %s2223_s8 }
  0xeb   : > { %v303_v15 = vpop.permute.xlu1 %302  ;;  %v311_v16 = vpop.permute.xlu0 %310 }
  0xec   : > { %305 = vst.msk [vmem:[#allocation4 + $0x1e] sm:$0x1] %vm273_vm4, %v303_v15  ;;  %v683_v15 = vstv %s2448_s27  ;;  %s1961_s27 = sld [smem:[#allocation5 + $0x30]] }
  0xed   : > { %313 = vst.msk [vmem:[#allocation4 + $0x1f] sm:$0x1] %vm273_vm4, %v311_v16  ;;  %v407_v17 = vpop.permute.xlu2 %406  ;;  %v563_v16 = vstv %s2452_s28  ;;  %s2867_s28 = sld [smem:[#allocation5 + $0x33]] }
  0xee   : > { %v408_v27 = vrot.slane %v407_v17, 1 }
  0xf0   : > { %v409_v32 = vperm.slane %v408_v27, 0  ;;  %v775_v27 = vstv %s2494_s17  ;;  %s2766_s17 = sld [smem:[#allocation5 + $0x1c]] }
  0xf3   : > { %v327_v18 = vpop.permute.xlu1 %326  ;;  %v335_v19 = vpop.permute.xlu0 %334 }
  0xf4   : > { %329 = vst.msk [vmem:[#allocation4 + $0x21] sm:$0x1] %vm273_vm4, %v327_v18  ;;  %v684_v18 = vmul.f32 %v683_v15, %v2454_v9 }
  0xf5   : > { %337 = vst.msk [vmem:[#allocation4 + $0x22] sm:$0x1] %vm273_vm4, %v335_v19  ;;  %v431_v20 = vpop.permute.xlu2 %430  ;;  %v564_v19 = vmul.f32 %v563_v16, %v2413_v59 }
  0xf6   : > { %v432_v21 = vrot.slane %v431_v20, 1 }
  0xf8   : > { %v433_v22 = vperm.slane %v432_v21, 0 }
  0xfa   : > { %434 = vrot.lane.b32.xlu0 %v433_v22, %s2223_s8  ;;  %v605_v22 = vstv %s2476_s0  ;;  %s2690_s0 = sld [smem:[#allocation5 + $0xe]] }
  0xfb   : > { %v391_v23 = vpop.permute.xlu1 %390  ;;  %v375_v24 = vpop.permute.xlu0 %374  ;;  %v606_v2 = vmul.f32 %v605_v22, %v2413_v59 }
  0xfc   : > { %v392_v36 = vrot.slane %v391_v23, 1  ;;  %v376_v50 = vrot.slane %v375_v24, 1  ;;  %v2501_v23 = vld [vmem:[#allocation4 + $0x3] sm:$0xff] }
  0xfd   : > { %v455_v35 = vpop.permute.xlu2 %454 }
  0xfe   : > { %v456_v37 = vrot.slane %v455_v35, 1  ;;  %v393_v39 = vperm.slane %v392_v36, 0  ;;  %v377_v53 = vperm.slane %v376_v50, 0  ;;  %v2545_v35 = vld [vmem:[#allocation4 + $0x4] sm:$0xff]  ;;  %v853_v36 = vstv %s2525_s2  ;;  %s2585_s2 = sld [smem:[#allocation5 + $0x1d]] }
 0x100   : > { %v457_v41 = vperm.slane %v456_v37, 0 }
 0x102   : > { %362 = vrot.lane.b32.xlu0 %v361_v26, %s2223_s8 }
 0x103   : > { %v415_v28 = vpop.permute.xlu1 %414  ;;  %v399_v29 = vpop.permute.xlu0 %398 }
 0x104   : > { %v416_v30 = vrot.slane %v415_v28, 1  ;;  %v400_v31 = vrot.slane %v399_v29, 1  ;;  %v655_v28 = vstv %s2499_s13  ;;  %v803_v29 = vstv %s2504_s22  ;;  %s2562_s22 = sld [smem:[#allocation5 + $0x22]] }
 0x105   : > { %s1966_s13 = sld [smem:[#allocation5 + $0x35]] }
 0x106   : > { %v417_v33 = vperm.slane %v416_v30, 0  ;;  %v401_v34 = vperm.slane %v400_v31, 0  ;;  %v776_v30 = vmul.f32 %v775_v27, %v2501_v23  ;;  %v656_v31 = vmul.f32 %v655_v28, %v2454_v9 }
 0x108   : > { %418 = vrot.lane.b32.xlu2 %v417_v33, %s2223_s8  ;;  %402 = vrot.lane.b32.xlu1 %v401_v34, %s2223_s8  ;;  %v817_v33 = vstv %s2518_s14  ;;  %v697_v34 = vstv %s2522_s19  ;;  %s2566_s14 = sld [smem:[#allocation5 + $0x19]] }
 0x109   : > { %v818_v37 = vmul.f32 %v817_v33, %v2501_v23  ;;  %s1968_s19 = sld [smem:[#allocation5 + $0x37]] }
 0x10a   : > { %410 = vrot.lane.b32.xlu0 %v409_v32, %s2223_s8  ;;  %v804_v32 = vmul.f32 %v803_v29, %v2501_v23  ;;  %v909_v50 = vstv %s2562_s22  ;;  %s2794_s22 = sld [smem:[#allocation5 + $0x23]] }
 0x10b   : > { %v423_v38 = vpop.permute.xlu0 %422  ;;  %v439_v40 = vpop.permute.xlu1 %438 }
 0x10c   : > { %v440_v42 = vrot.slane %v439_v40, 1  ;;  %v424_v56 = vrot.slane %v423_v38, 1  ;;  %v698_v38 = vmul.f32 %v697_v34, %v2454_v9  ;;  %v867_v40 = vstv %s2539_s12  ;;  %s2771_s12 = sld [smem:[#allocation5 + $0x25]] }
 0x10e   : > { %v441_v44 = vperm.slane %v440_v42, 0  ;;  %v425_v61 = vperm.slane %v424_v56, 0 }
 0x110   : > { %394 = vrot.lane.b32.xlu2 %v393_v39, %s2223_s8  ;;  %v854_v39 = vmul.f32 %v853_v36, %v2545_v35 }
 0x112   : > { %458 = vrot.lane.b32.xlu0 %v457_v41, %s2223_s8  ;;  %v747_v41 = vstv %s2543_s10  ;;  %s1972_s10 = sld [smem:[#allocation5 + $0x3b]] }
 0x113   : > { %v447_v43 = vpop.permute.xlu0 %446 }
 0x114   : > { %v448_v45 = vrot.slane %v447_v43, 1 }
 0x116   : > { %v449_v48 = vperm.slane %v448_v45, 0  ;;  %v748_v45 = vmul.f32 %v747_v41, %v2501_v23 }
 0x118   : > { %442 = vrot.lane.b32.xlu2 %v441_v44, %s2223_s8  ;;  %450 = vrot.lane.b32.xlu1 %v449_v48, %s2223_s8  ;;  %v868_v44 = vmul.f32 %v867_v40, %v2545_v35 }
 0x11a   : > { %490 = vrot.lane.b32.xlu0 %v486_v49, %s3235_s4 }
 0x120   : > { %504 = vrot.lane.b32.xlu2 %v500_v54, %s3227_s7  ;;  %378 = vrot.lane.b32.xlu1 %v377_v53, %s2223_s8  ;;  %v789_v53 = vstv %s2566_s14  ;;  %v910_v54 = vmul.f32 %v909_v50, %v2545_v35  ;;  %s2929_s14 = sld [smem:[#allocation5 + $0x3d]] }
 0x122   : > { %532 = vrot.lane.b32.xlu0 %v528_v55, %s3229_s15  ;;  %v371_v57 = vpop.permute.xlu2 %370  ;;  %v790_v55 = vmul.f32 %v789_v53, %v2501_v23 }
 0x123   : > { %373 = vst.msk [vmem:[#allocation4 + $0xd] sm:$0x1] %vm273_vm4, %v371_v57  ;;  %v839_v57 = vstv %s2585_s2  ;;  %s1951_s2 = sld [smem:[#allocation5 + $0x26]] }
 0x128   : > { %546 = vrot.lane.b32.xlu2 %v542_v62, %s3233_s23  ;;  %426 = vrot.lane.b32.xlu1 %v425_v61, %s2223_s8  ;;  %s3231_s8 = smov 127   ;;  %v840_v62 = vmul.f32 %v839_v57, %v2545_v35 }
 0x12a   : > { %582 = vrot.lane.b32.xlu0 %v578_v63, %s3235_s4 }
 0x130   : > { %596 = vrot.lane.b32.xlu2 %v592_v4, %s3227_s7  ;;  %476 = vrot.lane.b32.xlu1 %v472_v5, %s3231_s8  ;;  %s2457_s7 = sld [smem:[#allocation5 + $0x13]] }
 0x131   : > { %s2471_s8 = sld [smem:[#allocation5 + $0x14]] }
 0x132   : > { %624 = vrot.lane.b32.xlu0 %v620_v6, %s3229_s15  ;;  %s3237_s15 = smov 124  }
 0x136   : > { %v711_v17 = vstv %s2457_s7  ;;  %s2799_s7 = sld [smem:[#allocation5 + $0x28]] }
 0x137   : > { %v712_v20 = vmul.f32 %v711_v17, %v2454_v9  ;;  %v725_v21 = vstv %s2471_s8  ;;  %s1959_s8 = sld [smem:[#allocation5 + $0x2e]] }
 0x138   : > { %638 = vrot.lane.b32.xlu2 %v634_v11, %s3233_s23  ;;  %518 = vrot.lane.b32.xlu1 %v514_v12, %s3237_s15  ;;  %s2479_s23 = sld [smem:[#allocation5 + $0x17]]  ;;  %s3278_s15 = smov 127   ;;  %v726_v25 = vmul.f32 %v725_v21, %v2454_v9 }
 0x13a   : > { %v355_v14 = vpop.permute.xlu1 %354  ;;  %674 = vrot.lane.b32.xlu0 %v670_v13, %s3235_s4  ;;  %s3277_s4 = smov 125  }
 0x13b   : > { %357 = vst.msk [vmem:[#allocation4 + $0xc] sm:$0x1] %vm273_vm4, %v355_v14 }
 0x13e   : > { %3276 = sst [smem:[#allocation21_spill]] %s2479_s23  ;;  %v761_v24 = vstv %s2479_s23 }
 0x13f   : > { %v762_v26 = vmul.f32 %v761_v24, %v2501_v23  ;;  %s2548_s23 = sld [smem:[#allocation5 + $0x21]] }
 0x140   : > { %688 = vrot.lane.b32.xlu2 %v684_v18, %s3277_s4  ;;  %568 = vrot.lane.b32.xlu1 %v564_v19, %s3278_s15 }
 0x142   : > { %716 = vrot.lane.b32.xlu0 %v712_v20, %s3279_s1 }
 0x145   : > { %3286 = sst [smem:[#allocation25_spill]] %s2548_s23  ;;  %v895_v43 = vstv %s2548_s23 }
 0x146   : > { %v896_v48 = vmul.f32 %v895_v43, %v2545_v35  ;;  %s2597_s23 = sld [smem:[#allocation5 + $0x20]] }
 0x148   : > { %730 = vrot.lane.b32.xlu2 %v726_v25, %s3281_s11  ;;  %610 = vrot.lane.b32.xlu1 %v606_v2, %s3282_s21 }
 0x14a   : > { %766 = vrot.lane.b32.xlu0 %v762_v26, %s3283_s9 }
 0x14c   : > { %v881_v4 = vstv %s2597_s23  ;;  %s2822_s23 = sld [smem:[#allocation5 + $0x2c]] }
 0x14d   : > { %v882_v6 = vmul.f32 %v881_v4, %v2545_v35 }
 0x150   : > { %780 = vrot.lane.b32.xlu2 %v776_v30, %s3277_s4  ;;  %660 = vrot.lane.b32.xlu1 %v656_v31, %s3278_s15 }
 0x152   : > { %808 = vrot.lane.b32.xlu0 %v804_v32, %s3279_s1 }
 0x158   : > { %822 = vrot.lane.b32.xlu2 %v818_v37, %s3281_s11  ;;  %702 = vrot.lane.b32.xlu1 %v698_v38, %s3282_s21 }
 0x15a   : > { %858 = vrot.lane.b32.xlu0 %v854_v39, %s3283_s9 }
 0x15c   : > { %v387_v42 = vpop.permute.xlu0 %386 }
 0x15d   : > { %389 = vst.msk [vmem:[#allocation4 + $0xe] sm:$0x1] %vm273_vm4, %v387_v42 }
 0x160   : > { %872 = vrot.lane.b32.xlu2 %v868_v44, %s3277_s4  ;;  %752 = vrot.lane.b32.xlu1 %v748_v45, %s3278_s15  ;;  %v465_v44 = vstv %s2658_s29  ;;  %s1963_s29 = sld [smem:[#allocation5 + $0x32]] }
 0x162   : > { %v419_v49 = vpop.permute.xlu2 %418  ;;  %900 = vrot.lane.b32.xlu0 %v896_v48, %s3279_s1  ;;  %v466_v48 = vmul.f32 %v465_v44, %v2381_v46 }
 0x163   : > { %421 = vst.msk [vmem:[#allocation4 + $0x10] sm:$0x1] %vm273_vm4, %v419_v49 }
 0x168   : > { %914 = vrot.lane.b32.xlu2 %v910_v54, %s3281_s11  ;;  %794 = vrot.lane.b32.xlu1 %v790_v55, %s3282_s21 }
 0x16a   : > { %v395_v56 = vpop.permute.xlu2 %394 }
 0x16b   : > { %397 = vst.msk [vmem:[#allocation4 + $0x26] sm:$0x1] %vm273_vm4, %v395_v56 }
 0x16c   : > { %v435_v61 = vpop.permute.xlu0 %434 }
 0x16d   : > { %437 = vst.msk [vmem:[#allocation4 + $0x11] sm:$0x1] %vm273_vm4, %v435_v61 }
 0x170   : > { %844 = vrot.lane.b32.xlu1 %v840_v62, %s3278_s15 }
 0x172   : > { %v443_v63 = vpop.permute.xlu2 %442 }
 0x173   : > { %445 = vst.msk [vmem:[#allocation4 + $0x29] sm:$0x1] %vm273_vm4, %v443_v63 }
 0x174   : > { %v363_v5 = vpop.permute.xlu0 %362 }
 0x175   : > { %365 = vst.msk [vmem:[#allocation4 + $0x24] sm:$0x1] %vm273_vm4, %v363_v5  ;;  %v649_v5 = vstv %s2690_s0  ;;  %s1965_s0 = sld [smem:[#allocation5 + $0x34]] }
 0x178   : > { %886 = vrot.lane.b32.xlu1 %v882_v6, %s3282_s21 }
 0x17a   : > { %v403_v11 = vpop.permute.xlu1 %402  ;;  %v505_v13 = vpop.permute.xlu2 %504 }
 0x17b   : > { %405 = vst.msk [vmem:[#allocation4 + $0xf] sm:$0x1] %vm273_vm4, %v403_v11  ;;  %v557_v11 = vstv %s2697_s30  ;;  %s2889_s30 = sld [smem:[#allocation5 + $0x36]] }
 0x17c   : > { %v411_v12 = vpop.permute.xlu0 %410 }
 0x17d   : > { %413 = vst.msk [vmem:[#allocation4 + $0x27] sm:$0x1] %vm273_vm4, %v411_v12 }
 0x182   : > { %v2613_v14 = vld [vmem:[#allocation4 + $0x8] sm:$0xff]  ;;  %v547_v2 = vpop.permute.xlu2 %546 }
 0x183   : > { %v501_v18 = vmul.f32 %v499_v51, %v2613_v14  ;;  %v487_v19 = vmul.f32 %v485_v47, %v2613_v14  ;;  %v473_v20 = vmul.f32 %v471_v1, %v2613_v14  ;;  %v543_v47 = vmul.f32 %v541_v58, %v2613_v14  ;;  %v2641_v30 = vld [vmem:[#allocation4 + $0x9] sm:$0xff] }
 0x184   : > { %v459_v25 = vpop.permute.xlu0 %458  ;;  %v529_v1 = vmul.f32 %v527_v52, %v2613_v14  ;;  %v515_v26 = vmul.f32 %v513_v8, %v2613_v14  ;;  %v593_v52 = vmul.f32 %v591_v0, %v2641_v30  ;;  %v579_v8 = vmul.f32 %v577_v60, %v2641_v30  ;;  %v2676_v45 = vld [vmem:[#allocation4 + $0xa] sm:$0xff] }
 0x185   : > { %461 = vst.msk [vmem:[#allocation4 + $0x2a] sm:$0x1] %vm273_vm4, %v459_v25  ;;  %506 = vrot.lane.b32.xlu0 %v501_v18, %s3277_s4  ;;  %492 = vrot.lane.b32.xlu1 %v487_v19, %s3283_s9  ;;  %v565_v37 = vmul.f32 %v563_v16, %v2641_v30  ;;  %v635_v60 = vmul.f32 %v633_v7, %v2641_v30 }
 0x186   : > { %478 = vrot.lane.b32.xlu2 %v473_v20, %s3278_s15  ;;  %v621_v16 = vmul.f32 %v619_v3, %v2641_v30  ;;  %v607_v42 = vmul.f32 %v605_v22, %v2641_v30  ;;  %v685_v3 = vmul.f32 %v683_v15, %v2676_v45  ;;  %v671_v22 = vmul.f32 %v669_v10, %v2676_v45 }
 0x187   : > { %v657_v54 = vmul.f32 %v655_v28, %v2676_v45  ;;  %v727_v61 = vmul.f32 %v725_v21, %v2676_v45  ;;  %v713_v62 = vmul.f32 %v711_v17, %v2676_v45  ;;  %v699_v63 = vmul.f32 %v697_v34, %v2676_v45 }
 0x188   : > { %v650_v21 = vmul.f32 %v649_v5, %v2454_v9  ;;  %v558_v34 = vmul.f32 %v557_v11, %v2413_v59 }
 0x18a   : > { %v451_v51 = vpop.permute.xlu1 %450  ;;  %v2643_v31 = vpop.permute.xlu2 %596 }
 0x18b   : > { %453 = vst.msk [vmem:[#allocation4 + $0x12] sm:$0x1] %vm273_vm4, %v451_v51 }
 0x18c   : > { %v491_v32 = vpop.permute.xlu0 %490 }
 0x18d   : > { %548 = vrot.lane.b32.xlu0 %v543_v47, %s3281_s11  ;;  %534 = vrot.lane.b32.xlu1 %v529_v1, %s3279_s1 }
 0x18e   : > { %520 = vrot.lane.b32.xlu2 %v515_v26, %s3282_s21 }
 0x192   : > { %v379_v58 = vpop.permute.xlu1 %378  ;;  %v2660_v0 = vpop.permute.xlu2 %638  ;;  %v2716_v18 = vld [vmem:[#allocation4 + $0xb] sm:$0xff] }
 0x193   : > { %381 = vst.msk [vmem:[#allocation4 + $0x25] sm:$0x1] %vm273_vm4, %v379_v58  ;;  %v777_v51 = vmul.f32 %v775_v27, %v2716_v18  ;;  %v763_v47 = vmul.f32 %v761_v24, %v2716_v18  ;;  %v749_v9 = vmul.f32 %v747_v41, %v2716_v18  ;;  %v819_v41 = vmul.f32 %v817_v33, %v2716_v18 }
 0x194   : > { %v533_v39 = vpop.permute.xlu0 %532  ;;  %v791_v58 = vmul.f32 %v789_v53, %v2716_v18 }
 0x195   : > { %598 = vrot.lane.b32.xlu0 %v593_v52, %s3277_s4  ;;  %584 = vrot.lane.b32.xlu1 %v579_v8, %s3283_s9  ;;  %v741_v52 = vstv %s2730_s5  ;;  %s1970_s5 = sld [smem:[#allocation5 + $0x39]] }
 0x196   : > { %570 = vrot.lane.b32.xlu2 %v565_v37, %s3278_s15  ;;  %v2755_v37 = vld [vmem:[#allocation4 + $0xc] sm:$0xff] }
 0x197   : > { %v869_v53 = vmul.f32 %v867_v40, %v2755_v37 }
 0x19a   : > { %v427_v38 = vpop.permute.xlu1 %426  ;;  %v2692_v55 = vpop.permute.xlu2 %688 }
 0x19b   : > { %429 = vst.msk [vmem:[#allocation4 + $0x28] sm:$0x1] %vm273_vm4, %v427_v38 }
 0x19c   : > { %v583_v56 = vpop.permute.xlu0 %582 }
 0x19d   : > { %640 = vrot.lane.b32.xlu0 %v635_v60, %s3281_s11  ;;  %626 = vrot.lane.b32.xlu1 %v621_v16, %s3279_s1  ;;  %v855_v16 = vmul.f32 %v853_v36, %v2755_v37 }
 0x19e   : > { %612 = vrot.lane.b32.xlu2 %v607_v42, %s3282_s21 }
 0x1a2   : > { %v477_v7 = vpop.permute.xlu1 %476  ;;  %v731_v12 = vpop.permute.xlu2 %730 }
 0x1a3   : > { %v482_v49 = vadd.f32 %v477_v7, %v466_v48  ;;  %v897_v7 = vmul.f32 %v895_v43, %v2755_v37  ;;  %v931_v43 = vstv %s1949_s6  ;;  %s2947_s6 = sld [smem:[#allocation5 + $0x41]] }
 0x1a5   : > { %v496_v46 = vadd.f32 %v491_v32, %v482_v49  ;;  %690 = vrot.lane.b32.xlu0 %v685_v3, %s3277_s4  ;;  %676 = vrot.lane.b32.xlu1 %v671_v22, %s3283_s9  ;;  %v805_v32 = vmul.f32 %v803_v29, %v2716_v18  ;;  %v883_v49 = vmul.f32 %v881_v4, %v2755_v37  ;;  %v833_v3 = vstv %s2766_s17  ;;  %s1973_s17 = sld [smem:[#allocation5 + $0x3c]] }
 0x1a6   : > { %662 = vrot.lane.b32.xlu2 %v657_v54, %s3278_s15 }
 0x1a7   : > { %v510_v10 = vadd.f32 %v505_v13, %v496_v46  ;;  %v625_v13 = vpop.permute.xlu0 %624  ;;  %v834_v46 = vmul.f32 %v833_v3, %v2545_v35 }
 0x1aa   : > { %v519_v15 = vpop.permute.xlu1 %518  ;;  %v2735_v59 = vpop.permute.xlu2 %780 }
 0x1ab   : > { %v524_v28 = vadd.f32 %v519_v15, %v510_v10  ;;  %v945_v10 = vstv %s2771_s12  ;;  %v2791_v15 = vld [vmem:[#allocation4 + $0xd] sm:$0xff]  ;;  %s1975_s12 = sld [smem:[#allocation5 + $0x3e]] }
 0x1ad   : > { %v538_v6 = vadd.f32 %v533_v39, %v524_v28  ;;  %732 = vrot.lane.b32.xlu0 %v727_v61, %s3281_s11  ;;  %718 = vrot.lane.b32.xlu1 %v713_v62, %s3279_s1 }
 0x1ae   : > { %704 = vrot.lane.b32.xlu2 %v699_v63, %s3282_s21 }
 0x1af   : > { %v552_v17 = vadd.f32 %v547_v2, %v538_v6  ;;  %v675_v1 = vpop.permute.xlu0 %674  ;;  %v933_v6 = vmul.f32 %v931_v43, %v2791_v15 }
 0x1b1   : > { %v652_v19 = vadd.f32 %v650_v21, %v552_v17 }
 0x1b2   : > { %v569_v20 = vpop.permute.xlu1 %568  ;;  %v823_v39 = vpop.permute.xlu2 %822 }
 0x1b3   : > { %v574_v25 = vadd.f32 %v569_v20, %v558_v34 }
 0x1b5   : > { %v588_v2 = vadd.f32 %v583_v56, %v574_v25  ;;  %782 = vrot.lane.b32.xlu0 %v777_v51, %s3277_s4  ;;  %768 = vrot.lane.b32.xlu1 %v763_v47, %s3283_s9  ;;  %v922_v56 = vld [vmem:[#allocation4 + $0x5] sm:$0xff]  ;;  %v947_v25 = vmul.f32 %v945_v10, %v2791_v15  ;;  %v925_v47 = vstv %s2794_s22  ;;  %s1979_s22 = sld [smem:[#allocation5 + $0x42]] }
 0x1b6   : > { %754 = vrot.lane.b32.xlu2 %v749_v9, %s3278_s15  ;;  %v946_v62 = vmul.f32 %v945_v10, %v922_v56  ;;  %v932_v63 = vmul.f32 %v931_v43, %v922_v56 }
 0x1b7   : > { %v602_v27 = vadd.f32 %v2643_v31, %v588_v2  ;;  %v742_v31 = vmul.f32 %v741_v52, %v2501_v23  ;;  %v717_v42 = vpop.permute.xlu0 %716  ;;  %v841_v23 = vmul.f32 %v839_v57, %v2755_v37  ;;  %v911_v57 = vmul.f32 %v909_v50, %v2755_v37 }
 0x1b8   : > { %v467_v2 = vmul.f32 %v465_v44, %v2613_v14 }
 0x1ba   : > { %v611_v24 = vpop.permute.xlu1 %610  ;;  %v873_v54 = vpop.permute.xlu2 %872 }
 0x1bb   : > { %v616_v26 = vadd.f32 %v611_v24, %v602_v27  ;;  %v987_v24 = vstv %s2799_s7  ;;  %s2967_s7 = sld [smem:[#allocation5 + $0x44]] }
 0x1bd   : > { %v630_v8 = vadd.f32 %v625_v13, %v616_v26  ;;  %824 = vrot.lane.b32.xlu0 %v819_v41, %s3281_s11  ;;  %810 = vrot.lane.b32.xlu1 %v805_v32, %s3279_s1  ;;  %v959_v13 = vstv %s1951_s2  ;;  %v973_v26 = vstv %s1952_s16  ;;  %s1977_s2 = sld [smem:[#allocation5 + $0x40]] }
 0x1be   : > { %796 = vrot.lane.b32.xlu2 %v791_v58, %s3282_s21  ;;  %v961_v20 = vmul.f32 %v959_v13, %v2791_v15  ;;  %v960_v51 = vmul.f32 %v959_v13, %v922_v56  ;;  %s1980_s16 = sld [smem:[#allocation5 + $0x43]] }
 0x1bf   : > { %v644_v33 = vadd.f32 %v2660_v0, %v630_v8 }
 0x1c1   : > { %v744_v29 = vadd.f32 %v742_v31, %v644_v33  ;;  %v988_v33 = vmul.f32 %v987_v24, %v922_v56 }
 0x1c2   : > { %v661_v38 = vpop.permute.xlu1 %660  ;;  %v915_v35 = vpop.permute.xlu2 %914 }
 0x1c3   : > { %v666_v60 = vadd.f32 %v661_v38, %v652_v19  ;;  %v975_v38 = vmul.f32 %v973_v26, %v2791_v15 }
 0x1c5   : > { %v680_v0 = vadd.f32 %v675_v1, %v666_v60  ;;  %874 = vrot.lane.b32.xlu0 %v869_v53, %s3277_s4  ;;  %860 = vrot.lane.b32.xlu1 %v855_v16, %s3283_s9  ;;  %v1001_v53 = vstv %s1954_s18  ;;  %s1982_s18 = sld [smem:[#allocation5 + $0x45]] }
 0x1c6   : > { %846 = vrot.lane.b32.xlu2 %v841_v23, %s3278_s15  ;;  %v989_v23 = vmul.f32 %v987_v24, %v2791_v15 }
 0x1c7   : > { %v694_v36 = vadd.f32 %v2692_v55, %v680_v0  ;;  %v767_v55 = vpop.permute.xlu0 %766 }
 0x1ca   : > { %v703_v40 = vpop.permute.xlu1 %702 }
 0x1cb   : > { %v708_v48 = vadd.f32 %v703_v40, %v694_v36  ;;  %v1002_v36 = vmul.f32 %v1001_v53, %v922_v56  ;;  %v2826_v40 = vld [vmem:[#allocation4 + $0x6] sm:$0xff] }
 0x1cd   : > { %v722_v22 = vadd.f32 %v717_v42, %v708_v48  ;;  %916 = vrot.lane.b32.xlu0 %v911_v57, %s3281_s11  ;;  %902 = vrot.lane.b32.xlu1 %v897_v7, %s3279_s1  ;;  %v1003_v42 = vmul.f32 %v1001_v53, %v2791_v15  ;;  %v1017_v48 = vstv %s2817_s20  ;;  %v559_v7 = vmul.f32 %v557_v11, %v2641_v30  ;;  %s2986_s20 = sld [smem:[#allocation5 + $0x31]] }
 0x1ce   : > { %888 = vrot.lane.b32.xlu2 %v883_v49, %s3282_s21  ;;  %v1018_v49 = vmul.f32 %v1017_v48, %v2826_v40 }
 0x1cf   : > { %v736_v50 = vadd.f32 %v731_v12, %v722_v22  ;;  %v809_v12 = vpop.permute.xlu0 %808 }
 0x1d1   : > { %v836_v4 = vadd.f32 %v834_v46, %v736_v50  ;;  %v1023_v46 = vstv %s1956_s24  ;;  %s1984_s24 = sld [smem:[#allocation5 + $0x47]] }
 0x1d2   : > { %v753_v28 = vpop.permute.xlu1 %752 }
 0x1d3   : > { %v758_v61 = vadd.f32 %v753_v28, %v744_v29  ;;  %v974_v29 = vmul.f32 %v973_v26, %v922_v56 }
 0x1d5   : > { %v772_v21 = vadd.f32 %v767_v55, %v758_v61  ;;  %950 = vrot.lane.b32.xlu0 %v946_v62, %s3283_s9  ;;  %936 = vrot.lane.b32.xlu1 %v932_v63, %s3278_s15  ;;  %v1037_v55 = vstv %s2822_s23  ;;  %v1051_v63 = vstv %s1958_s25  ;;  %s2988_s23 = sld [smem:[#allocation5 + $0x48]] }
 0x1d6   : > { %938 = vrot.lane.b32.xlu2 %v933_v6, %s3278_s15  ;;  %v1038_v43 = vmul.f32 %v1037_v55, %v2826_v40  ;;  %s1986_s25 = sld [smem:[#allocation5 + $0x49]] }
 0x1d7   : > { %v786_v17 = vadd.f32 %v2735_v59, %v772_v21  ;;  %v926_v59 = vmul.f32 %v925_v47, %v922_v56  ;;  %v859_v58 = vpop.permute.xlu0 %858  ;;  %v2839_v56 = vld [vmem:[#allocation4 + $0xe] sm:$0xff] }
 0x1d8   : > { %v1025_v28 = vmul.f32 %v1023_v46, %v2839_v56  ;;  %v1053_v21 = vmul.f32 %v1051_v63, %v2839_v56 }
 0x1da   : > { %v795_v34 = vpop.permute.xlu1 %794 }
 0x1db   : > { %v800_v19 = vadd.f32 %v795_v34, %v786_v17 }
 0x1dd   : > { %v814_v9 = vadd.f32 %v809_v12, %v800_v19  ;;  %966 = vrot.lane.b32.xlu0 %v961_v20, %s3277_s4  ;;  %952 = vrot.lane.b32.xlu1 %v947_v25, %s3283_s9  ;;  %v1052_v12 = vmul.f32 %v1051_v63, %v2826_v40  ;;  %v1079_v25 = vstv %s2849_s26  ;;  %s3012_s26 = sld [smem:[#allocation5 + $0x4b]] }
 0x1de   : > { %964 = vrot.lane.b32.xlu2 %v960_v51, %s3277_s4  ;;  %v1065_v51 = vstv %s1959_s8  ;;  %s1987_s8 = sld [smem:[#allocation5 + $0x4a]] }
 0x1df   : > { %v828_v27 = vadd.f32 %v823_v39, %v814_v9  ;;  %v901_v0 = vpop.permute.xlu0 %900  ;;  %v651_v9 = vmul.f32 %v649_v5, %v2676_v45  ;;  %v1067_v24 = vmul.f32 %v1065_v51, %v2839_v56 }
 0x1e0   : > { %v479_v1 = vpop.permute.xlu2 %478 }
 0x1e1   : > { %v483_v41 = vadd.f32 %v479_v1, %v467_v2  ;;  %v2814_v32 = vadd.f32 %v926_v59, %v828_v27  ;;  %v1080_v59 = vmul.f32 %v1079_v25, %v2826_v40  ;;  %v1066_v27 = vmul.f32 %v1065_v51, %v2826_v40 }
 0x1e2   : > { %v845_v8 = vpop.permute.xlu1 %844 }
 0x1e3   : > { %v850_v31 = vadd.f32 %v845_v8, %v836_v4  ;;  %v1024_v4 = vmul.f32 %v1023_v46, %v2826_v40  ;;  %v1093_v8 = vstv %s1961_s27  ;;  %s1989_s27 = sld [smem:[#allocation5 + $0x4c]] }
 0x1e5   : > { %v864_v14 = vadd.f32 %v859_v58, %v850_v31  ;;  %992 = vrot.lane.b32.xlu0 %v988_v33, %s3279_s1  ;;  %978 = vrot.lane.b32.xlu1 %v974_v29, %s3282_s21  ;;  %v1095_v33 = vmul.f32 %v1093_v8, %v2839_v56  ;;  %v1081_v29 = vmul.f32 %v1079_v25, %v2839_v56 }
 0x1e6   : > { %980 = vrot.lane.b32.xlu2 %v975_v38, %s3282_s21  ;;  %v1094_v38 = vmul.f32 %v1093_v8, %v2826_v40  ;;  %v2915_v8 = vld [vmem:[#allocation4 + $0x19] sm:$0xff] }
 0x1e7   : > { %v878_v44 = vadd.f32 %v873_v54, %v864_v14 }
 0x1e8   : > { %v521_v60 = vpop.permute.xlu2 %520 }
 0x1ea   : > { %v887_v16 = vpop.permute.xlu1 %886 }
 0x1eb   : > { %v892_v39 = vadd.f32 %v887_v16, %v878_v44 }
 0x1ed   : > { %v906_v57 = vadd.f32 %v901_v0, %v892_v39  ;;  %1008 = vrot.lane.b32.xlu0 %v1003_v42, %s3281_s11  ;;  %994 = vrot.lane.b32.xlu1 %v989_v23, %s3279_s1  ;;  %v2875_v39 = vld [vmem:[#allocation4 + $0x18] sm:$0xff]  ;;  %v1129_v42 = vstv %s2867_s28  ;;  %v1115_v23 = vstv %s1963_s29  ;;  %v2878_v0 = vld [vmem:[#allocation4 + $0x20] sm:$0xff]  ;;  %s3034_s28 = sld [smem:[#allocation5 + $0x38]] }
 0x1ee   : > { %1006 = vrot.lane.b32.xlu2 %v1002_v36, %s3281_s11  ;;  %v743_v36 = vmul.f32 %v741_v52, %v2716_v18  ;;  %s3036_s29 = sld [smem:[#allocation5 + $0x4f]] }
 0x1ef   : > { %v920_v22 = vadd.f32 %v915_v35, %v906_v57  ;;  %v1039_v35 = vmul.f32 %v1037_v55, %v2839_v56  ;;  %v1130_v57 = vmul.f32 %v1129_v42, %v2875_v39 }
 0x1f0   : > { %v571_v54 = vpop.permute.xlu2 %570 }
 0x1f1   : > { %v575_v50 = vadd.f32 %v571_v54, %v559_v7  ;;  %v2841_v10 = vadd.f32 %v1018_v49, %v920_v22  ;;  %v1116_v7 = vmul.f32 %v1115_v23, %v2875_v39  ;;  %v1117_v22 = vmul.f32 %v1115_v23, %v2878_v0 }
 0x1f5   : > { %1042 = vrot.lane.b32.xlu0 %v1038_v43, %s3283_s9  ;;  %1028 = vrot.lane.b32.xlu1 %v1024_v4, %s3278_s15 }
 0x1f6   : > { %1030 = vrot.lane.b32.xlu2 %v1025_v28, %s3278_s15  ;;  %v1131_v28 = vmul.f32 %v1129_v42, %v2878_v0 }
 0x1f7   : > { %v493_v30 = vpop.permute.xlu1 %492  ;;  %v507_v11 = vpop.permute.xlu0 %506 }
 0x1f8   : > { %v497_v61 = vadd.f32 %v493_v30, %v483_v41  ;;  %v613_v62 = vpop.permute.xlu2 %612 }
 0x1fa   : > { %v511_v6 = vadd.f32 %v507_v11, %v497_v61 }
 0x1fc   : > { %v525_v17 = vadd.f32 %v521_v60, %v511_v6 }
 0x1fd   : > { %1058 = vrot.lane.b32.xlu0 %v1053_v21, %s3277_s4  ;;  %1044 = vrot.lane.b32.xlu1 %v1039_v35, %s3283_s9  ;;  %v1171_v21 = vstv %s2889_s30  ;;  %v1157_v35 = vstv %s1966_s13  ;;  %s1993_s30 = sld [smem:[#allocation5 + $0x50]] }
 0x1fe   : > { %1056 = vrot.lane.b32.xlu2 %v1052_v12, %s3277_s4  ;;  %v835_v12 = vmul.f32 %v833_v3, %v2755_v37  ;;  %s3054_s13 = sld [smem:[#allocation5 + $0x3f]] }
 0x1ff   : > { %v535_v13 = vpop.permute.xlu1 %534  ;;  %v549_v34 = vpop.permute.xlu0 %548 }
 0x200   : > { %v539_v19 = vadd.f32 %v535_v13, %v525_v17  ;;  %v663_v20 = vpop.permute.xlu2 %662  ;;  %v1172_v13 = vmul.f32 %v1171_v21, %v2875_v39 }
 0x202   : > { %v553_v2 = vadd.f32 %v549_v34, %v539_v19  ;;  %v1158_v34 = vmul.f32 %v1157_v35, %v2875_v39 }
 0x204   : > { %v653_v1 = vadd.f32 %v651_v9, %v553_v2  ;;  %v1185_v2 = vstv %s1968_s19  ;;  %s3062_s19 = sld [smem:[#allocation5 + $0x52]] }
 0x205   : > { %1084 = vrot.lane.b32.xlu0 %v1080_v59, %s3279_s1  ;;  %1070 = vrot.lane.b32.xlu1 %v1066_v27, %s3282_s21  ;;  %v1187_v27 = vmul.f32 %v1185_v2, %v2878_v0 }
 0x206   : > { %1072 = vrot.lane.b32.xlu2 %v1067_v24, %s3282_s21  ;;  %v667_v26 = vadd.f32 %v663_v20, %v653_v1  ;;  %v1159_v20 = vmul.f32 %v1157_v35, %v2878_v0  ;;  %v1173_v1 = vmul.f32 %v1171_v21, %v2878_v0  ;;  %v1186_v24 = vmul.f32 %v1185_v2, %v2875_v39  ;;  %v2959_v2 = vld [vmem:[#allocation4 + $0x22] sm:$0xff] }
 0x207   : > { %v585_v41 = vpop.permute.xlu1 %584  ;;  %v599_v58 = vpop.permute.xlu0 %598 }
 0x208   : > { %v589_v45 = vadd.f32 %v585_v41, %v575_v50  ;;  %v705_v5 = vpop.permute.xlu2 %704  ;;  %v1143_v50 = vstv %s1965_s0  ;;  %s1991_s0 = sld [smem:[#allocation5 + $0x4e]] }
 0x209   : > { %v1145_v4 = vmul.f32 %v1143_v50, %v2878_v0  ;;  %v1144_v30 = vmul.f32 %v1143_v50, %v2875_v39  ;;  %v1263_v50 = vstv %s2929_s14  ;;  %s3083_s14 = sld [smem:[#allocation5 + $0x5c]] }
 0x20a   : > { %v603_v31 = vadd.f32 %v599_v58, %v589_v45 }
 0x20c   : > { %v617_v14 = vadd.f32 %v613_v62, %v603_v31  ;;  %v1221_v31 = vstv %s2907_s3  ;;  %s1994_s3 = sld [smem:[#allocation5 + $0x51]] }
 0x20d   : > { %1100 = vrot.lane.b32.xlu0 %v1095_v33, %s3281_s11  ;;  %1086 = vrot.lane.b32.xlu1 %v1081_v29, %s3279_s1  ;;  %v1207_v33 = vstv %s1970_s5  ;;  %v2918_v29 = vld [vmem:[#allocation4 + $0x21] sm:$0xff]  ;;  %s1996_s5 = sld [smem:[#allocation5 + $0x53]] }
 0x20e   : > { %1098 = vrot.lane.b32.xlu2 %v1094_v38, %s3281_s11  ;;  %v927_v38 = vmul.f32 %v925_v47, %v2791_v15 }
 0x20f   : > { %v627_v44 = vpop.permute.xlu1 %626  ;;  %v641_v60 = vpop.permute.xlu0 %640 }
 0x210   : > { %v631_v53 = vadd.f32 %v627_v44, %v617_v14  ;;  %v755_v16 = vpop.permute.xlu2 %754  ;;  %v1222_v44 = vmul.f32 %v1221_v31, %v2915_v8 }
 0x212   : > { %v645_v40 = vadd.f32 %v641_v60, %v631_v53  ;;  %v1208_v60 = vmul.f32 %v1207_v33, %v2915_v8 }
 0x214   : > { %v745_v49 = vadd.f32 %v743_v36, %v645_v40  ;;  %v1235_v40 = vstv %s1972_s10  ;;  %s1998_s10 = sld [smem:[#allocation5 + $0x55]] }
 0x215   : > { %1134 = vrot.lane.b32.xlu0 %v1130_v57, %s3283_s9  ;;  %1120 = vrot.lane.b32.xlu1 %v1116_v7, %s3278_s15  ;;  %v1237_v7 = vmul.f32 %v1235_v40, %v2918_v29 }
 0x216   : > { %1122 = vrot.lane.b32.xlu2 %v1117_v22, %s3278_s15  ;;  %v759_v54 = vadd.f32 %v755_v16, %v745_v49  ;;  %v1209_v16 = vmul.f32 %v1207_v33, %v2918_v29  ;;  %v1223_v49 = vmul.f32 %v1221_v31, %v2918_v29  ;;  %v1236_v22 = vmul.f32 %v1235_v40, %v2915_v8 }
 0x217   : > { %v677_v55 = vpop.permute.xlu1 %676  ;;  %v691_v46 = vpop.permute.xlu0 %690  ;;  %v1327_v31 = vstv %s1979_s22  ;;  %s2007_s22 = sld [smem:[#allocation5 + $0x5e]] }
 0x218   : > { %v681_v18 = vadd.f32 %v677_v55, %v667_v26  ;;  %v797_v52 = vpop.permute.xlu2 %796 }
 0x21a   : > { %v695_v43 = vadd.f32 %v691_v46, %v681_v18 }
 0x21c   : > { %v709_v11 = vadd.f32 %v705_v5, %v695_v43  ;;  %v1249_v43 = vstv %s1973_s17  ;;  %s3097_s17 = sld [smem:[#allocation5 + $0x46]] }
 0x21d   : > { %1150 = vrot.lane.b32.xlu0 %v1145_v4, %s3277_s4  ;;  %1136 = vrot.lane.b32.xlu1 %v1131_v28, %s3283_s9  ;;  %v1019_v28 = vmul.f32 %v1017_v48, %v2839_v56  ;;  %v1277_v56 = vstv %s1975_s12  ;;  %s1999_s12 = sld [smem:[#allocation5 + $0x56]] }
 0x21e   : > { %1148 = vrot.lane.b32.xlu2 %v1144_v30, %s3277_s4  ;;  %v1264_v30 = vmul.f32 %v1263_v50, %v2915_v8 }
 0x21f   : > { %v719_v61 = vpop.permute.xlu1 %718  ;;  %v733_v62 = vpop.permute.xlu0 %732 }
 0x220   : > { %v723_v63 = vadd.f32 %v719_v61, %v709_v11  ;;  %v847_v6 = vpop.permute.xlu2 %846  ;;  %v1250_v11 = vmul.f32 %v1249_v43, %v2915_v8  ;;  %v1251_v61 = vmul.f32 %v1249_v43, %v2918_v29 }
 0x222   : > { %v737_v17 = vadd.f32 %v733_v62, %v723_v63 }
 0x224   : > { %v837_v19 = vadd.f32 %v835_v12, %v737_v17  ;;  %v1279_v12 = vmul.f32 %v1277_v56, %v2918_v29  ;;  %v1265_v17 = vmul.f32 %v1263_v50, %v2918_v29 }
 0x225   : > { %1176 = vrot.lane.b32.xlu0 %v1172_v13, %s3279_s1  ;;  %1162 = vrot.lane.b32.xlu1 %v1158_v34, %s3282_s21  ;;  %v1278_v13 = vmul.f32 %v1277_v56, %v2915_v8  ;;  %v3004_v56 = vld [vmem:[#allocation4 + $0x23] sm:$0xff] }
 0x226   : > { %1164 = vrot.lane.b32.xlu2 %v1159_v20, %s3282_s21  ;;  %v851_v25 = vadd.f32 %v847_v6, %v837_v19 }
 0x227   : > { %v769_v51 = vpop.permute.xlu1 %768  ;;  %v783_v9 = vpop.permute.xlu0 %782 }
 0x228   : > { %v773_v37 = vadd.f32 %v769_v51, %v759_v54  ;;  %v889_v3 = vpop.permute.xlu2 %888  ;;  %v2956_v51 = vld [vmem:[#allocation4 + $0x1a] sm:$0xff] }
 0x22a   : > { %v787_v59 = vadd.f32 %v783_v9, %v773_v37  ;;  %v1313_v9 = vstv %s2947_s6  ;;  %v1299_v37 = vstv %s1977_s2  ;;  %s3109_s6 = sld [smem:[#allocation5 + $0x57]] }
 0x22b   : > { %s2006_s2 = sld [smem:[#allocation5 + $0x5d]] }
 0x22c   : > { %v801_v26 = vadd.f32 %v797_v52, %v787_v59 }
 0x22d   : > { %1192 = vrot.lane.b32.xlu0 %v1187_v27, %s3281_s11  ;;  %1178 = vrot.lane.b32.xlu1 %v1173_v1, %s3279_s1  ;;  %v1314_v27 = vmul.f32 %v1313_v9, %v2956_v51  ;;  %v1300_v1 = vmul.f32 %v1299_v37, %v2956_v51 }
 0x22e   : > { %1190 = vrot.lane.b32.xlu2 %v1186_v24, %s3281_s11  ;;  %v1301_v24 = vmul.f32 %v1299_v37, %v2959_v2 }
 0x22f   : > { %v811_v41 = vpop.permute.xlu1 %810  ;;  %v825_v58 = vpop.permute.xlu0 %824 }
 0x230   : > { %v815_v45 = vadd.f32 %v811_v41, %v801_v26  ;;  %v939_v5 = vpop.permute.xlu2 %938 }
 0x232   : > { %v829_v14 = vadd.f32 %v825_v58, %v815_v45 }
 0x234   : > { %v929_v53 = vadd.f32 %v927_v38, %v829_v14  ;;  %v1329_v38 = vmul.f32 %v1327_v31, %v2959_v2  ;;  %v1315_v14 = vmul.f32 %v1313_v9, %v2959_v2 }
 0x235   : > { %1226 = vrot.lane.b32.xlu0 %v1222_v44, %s3283_s9  ;;  %1212 = vrot.lane.b32.xlu1 %v1208_v60, %s3278_s15  ;;  %v1328_v60 = vmul.f32 %v1327_v31, %v2956_v51 }
 0x236   : > { %1214 = vrot.lane.b32.xlu2 %v1209_v16, %s3278_s15  ;;  %v943_v42 = vadd.f32 %v939_v5, %v929_v53 }
 0x237   : > { %v861_v23 = vpop.permute.xlu1 %860  ;;  %v875_v36 = vpop.permute.xlu0 %874 }
 0x238   : > { %v865_v15 = vadd.f32 %v861_v23, %v851_v25  ;;  %v965_v47 = vpop.permute.xlu2 %964 }
 0x23a   : > { %v879_v57 = vadd.f32 %v875_v36, %v865_v15  ;;  %v1355_v36 = vstv %s2967_s7  ;;  %v1341_v15 = vstv %s1980_s16  ;;  %s3132_s7 = sld [smem:[#allocation5 + $0x5f]] }
 0x23b   : > { %v1356_v40 = vmul.f32 %v1355_v36, %v2956_v51  ;;  %v1357_v50 = vmul.f32 %v1355_v36, %v2959_v2  ;;  %v1461_v36 = vstv %s1989_s27  ;;  %s2002_s16 = sld [smem:[#allocation5 + $0x59]] }
 0x23c   : > { %v893_v54 = vadd.f32 %v889_v3, %v879_v57  ;;  %v1342_v57 = vmul.f32 %v1341_v15, %v2956_v51 }
 0x23d   : > { %1242 = vrot.lane.b32.xlu0 %v1237_v7, %s3277_s4  ;;  %1228 = vrot.lane.b32.xlu1 %v1223_v49, %s3283_s9  ;;  %v1343_v7 = vmul.f32 %v1341_v15, %v2959_v2 }
 0x23e   : > { %1240 = vrot.lane.b32.xlu2 %v1236_v22, %s3277_s4 }
 0x23f   : > { %v903_v55 = vpop.permute.xlu1 %902  ;;  %v917_v46 = vpop.permute.xlu0 %916 }
 0x240   : > { %v907_v18 = vadd.f32 %v903_v55, %v893_v54  ;;  %v981_v52 = vpop.permute.xlu2 %980 }
 0x242   : > { %v921_v4 = vadd.f32 %v917_v46, %v907_v18  ;;  %v1369_v46 = vstv %s1982_s18  ;;  %s2009_s18 = sld [smem:[#allocation5 + $0x60]] }
 0x243   : > { %v1370_v43 = vmul.f32 %v1369_v46, %v2956_v51 }
 0x244   : > { %v1021_v62 = vadd.f32 %v1019_v28, %v921_v4  ;;  %v1109_v28 = vstv %s2986_s20  ;;  %s2010_s20 = sld [smem:[#allocation5 + $0x61]] }
 0x245   : > { %1268 = vrot.lane.b32.xlu0 %v1264_v30, %s3279_s1  ;;  %1254 = vrot.lane.b32.xlu1 %v1250_v11, %s3282_s21  ;;  %v1111_v30 = vmul.f32 %v1109_v28, %v2878_v0 }
 0x246   : > { %1256 = vrot.lane.b32.xlu2 %v1251_v61, %s3282_s21 }
 0x247   : > { %v937_v63 = vpop.permute.xlu1 %936  ;;  %v951_v6 = vpop.permute.xlu0 %950 }
 0x248   : > { %v942_v21 = vadd.f32 %v937_v63, %v2814_v32  ;;  %v1007_v48 = vpop.permute.xlu2 %1006  ;;  %v2999_v63 = vld [vmem:[#allocation4 + $0x1b] sm:$0xff] }
 0x24a   : > { %v956_v35 = vadd.f32 %v951_v6, %v942_v21  ;;  %v1405_v6 = vstv %s2988_s23  ;;  %v1391_v21 = vstv %s1984_s24  ;;  %s3293_s23 = sld [smem:[#allocation14_spill]] }
 0x24c   : > { %v970_v34 = vadd.f32 %v965_v47, %v956_v35 }
 0x24d   : > { %1284 = vrot.lane.b32.xlu0 %v1279_v12, %s3281_s11  ;;  %1270 = vrot.lane.b32.xlu1 %v1265_v17, %s3279_s1  ;;  %v1406_v12 = vmul.f32 %v1405_v6, %v2999_v63  ;;  %v1392_v17 = vmul.f32 %v1391_v21, %v2999_v63 }
 0x24e   : > { %1282 = vrot.lane.b32.xlu2 %v1278_v13, %s3281_s11  ;;  %v1393_v13 = vmul.f32 %v1391_v21, %v3004_v56 }
 0x24f   : > { %v953_v19 = vpop.permute.xlu1 %952  ;;  %v967_v32 = vpop.permute.xlu0 %966 }
 0x250   : > { %v957_v20 = vadd.f32 %v953_v19, %v943_v42  ;;  %v1031_v25 = vpop.permute.xlu2 %1030 }
 0x251   : > { %v1035_v3 = vadd.f32 %v1031_v25, %v1021_v62  ;;  %v1419_v25 = vstv %s1986_s25 }
 0x252   : > { %v971_v59 = vadd.f32 %v967_v32, %v957_v20  ;;  %v1421_v37 = vmul.f32 %v1419_v25, %v3004_v56 }
 0x254   : > { %v985_v26 = vadd.f32 %v981_v52, %v971_v59  ;;  %v1371_v52 = vmul.f32 %v1369_v46, %v2959_v2 }
 0x255   : > { %1318 = vrot.lane.b32.xlu0 %v1314_v27, %s3283_s9  ;;  %1304 = vrot.lane.b32.xlu1 %v1300_v1, %s3278_s15  ;;  %v1420_v27 = vmul.f32 %v1419_v25, %v2999_v63 }
 0x256   : > { %1306 = vrot.lane.b32.xlu2 %v1301_v24, %s3278_s15 }
 0x257   : > { %v979_v41 = vpop.permute.xlu1 %978  ;;  %v993_v58 = vpop.permute.xlu0 %992 }
 0x258   : > { %v984_v45 = vadd.f32 %v979_v41, %v970_v34  ;;  %v1057_v5 = vpop.permute.xlu2 %1056 }
 0x25a   : > { %v998_v33 = vadd.f32 %v993_v58, %v984_v45  ;;  %v1447_v45 = vstv %s3012_s26  ;;  %s2017_s26 = sshll.u32 %s3293_s23, 4 }
 0x25c   : > { %v2971_v44 = vadd.f32 %v1007_v48, %v998_v33  ;;  %v1448_v33 = vmul.f32 %v1447_v45, %v2999_v63 }
 0x25d   : > { %1334 = vrot.lane.b32.xlu0 %v1329_v38, %s3277_s4  ;;  %1320 = vrot.lane.b32.xlu1 %v1315_v14, %s3283_s9 }
 0x25e   : > { %1332 = vrot.lane.b32.xlu2 %v1328_v60, %s3277_s4  ;;  %v1110_v60 = vmul.f32 %v1109_v28, %v2875_v39 }
 0x25f   : > { %v995_v53 = vpop.permute.xlu1 %994  ;;  %v1009_v16 = vpop.permute.xlu0 %1008 }
 0x260   : > { %v999_v42 = vadd.f32 %v995_v53, %v985_v26  ;;  %v1073_v23 = vpop.permute.xlu2 %1072 }
 0x262   : > { %v2978_v47 = vadd.f32 %v1009_v16, %v999_v42 }
 0x265   : > { %1360 = vrot.lane.b32.xlu0 %v1356_v40, %s3279_s1  ;;  %1346 = vrot.lane.b32.xlu1 %v1342_v57, %s3282_s21  ;;  %v1449_v40 = vmul.f32 %v1447_v45, %v3004_v56  ;;  %v1462_v57 = vmul.f32 %v1461_v36, %v2999_v63 }
 0x266   : > { %1348 = vrot.lane.b32.xlu2 %v1343_v7, %s3282_s21  ;;  %v1201_v7 = vstv %s3034_s28  ;;  %s3294_s28 = sld [smem:[#allocation28_spill]] }
 0x267   : > { %v1029_v49 = vpop.permute.xlu1 %1028  ;;  %v1043_v22 = vpop.permute.xlu0 %1042  ;;  %v1202_v45 = vmul.f32 %v1201_v7, %v2915_v8 }
 0x268   : > { %v1034_v54 = vadd.f32 %v1029_v49, %v2841_v10  ;;  %v1099_v55 = vpop.permute.xlu2 %1098 }
 0x26a   : > { %v1048_v18 = vadd.f32 %v1043_v22, %v1034_v54  ;;  %v1203_v22 = vmul.f32 %v1201_v7, %v2918_v29 }
 0x26c   : > { %v1062_v4 = vadd.f32 %v1057_v5, %v1048_v18  ;;  %v1433_v5 = vstv %s1987_s8  ;;  %v3047_v18 = vld [vmem:[#allocation4 + $0x1c] sm:$0xff] }
 0x26d   : > { %1376 = vrot.lane.b32.xlu0 %v1371_v52, %s3281_s11  ;;  %1362 = vrot.lane.b32.xlu1 %v1357_v50, %s3279_s1  ;;  %v1434_v38 = vmul.f32 %v1433_v5, %v2999_v63  ;;  %v1497_v52 = vstv %s3036_s29  ;;  %v1483_v50 = vstv %s1991_s0  ;;  %s1809_s29 = scalar_lea.hbm %s3294_s28, %s2017_s26 }
 0x26e   : > { %1374 = vrot.lane.b32.xlu2 %v1370_v43, %s3281_s11  ;;  %v1484_v29 = vmul.f32 %v1483_v50, %v3047_v18 }
 0x26f   : > { %v1045_v10 = vpop.permute.xlu1 %1044  ;;  %v1059_v11 = vpop.permute.xlu0 %1058 }
 0x270   : > { %v1049_v61 = vadd.f32 %v1045_v10, %v1035_v3  ;;  %v1123_v62 = vpop.permute.xlu2 %1122  ;;  %v1407_v3 = vmul.f32 %v1405_v6, %v3004_v56  ;;  %v1498_v10 = vmul.f32 %v1497_v52, %v3047_v18 }
 0x271   : > { %v3002_v48 = vadd.f32 %v1123_v62, %v1111_v30 }
 0x272   : > { %v1063_v35 = vadd.f32 %v1059_v11, %v1049_v61 }
 0x274   : > { %v1077_v0 = vadd.f32 %v1073_v23, %v1063_v35  ;;  %v1293_v35 = vstv %s3054_s13  ;;  %s1812_s13 = sshll.u32 %s1809_s29, 4  ;;  %s1813_s13 = int_to_ptr.hbm [resolvable:$true] %s1812_s13 }
 0x275   : > { %1410 = vrot.lane.b32.xlu0 %v1406_v12, %s3283_s9  ;;  %1396 = vrot.lane.b32.xlu1 %v1392_v17, %s3278_s15 }
 0x276   : > { %1398 = vrot.lane.b32.xlu2 %v1393_v13, %s3278_s15 }
 0x277   : > { %v1071_v34 = vpop.permute.xlu1 %1070  ;;  %v1085_v19 = vpop.permute.xlu0 %1084 }
 0x278   : > { %v1076_v32 = vadd.f32 %v1071_v34, %v1062_v4  ;;  %v1149_v20 = vpop.permute.xlu2 %1148  ;;  %v3052_v4 = vld [vmem:[#allocation4 + $0x24] sm:$0xff] }
 0x279   : > { %v1485_v30 = vmul.f32 %v1483_v50, %v3052_v4  ;;  %v1499_v13 = vmul.f32 %v1497_v52, %v3052_v4 }
 0x27a   : > { %v1090_v9 = vadd.f32 %v1085_v19, %v1076_v32  ;;  %v1294_v19 = vmul.f32 %v1293_v35, %v2956_v51 }
 0x27c   : > { %v1104_v59 = vadd.f32 %v1099_v55, %v1090_v9 }
 0x27d   : > { %1426 = vrot.lane.b32.xlu0 %v1421_v37, %s3277_s4  ;;  %1412 = vrot.lane.b32.xlu1 %v1407_v3, %s3283_s9  ;;  %v1539_v3 = vstv %s3062_s19 }
 0x27e   : > { %v3020_v1 = vadd.f32 %v1104_v59, %v2971_v44  ;;  %1424 = vrot.lane.b32.xlu2 %v1420_v27, %s3277_s4  ;;  %v1435_v44 = vmul.f32 %v1433_v5, %v3004_v56  ;;  %v1525_v59 = vstv %s1994_s3  ;;  %v1540_v51 = vmul.f32 %v1539_v3, %v3047_v18 }
 0x27f   : > { %v1087_v24 = vpop.permute.xlu1 %1086  ;;  %v1101_v26 = vpop.permute.xlu0 %1100 }
 0x280   : > { %v1091_v41 = vadd.f32 %v1087_v24, %v1077_v0  ;;  %v1165_v58 = vpop.permute.xlu2 %1164  ;;  %v1295_v24 = vmul.f32 %v1293_v35, %v2959_v2 }
 0x282   : > { %v1105_v31 = vadd.f32 %v1101_v26, %v1091_v41  ;;  %v1526_v26 = vmul.f32 %v1525_v59, %v3047_v18  ;;  %v1527_v41 = vmul.f32 %v1525_v59, %v3052_v4 }
 0x284   : > { %v3027_v14 = vadd.f32 %v1105_v31, %v2978_v47  ;;  %v1463_v47 = vmul.f32 %v1461_v36, %v3004_v56 }
 0x285   : > { %1452 = vrot.lane.b32.xlu0 %v1448_v33, %s3279_s1  ;;  %1438 = vrot.lane.b32.xlu1 %v1434_v38, %s3282_s21  ;;  %v1553_v38 = vstv %s1996_s5  ;;  %s2146_s5 = sshra.s32 %s1813_s13, 4  ;;  %s2147_s5 = int_to_ptr.hbm [resolvable:$true] %s2146_s5 }
 0x286   : > { %1440 = vrot.lane.b32.xlu2 %v1435_v44, %s3282_s21  ;;  %p2153_p5 = scmp.lt.s32.totalorder %s2147_s5, %s3294_s28 }
 0x287   : > { %v1121_v53 = vpop.permute.xlu1 %1120  ;;  %v1135_v16 = vpop.permute.xlu0 %1134 }
 0x288   : > { %v1126_v42 = vadd.f32 %v1121_v53, %v1110_v60  ;;  %v1191_v23 = vpop.permute.xlu2 %1190  ;;  %v1555_v60 = vmul.f32 %v1553_v38, %v3052_v4  ;;  %v1541_v53 = vmul.f32 %v1539_v3, %v3052_v4 }
 0x28a   : > { %v1140_v15 = vadd.f32 %v1135_v16, %v1126_v42  ;;  %v1554_v16 = vmul.f32 %v1553_v38, %v3047_v18 }
 0x28c   : > { %v1154_v39 = vadd.f32 %v1149_v20, %v1140_v15 }
 0x28d   : > { %1468 = vrot.lane.b32.xlu0 %v1463_v47, %s3281_s11  ;;  %1454 = vrot.lane.b32.xlu1 %v1449_v40, %s3279_s1  ;;  %v3092_v47 = vld [vmem:[#allocation4 + $0x1e] sm:$0xff]  ;;  %v1667_v40 = vstv %s3083_s14 }
 0x28e   : > { %1466 = vrot.lane.b32.xlu2 %v1462_v57, %s3281_s11  ;;  %v3095_v57 = vld [vmem:[#allocation4 + $0x1d] sm:$0xff] }
 0x28f   : > { %v1137_v49 = vpop.permute.xlu1 %1136  ;;  %v1151_v54 = vpop.permute.xlu0 %1150 }
 0x290   : > { %v1141_v55 = vadd.f32 %v1137_v49, %v3002_v48  ;;  %v1215_v46 = vpop.permute.xlu2 %1214  ;;  %v1511_v48 = vstv %s1993_s30  ;;  %v3101_v49 = vld [vmem:[#allocation4 + $0x25] sm:$0xff] }
 0x291   : > { %v3050_v43 = vadd.f32 %v1215_v46, %v1203_v22  ;;  %v1513_v17 = vmul.f32 %v1511_v48, %v3052_v4  ;;  %v1512_v34 = vmul.f32 %v1511_v48, %v3047_v18 }
 0x292   : > { %v1155_v28 = vadd.f32 %v1151_v54, %v1141_v55  ;;  %v1668_v54 = vmul.f32 %v1667_v40, %v3092_v47 }
 0x294   : > { %v1169_v11 = vadd.f32 %v1165_v58, %v1155_v28 }
 0x295   : > { %1502 = vrot.lane.b32.xlu0 %v1498_v10, %s3283_s9  ;;  %1488 = vrot.lane.b32.xlu1 %v1484_v29, %s3278_s15  ;;  %v3111_v29 = vld [vmem:[#allocation4 + $0x26] sm:$0xff] }
 0x296   : > { %1490 = vrot.lane.b32.xlu2 %v1485_v30, %s3278_s15  ;;  %v1589_v30 = vstv %s1999_s12  ;;  %s2152_s12 = scalar_lea.hbm %s3294_s28, 32 }
 0x297   : > { %v1163_v61 = vpop.permute.xlu1 %1162  ;;  %v1177_v62 = vpop.permute.xlu0 %1176  ;;  %v1590_v48 = vmul.f32 %v1589_v30, %v3095_v57 }
 0x298   : > { %v1168_v6 = vadd.f32 %v1163_v61, %v1154_v39  ;;  %v1241_v21 = vpop.permute.xlu2 %1240  ;;  %v1575_v39 = vstv %s1998_s10  ;;  %s2148_s10 = scalar_lea.hbm %s2147_s5, 16 }
 0x299   : > { %v1576_v55 = vmul.f32 %v1575_v39, %v3095_v57  ;;  %v1577_v46 = vmul.f32 %v1575_v39, %v3101_v49  ;;  %p2149_p1 = scmp.ne.s32.totalorder %s2147_s5, %s2148_s10  ;;  %p2154_p6 = scmp.lt.s32.totalorder %s2152_s12, %s2148_s10 }
 0x29a   : > { %v1182_v12 = vadd.f32 %v1177_v62, %v1168_v6  ;;  %v1669_v62 = vmul.f32 %v1667_v40, %v3111_v29  ;;  %v1591_v6 = vmul.f32 %v1589_v30, %v3101_v49 }
 0x29b   : > { %p2150_p2 = pnand %p2149_p1, %p2297_p4  ;;  %p2155_p7 = por %p2154_p6, %p2153_p5 }
 0x29c   : > { %v1196_v0 = vadd.f32 %v1191_v23, %v1182_v12 }
 0x29d   : > { %1518 = vrot.lane.b32.xlu0 %v1513_v17, %s3277_s4  ;;  %1504 = vrot.lane.b32.xlu1 %v1499_v13, %s3283_s9  ;;  %p2151_p3 = pneg %p2150_p2 }
 0x29e   : > { %1516 = vrot.lane.b32.xlu2 %v1512_v34, %s3277_s4  ;;  %v3072_v32 = vadd.f32 %v1294_v19, %v1196_v0  ;;  %v1681_v19 = vstv %s2006_s2 }
 0x29f   : > { %v1179_v20 = vpop.permute.xlu1 %1178  ;;  %v1193_v25 = vpop.permute.xlu0 %1192  ;;  %v1683_v3 = vmul.f32 %v1681_v19, %v3111_v29  ;;  %p2156_p9 = pnand %p2155_p7, %p2151_p3 }
 0x2a0   : > { %v1183_v9 = vadd.f32 %v1179_v20, %v1169_v11  ;;  %v1257_v37 = vpop.permute.xlu2 %1256  ;;  %v1385_v11 = vstv %s3097_s17  ;;  %v1603_v20 = vstv %s3109_s6 }
 0x2a1   : > { %v1386_v35 = vmul.f32 %v1385_v11, %v2999_v63  ;;  %v1682_v63 = vmul.f32 %v1681_v19, %v3092_v47 }
 0x2a2   : > { %v1197_v27 = vadd.f32 %v1193_v25, %v1183_v9  ;;  %v1387_v9 = vmul.f32 %v1385_v11, %v3004_v56  ;;  %v1695_v56 = vstv %s2007_s22 }
 0x2a4   : > { %v1297_v58 = vadd.f32 %v1295_v24, %v1197_v27 }
 0x2a5   : > { %1544 = vrot.lane.b32.xlu0 %v1540_v51, %s3279_s1  ;;  %1530 = vrot.lane.b32.xlu1 %v1526_v26, %s3282_s21 }
 0x2a6   : > { %1532 = vrot.lane.b32.xlu2 %v1527_v41, %s3282_s21 }
 0x2a7   : > { %v1213_v5 = vpop.permute.xlu1 %1212  ;;  %v1227_v31 = vpop.permute.xlu0 %1226 }
 0x2a8   : > { %v1218_v33 = vadd.f32 %v1213_v5, %v1202_v45  ;;  %v1283_v2 = vpop.permute.xlu2 %1282  ;;  %v1697_v45 = vmul.f32 %v1695_v56, %v3111_v29  ;;  %v1696_v5 = vmul.f32 %v1695_v56, %v3092_v47 }
 0x2aa   : > { %v1232_v44 = vadd.f32 %v1227_v31, %v1218_v33 }
 0x2ac   : > { %v1246_v42 = vadd.f32 %v1241_v21, %v1232_v44 }
 0x2ad   : > { %1560 = vrot.lane.b32.xlu0 %v1555_v60, %s3281_s11  ;;  %1546 = vrot.lane.b32.xlu1 %v1541_v53, %s3279_s1  ;;  %v1709_v60 = vstv %s3132_s7 }
 0x2ae   : > { %1558 = vrot.lane.b32.xlu2 %v1554_v16, %s3281_s11 }
 0x2af   : > { %v1229_v8 = vpop.permute.xlu1 %1228  ;;  %v1243_v23 = vpop.permute.xlu0 %1242 }
 0x2b0   : > { %v1233_v36 = vadd.f32 %v1229_v8, %v3050_v43  ;;  %v1307_v15 = vpop.permute.xlu2 %1306  ;;  %v1710_v8 = vmul.f32 %v1709_v60, %v3092_v47 }
 0x2b1   : > { %v3099_v7 = vadd.f32 %v1307_v15, %v1297_v58  ;;  %v1605_v58 = vmul.f32 %v1603_v20, %v3101_v49 }
 0x2b2   : > { %v1247_v22 = vadd.f32 %v1243_v23, %v1233_v36 }
 0x2b4   : > { %v1261_v52 = vadd.f32 %v1257_v37, %v1247_v22  ;;  %v1604_v37 = vmul.f32 %v1603_v20, %v3095_v57  ;;  %v1631_v22 = vstv %s2002_s16 }
 0x2b5   : > { %1672 = vrot.lane.b32.xlu0 %v1668_v54, %s3278_s15  ;;  %1580 = vrot.lane.b32.xlu1 %v1576_v55, %s3278_s15 }
 0x2b6   : > { %1582 = vrot.lane.b32.xlu2 %v1577_v46, %s3278_s15  ;;  %v1711_v46 = vmul.f32 %v1709_v60, %v3111_v29 }
 0x2b7   : > { %v1255_v50 = vpop.permute.xlu1 %1254  ;;  %v1269_v43 = vpop.permute.xlu0 %1268 }
 0x2b8   : > { %v1260_v28 = vadd.f32 %v1255_v50, %v1246_v42  ;;  %v1333_v10 = vpop.permute.xlu2 %1332 }
 0x2ba   : > { %v1274_v61 = vadd.f32 %v1269_v43, %v1260_v28  ;;  %v1632_v43 = vmul.f32 %v1631_v22, %v3095_v57 }
 0x2bc   : > { %v1288_v21 = vadd.f32 %v1283_v2, %v1274_v61 }
 0x2bd   : > { %1674 = vrot.lane.b32.xlu1 %v1669_v62, %s3278_s15  ;;  %1596 = vrot.lane.b32.xlu0 %v1591_v6, %s3283_s9  ;;  %s2001_s15 = sld [smem:[#allocation5 + $0x58]]  ;;  %v1723_v6 = vstv %s2009_s18 }
 0x2be   : > { %1594 = vrot.lane.b32.xlu2 %v1590_v48, %s3283_s9  ;;  %v3121_v12 = vadd.f32 %v1386_v35, %v1288_v21 }
 0x2bf   : > { %v1271_v17 = vpop.permute.xlu1 %1270  ;;  %v1285_v13 = vpop.permute.xlu0 %1284 }
 0x2c0   : > { %v1275_v0 = vadd.f32 %v1271_v17, %v1261_v52  ;;  %v1349_v34 = vpop.permute.xlu2 %1348  ;;  %v1633_v52 = vmul.f32 %v1631_v22, %v3101_v49  ;;  %v1724_v17 = vmul.f32 %v1723_v6, %v3092_v47 }
 0x2c2   : > { %v1289_v25 = vadd.f32 %v1285_v13, %v1275_v0  ;;  %v1725_v13 = vmul.f32 %v1723_v6, %v3111_v29 }
 0x2c3   : > { %v1617_v44 = vstv %s2001_s15 }
 0x2c4   : > { %v1389_v59 = vadd.f32 %v1387_v9, %v1289_v25  ;;  %v1618_v42 = vmul.f32 %v1617_v44, %v3095_v57  ;;  %v1619_v23 = vmul.f32 %v1617_v44, %v3101_v49  ;;  %v1737_v9 = vstv %s2010_s20 }
 0x2c5   : > { %1686 = vrot.lane.b32.xlu1 %v1682_v63, %s3283_s9  ;;  %1608 = vrot.lane.b32.xlu0 %v1604_v37, %s3277_s4  ;;  %v1739_v37 = vmul.f32 %v1737_v9, %v3111_v29 }
 0x2c6   : > { %1688 = vrot.lane.b32.xlu2 %v1683_v3, %s3283_s9  ;;  %s3142_s9 = sld [smem:[#allocation5 + $0x4d]]  ;;  %v1738_v3 = vmul.f32 %v1737_v9, %v3092_v47 }
 0x2c7   : > { %v1305_v27 = vpop.permute.xlu1 %1304  ;;  %v1319_v24 = vpop.permute.xlu0 %1318 }
 0x2c8   : > { %v1310_v51 = vadd.f32 %v1305_v27, %v3072_v32  ;;  %v1375_v26 = vpop.permute.xlu2 %1374 }
 0x2ca   : > { %v1324_v41 = vadd.f32 %v1319_v24, %v1310_v51 }
 0x2cc   : > { %v1338_v31 = vadd.f32 %v1333_v10, %v1324_v41  ;;  %v1477_v54 = vstv %s3142_s9 }
 0x2cd   : > { %1610 = vrot.lane.b32.xlu1 %v1605_v58, %s3277_s4  ;;  %1702 = vrot.lane.b32.xlu0 %v1697_v45, %s3277_s4  ;;  %v1478_v28 = vmul.f32 %v1477_v54, %v3047_v18  ;;  %v1479_v35 = vmul.f32 %v1477_v54, %v3052_v4 }
 0x2ce   : > { %1700 = vrot.lane.b32.xlu2 %v1696_v5, %s3277_s4  ;;  %s3150_s4 = sld [smem:[#allocation5 + $0x5a]] }
 0x2cf   : > { %v1321_v32 = vpop.permute.xlu1 %1320  ;;  %v1335_v33 = vpop.permute.xlu0 %1334 }
 0x2d0   : > { %v1325_v2 = vadd.f32 %v1321_v32, %v3099_v7  ;;  %v1399_v38 = vpop.permute.xlu2 %1398 }
 0x2d1   : > { %v1403_v53 = vadd.f32 %v1399_v38, %v1389_v59 }
 0x2d2   : > { %v1339_v16 = vadd.f32 %v1335_v33, %v1325_v2 }
 0x2d4   : > { %v1353_v36 = vadd.f32 %v1349_v34, %v1339_v16  ;;  %v1645_v21 = vstv %s3150_s4 }
 0x2d5   : > { %1622 = vrot.lane.b32.xlu1 %v1618_v42, %s3282_s21  ;;  %1714 = vrot.lane.b32.xlu0 %v1710_v8, %s3282_s21  ;;  %v1646_v18 = vmul.f32 %v1645_v21, %v3095_v57  ;;  %v1647_v63 = vmul.f32 %v1645_v21, %v3101_v49 }
 0x2d6   : > { %1624 = vrot.lane.b32.xlu2 %v1619_v23, %s3282_s21 }
 0x2d7   : > { %v1347_v15 = vpop.permute.xlu1 %1346  ;;  %v1361_v40 = vpop.permute.xlu0 %1360 }
 0x2d8   : > { %v1352_v39 = vadd.f32 %v1347_v15, %v1338_v31  ;;  %v1425_v7 = vpop.permute.xlu2 %1424 }
 0x2da   : > { %v1366_v55 = vadd.f32 %v1361_v40, %v1352_v39 }
 0x2dc   : > { %v1380_v50 = vadd.f32 %v1375_v26, %v1366_v55 }
 0x2dd   : > { %1716 = vrot.lane.b32.xlu1 %v1711_v46, %s3282_s21  ;;  %1638 = vrot.lane.b32.xlu0 %v1633_v52, %s3279_s1  ;;  %s3292_s21 = sld [smem:[#allocation12_spill]] }
 0x2de   : > { %1636 = vrot.lane.b32.xlu2 %v1632_v43, %s3279_s1  ;;  %v1480_v10 = vadd.f32 %v1478_v28, %v1380_v50 }
 0x2df   : > { %v1363_v30 = vpop.permute.xlu1 %1362  ;;  %v1377_v11 = vpop.permute.xlu0 %1376 }
 0x2e0   : > { %v1367_v61 = vadd.f32 %v1363_v30, %v1353_v36  ;;  %v1441_v62 = vpop.permute.xlu2 %1440 }
 0x2e2   : > { %v1381_v48 = vadd.f32 %v1377_v11, %v1367_v61 }
 0x2e3   : > { %s170_s24 = sand.u32 1, %s3292_s21  }
 0x2e4   : > { %v1481_v0 = vadd.f32 %v1479_v35, %v1381_v48  ;;  %s1911_s25 = sshll.u32 %s170_s24, 4  ;;  %s1798_s3 = scalar_lea.sflag [#allocation6], %s170_s24 }
 0x2e5   : > { %1728 = vrot.lane.b32.xlu1 %v1724_v17, %s3279_s1  ;;  %1650 = vrot.lane.b32.xlu0 %v1646_v18, %s3281_s11  ;;  %s172_s0 = scalar_lea.vmem [#allocation8], %s1911_s25 }
 0x2e6   : > { %1730 = vrot.lane.b32.xlu2 %v1725_v13, %s3279_s1  ;;  %s1997_s1 = sld [smem:[#allocation5 + $0x54]]  ;;  %s1810_s30 = sshll.u32 %s172_s0, 4  ;;  %s1811_s30 = int_to_ptr.vmem [resolvable:$true] %s1810_s30 }
 0x2e7   : > { %v1397_v34 = vpop.permute.xlu1 %1396  ;;  %v1411_v19 = vpop.permute.xlu0 %1410 }
 0x2e8   : > { %v1402_v20 = vadd.f32 %v1397_v34, %v3121_v12  ;;  %v1467_v25 = vpop.permute.xlu2 %1466 }
 0x2ea   : > { %v1416_v4 = vadd.f32 %v1411_v19, %v1402_v20 }
 0x2ec   : > { %v1430_v59 = vadd.f32 %v1425_v7, %v1416_v4  ;;  %v1569_v32 = vstv %s1997_s1 }
 0x2ed   : > { %1652 = vrot.lane.b32.xlu1 %v1647_v63, %s3281_s11  ;;  %1744 = vrot.lane.b32.xlu0 %v1739_v37, %s3281_s11  ;;  %v1570_v38 = vmul.f32 %v1569_v32, %v3095_v57  ;;  %v1571_v23 = vmul.f32 %v1569_v32, %v3101_v49 }
 0x2ee   : > { %1742 = vrot.lane.b32.xlu2 %v1738_v3, %s3281_s11  ;;  %s2004_s11 = sld [smem:[#allocation5 + $0x5b]] }
 0x2ef   : > { %v1413_v27 = vpop.permute.xlu1 %1412  ;;  %v1427_v24 = vpop.permute.xlu0 %1426 }
 0x2f0   : > { %v1417_v51 = vadd.f32 %v1413_v27, %v1403_v53  ;;  %v1491_v12 = vpop.permute.xlu2 %1490 }
 0x2f1   : > { %v1495_v26 = vadd.f32 %v1491_v12, %v1481_v0 }
 0x2f2   : > { %v1431_v56 = vadd.f32 %v1427_v24, %v1417_v51 }
 0x2f4   : > { %v1445_v41 = vadd.f32 %v1441_v62, %v1431_v56  ;;  %v1661_v30 = vstv %s2004_s11 }
 0x2f5   : > { %v1662_v6 = vmul.f32 %v1661_v30, %v3092_v47  ;;  %v1663_v13 = vmul.f32 %v1661_v30, %v3111_v29 }
 0x2f7   : > { %v1439_v58 = vpop.permute.xlu1 %1438  ;;  %v1453_v45 = vpop.permute.xlu0 %1452 }
 0x2f8   : > { %v1444_v5 = vadd.f32 %v1439_v58, %v1430_v59  ;;  %v1517_v31 = vpop.permute.xlu2 %1516 }
 0x2fa   : > { %v1458_v33 = vadd.f32 %v1453_v45, %v1444_v5 }
 0x2fc   : > { %v1472_v2 = vadd.f32 %v1467_v25, %v1458_v33 }
 0x2fe   : > { %v1572_v44 = vadd.f32 %v1570_v38, %v1472_v2 }
 0x2ff   : > { %v1455_v60 = vpop.permute.xlu1 %1454  ;;  %v1469_v16 = vpop.permute.xlu0 %1468 }
 0x300   : > { %v1459_v42 = vadd.f32 %v1455_v60, %v1445_v41  ;;  %v1533_v8 = vpop.permute.xlu2 %1532 }
 0x302   : > { %v1473_v53 = vadd.f32 %v1469_v16, %v1459_v42 }
 0x304   : > { %v1573_v36 = vadd.f32 %v1571_v23, %v1473_v53 }
 0x307   : > { %v1489_v15 = vpop.permute.xlu1 %1488  ;;  %v1503_v40 = vpop.permute.xlu0 %1502 }
 0x308   : > { %v1559_v39 = vpop.permute.xlu2 %1558  ;;  %v1494_v7 = vadd.f32 %v1489_v15, %v1480_v10 }
 0x30a   : > { %v1508_v55 = vadd.f32 %v1503_v40, %v1494_v7 }
 0x30c   : > { %v1522_v57 = vadd.f32 %v1517_v31, %v1508_v55 }
 0x30f   : > { %v1505_v22 = vpop.permute.xlu1 %1504  ;;  %v1519_v54 = vpop.permute.xlu0 %1518 }
 0x310   : > { %v1583_v46 = vpop.permute.xlu2 %1582  ;;  %v1509_v52 = vadd.f32 %v1505_v22, %v1495_v26 }
 0x311   : > { %v1587_v32 = vadd.f32 %v1583_v46, %v1573_v36 }
 0x312   : > { %v1523_v11 = vadd.f32 %v1519_v54, %v1509_v52 }
 0x314   : > { %v1537_v21 = vadd.f32 %v1533_v8, %v1523_v11 }
 0x317   : > { %v1531_v50 = vpop.permute.xlu1 %1530  ;;  %v1545_v43 = vpop.permute.xlu0 %1544 }
 0x318   : > { %v1536_v28 = vadd.f32 %v1531_v50, %v1522_v57  ;;  %v1595_v62 = vpop.permute.xlu2 %1594 }
 0x31a   : > { %v1550_v61 = vadd.f32 %v1545_v43, %v1536_v28 }
 0x31c   : > { %v1564_v49 = vadd.f32 %v1559_v39, %v1550_v61 }
 0x31e   : > { %v1664_v48 = vadd.f32 %v1662_v6, %v1564_v49 }
 0x31f   : > { %v1547_v10 = vpop.permute.xlu1 %1546  ;;  %v1561_v35 = vpop.permute.xlu0 %1560 }
 0x320   : > { %v1551_v17 = vadd.f32 %v1547_v10, %v1537_v21  ;;  %v1689_v34 = vpop.permute.xlu2 %1688 }
 0x322   : > { %v1565_v18 = vadd.f32 %v1561_v35, %v1551_v17 }
 0x324   : > { %v1665_v0 = vadd.f32 %v1663_v13, %v1565_v18 }
 0x327   : > { %v1581_v19 = vpop.permute.xlu1 %1580  ;;  %v1673_v20 = vpop.permute.xlu0 %1672 }
 0x328   : > { %v1701_v4 = vpop.permute.xlu2 %1700  ;;  %v1586_v12 = vadd.f32 %v1581_v19, %v1572_v44  ;;  %v1678_v26 = vadd.f32 %v1673_v20, %v1664_v48 }
 0x32a   : > { %v1600_v45 = vadd.f32 %v1595_v62, %v1586_v12 }
 0x32f   : > { %v1675_v25 = vpop.permute.xlu1 %1674  ;;  %v1597_v9 = vpop.permute.xlu0 %1596 }
 0x330   : > { %v1625_v3 = vpop.permute.xlu2 %1624  ;;  %v1679_v5 = vadd.f32 %v1675_v25, %v1665_v0  ;;  %v1601_v38 = vadd.f32 %v1597_v9, %v1587_v32 }
 0x332   : > { %v1693_v60 = vadd.f32 %v1689_v34, %v1679_v5 }
 0x337   : > { %v1687_v63 = vpop.permute.xlu1 %1686  ;;  %v1609_v37 = vpop.permute.xlu0 %1608 }
 0x338   : > { %v1637_v27 = vpop.permute.xlu2 %1636  ;;  %v1692_v58 = vadd.f32 %v1687_v63, %v1678_v26  ;;  %v1614_v31 = vadd.f32 %v1609_v37, %v1600_v45 }
 0x33a   : > { %v1706_v2 = vadd.f32 %v1701_v4, %v1692_v58 }
 0x33f   : > { %v1611_v59 = vpop.permute.xlu1 %1610  ;;  %v1703_v47 = vpop.permute.xlu0 %1702 }
 0x340   : > { %v1731_v56 = vpop.permute.xlu2 %1730  ;;  %v1615_v53 = vadd.f32 %v1611_v59, %v1601_v38  ;;  %v1707_v23 = vadd.f32 %v1703_v47, %v1693_v60 }
 0x342   : > { %v1629_v54 = vadd.f32 %v1625_v3, %v1615_v53 }
 0x347   : > { %v1623_v24 = vpop.permute.xlu1 %1622  ;;  %v1715_v51 = vpop.permute.xlu0 %1714 }
 0x348   : > { %v1628_v33 = vadd.f32 %v1623_v24, %v1614_v31  ;;  %v1720_v16 = vadd.f32 %v1715_v51, %v1706_v2  ;;  %v1743_v40 = vpop.permute.xlu2 %1742 }
 0x34a   : > { %v1642_v44 = vadd.f32 %v1637_v27, %v1628_v33 }
 0x34f   : > { %v1717_v41 = vpop.permute.xlu1 %1716  ;;  %v1639_v29 = vpop.permute.xlu0 %1638 }
 0x350   : > { %v1721_v39 = vadd.f32 %v1717_v41, %v1707_v23  ;;  %v1643_v52 = vadd.f32 %v1639_v29, %v1629_v54 }
 0x352   : > { %v1735_v46 = vadd.f32 %v1731_v56, %v1721_v39 }
 0x357   : > { %v1729_v42 = vpop.permute.xlu1 %1728  ;;  %v1651_v8 = vpop.permute.xlu0 %1650 }
 0x358   : > { %v1734_v15 = vadd.f32 %v1729_v42, %v1720_v16  ;;  %v1656_v22 = vadd.f32 %v1651_v8, %v1642_v44 }
 0x35a   : > { %v1748_v7 = vadd.f32 %v1743_v40, %v1734_v15 }
 0x35c   : > { %v1752_v55 = vadd.f32 %v1748_v7, %v1656_v22 }
 0x35e   : > { %v1754_v36 = vadd.f32 %v1752_v55, %v3020_v1 }
 0x35f   : > { %v1653_v57 = vpop.permute.xlu1 %1652  ;;  %v1745_v50 = vpop.permute.xlu0 %1744 }
 0x360   : > { %v1756_v43 = vsub.f32 0.0, %v1754_v36  ;;  %v1657_v28 = vadd.f32 %v1653_v57, %v1643_v52  ;;  %v1749_v30 = vadd.f32 %v1745_v50, %v1735_v46 }
 0x362   : > { %v1758_v11 = vmul.f32 1.442695, %v1756_v43  ;;  %v1753_v61 = vadd.f32 %v1749_v30, %v1657_v28 }
 0x364   : > { %2109 = vpow2.f32 %v1758_v11  ;;  %v1755_v62 = vadd.f32 %v1753_v61, %v3027_v14 }
 0x366   : > { %v1757_v49 = vsub.f32 0.0, %v1755_v62 }
 0x368   : > { %v1760_v6 = vmul.f32 1.442695, %v1757_v49 }
 0x36a   : > { %v2110_v21 = vpop.eup %2109  ;;  %2111 = vpow2.f32 %v1760_v6 }
 0x36b   : > { %v1762_v48 = vadd.f32 1.0, %v2110_v21 }
 0x36d   : > { %2113 = vrcp.f32 %v1762_v48  ;;  %v1775_v13 = vand.u32 2147483648, %v1762_v48  ;;  %v1773_v14 = vand.u32 2147483647, %v1762_v48  ;;  %vm1769_vm7 = vweird.f32 %v1762_v48 }
 0x36f   : > { %v1776_v25 = vor.u32 1.1754944e-38, %v1775_v13  ;;  %vm1774_vm10 = vcmp.eq.f32.partialorder %v1773_v14, 8.507059e+37 }
 0x370   : > { %v2112_v1 = vpop.eup %2111 }
 0x371   : > { %v1763_v10 = vadd.f32 1.0, %v2112_v1 }
 0x373   : > { %v2114_v35 = vpop.eup %2113  ;;  %2115 = vrcp.f32 %v1763_v10  ;;  %v1790_v37 = vand.u32 2147483648, %v1763_v10  ;;  %v1788_v59 = vand.u32 2147483647, %v1763_v10  ;;  %vm1784_vm12 = vweird.f32 %v1763_v10 }
 0x374   : > { %v1765_v17 = vmul.f32 %v2114_v35, %v1762_v48  ;;  %vm1770_vm6 = vweird.f32 %v2114_v35 }
 0x375   : > { %vm1771_vm8 = vmor %vm1769_vm7, %vm1770_vm6  ;;  %v1791_v27 = vor.u32 1.1754944e-38, %v1790_v37  ;;  %vm1789_vm14 = vcmp.eq.f32.partialorder %v1788_v59, 8.507059e+37 }
 0x376   : > { %v1766_v18 = vsub.f32 1.0, %v1765_v17 }
 0x378   : > { %v1767_v0 = vmul.f32 %v2114_v35, %v1766_v18 }
 0x379   : > { %v2116_v34 = vpop.eup %2115 }
 0x37a   : > { %v1780_v19 = vmul.f32 %v2116_v34, %v1763_v10  ;;  %v1768_v20 = vadd.f32 %v2114_v35, %v1767_v0  ;;  %vm1785_vm11 = vweird.f32 %v2116_v34 }
 0x37b   : > { %vm1786_vm13 = vmor %vm1784_vm12, %vm1785_vm11 }
 0x37c   : > { %v1781_v9 = vsub.f32 1.0, %v1780_v19  ;;  %v1772_v4 = vsel %vm1771_vm8, %v2114_v35, %v1768_v20 }
 0x37d   : > { %v1777_v63 = vsel %vm1774_vm10, %v1776_v25, %v1772_v4 }
 0x37e   : > { %v1782_v3 = vmul.f32 %v2116_v34, %v1781_v9  ;;  %1795 = vst.msk [vmem:[%s172_s0] sm:$0xff] %vm1794_vm9, %v1777_v63 }
 0x380   : > { %v1783_v47 = vadd.f32 %v2116_v34, %v1782_v3 }
 0x382   : > { %v1787_v24 = vsel %vm1786_vm13, %v2116_v34, %v1783_v47 }
 0x383   : > { %v1792_v51 = vsel %vm1789_vm14, %v1791_v27, %v1787_v24 }
 0x384   : > { %1796 = vst.msk [vmem:[%s172_s0 + $0x8] sm:$0xff] %vm1794_vm9, %v1792_v51 }
 0x385   : > { %2159 = shalt.err (!%p2156_p9)
}
 0x386   : > { %s2240_s22 = smov 128   ;;  %s2241_s15 = smov 8  }
 0x387   : > { %2022 = dma.vmem_to_hbm [thread:$0]  (%p2297_p4), %s1811_s30, 256, %s1813_s13, %s1798_s3, %s2240_s22, %s2240_s22, %s2241_s15  }
 0x388 PF: > { %s3296_s7 = sld [smem:[#allocation16_spill]] }
 0x389   : > { %s3297_s9 = sld [smem:[#allocation11_spill]] }
 0x38e   : > { %p2034_p10 = scmp.ge.s32.totalorder %s3296_s7, 2 }
 0x38f   : > { %s1827_s4 = sand.u32 1, %s3297_s9  }
 0x390   : > { %p2029_p11 = pnand %p2034_p10, %p2304_p8  ;;  %s1828_s18 = scalar_lea.sflag [#allocation6], %s1827_s4 }
 0x392   : > { %p2030_p12 = pneg %p2029_p11 }
 0x394   : > { %2189 = dma.done.wait (%p2030_p12), %s1828_s18, 256  }
 0x395   : > { %2191 = vsyncadd (%p2030_p12), %s1828_s18, 4294967040  ;;  %s16_s14 = sadd.s32 1, %s3296_s7   ;;  %s3299_s9 = sld [smem:[#allocation12_spill]] }
 0x396   : > { %p13_p13 = scmp.ge.s32.totalorder %s16_s14, 4   ;;  %s3300_s10 = sld [smem:[#allocation13_spill]] }
 0x397   : > { %s3301_s11 = sld [smem:[#allocation20_spill]] }
 0x398   : > { %s3302_s12 = sld [smem:[#allocation15_spill]]  ;;  %15 = sbr.rel (!%p13_p13) target bundleno = 9 (0x9), region = 77 }
 0x399   : > { %s3303_s13 = sld [smem:[#allocation17_spill]] }
 0x39d   :  { %1834 = vsyncpa [#allocation6], 1 }
 0x39e   :  { %1836 = vsyncpa [#allocation6 + $0x1], 1 }
 0x39f   :  { %1837 = vsyncpa [#allocation7], 1 }
 0x3a0   :  { %1839 = vsyncpa [#allocation7 + $0x1], 1 }

</bundles_post_ra>
